<compile_context>
chip_gen: v5e
topology: v5e:2x2
jax: 0.10.0
libtpu: 0.0.40
codegen_flags: <defaults>
</compile_context>

<pallas_src>
import functools
import math

import jax
import jax.numpy as jnp
from jax import lax
from jax.experimental import pallas as pl
from jax.experimental.pallas import tpu as pltpu

LN_EPS = 1e-12        # BertConfig default layer_norm_eps
MASK_VALUE = -1e9     # additive attention / padded-vocab mask value (f32)


def _layernorm(x, gamma, beta):
    mean = jnp.mean(x, axis=-1, keepdims=True)
    var = jnp.mean((x - mean) ** 2, axis=-1, keepdims=True)
    return (x - mean) * lax.rsqrt(var + LN_EPS) * gamma + beta


def _vmem_limit_bytes():
    # Generation-dependent scoped-VMEM limit with ~25% headroom for Mosaic
    # internal scratch: ~48 MiB on v7x (64 MiB physical), 96 MiB on v5e/v6e.
    try:
        info = pltpu.get_tpu_info()
        cap = getattr(info, "vmem_capacity_bytes", None) or 128 * 1024 * 1024
    except Exception:
        cap = 128 * 1024 * 1024
    return int(min((cap * 3) // 4, 96 * 1024 * 1024))


def _row_tile(R, pref=512):
    if R <= pref:
        return R
    for t in (pref, 256, 128):
        if R % t == 0:
            return t
    return R


def _vocab_tile(Vp):
    for t in (2048, 1024, 512, 256, 128):
        if Vp >= t and Vp % t == 0:
            return t
    return Vp


# Grid-invariant (constant) blocks: single-buffer them when the running JAX
# supports pipeline_mode; otherwise fall back to default double-buffering.
_SINGLE_BUF = {"enabled": hasattr(pl, "Buffered")}


def _const_spec(shape):
    index_map = lambda *args: (0,) * len(shape)
    if _SINGLE_BUF["enabled"]:
        try:
            return pl.BlockSpec(shape, index_map, pipeline_mode=pl.Buffered(1))
        except TypeError:
            _SINGLE_BUF["enabled"] = False
    return pl.BlockSpec(shape, index_map)


# ---------------------------------------------------------------------------
# Kernel 1: one BERT encoder layer (optionally fused embedding LayerNorm)
# ---------------------------------------------------------------------------
def bert_layer_kernel(x_ref, mask_ref, inln_g_ref, inln_b_ref,
                      wq_ref, bq_ref, wk_ref, bk_ref, wv_ref, bv_ref,
                      wo_ref, bo_ref, ln1g_ref, ln1b_ref,
                      wi_ref, bi_ref, wo2_ref, bo2_ref, ln2g_ref, ln2b_ref,
                      o_ref, ctx_sc, *, num_heads, fuse_input_ln):
    S = x_ref.shape[1]
    TQ, H = o_ref.shape[1], o_ref.shape[2]
    dh = H // num_heads
    scale = 1.0 / math.sqrt(dh)

    x_full = x_ref[0].astype(jnp.float32)                 # (S, H)
    if TQ == S:
        if fuse_input_ln:
            x_full = _layernorm(x_full, inln_g_ref[0], inln_b_ref[0])
        x_q = x_full
    else:
        row0 = pl.multiple_of(pl.program_id(1) * TQ, TQ)
        x_q = x_ref[0, pl.ds(row0, TQ), :].astype(jnp.float32)
        if fuse_input_ln:
            g, b = inln_g_ref[0], inln_b_ref[0]
            x_full = _layernorm(x_full, g, b)
            x_q = _layernorm(x_q, g, b)

    xb_full = x_full.astype(jnp.bfloat16)                  # MXU operands bf16
    xb_q = x_q.astype(jnp.bfloat16)

    # Full-width projections: N = H keeps the MXU output lanes full on
    # v5e/v6e/v7x.  K/V are computed once per layer (TQ == S for S <= 512).
    q = (jnp.dot(xb_q, wq_ref[...], preferred_element_type=jnp.float32)
         + bq_ref[0]) * scale
    k = jnp.dot(xb_full, wk_ref[...],
                preferred_element_type=jnp.float32) + bk_ref[0]
    v = jnp.dot(xb_full, wv_ref[...],
                preferred_element_type=jnp.float32) + bv_ref[0]
    q = q.astype(jnp.bfloat16)
    k = k.astype(jnp.bfloat16)
    v = v.astype(jnp.bfloat16)
    # xb_full / x_full are dead past this point (nothing big stays live across
    # the head loop except q/k/v and the scores of the current head).

    # additive mask, broadcast once (hoisted out of the head loop).
    mask_full = jnp.broadcast_to(mask_ref[0], (TQ, S))     # (TQ, S) f32

    # Per-head attention: static lane slices of q/k/v, context written into a
    # (TQ, H) f32 scratch so the output projection is ONE K=H matmul.
    for h in range(num_heads):
        c = slice(h * dh, (h + 1) * dh)
        s = lax.dot_general(q[:, c], k[:, c], (((1,), (1,)), ((), ())),
                            preferred_element_type=jnp.float32)    # (TQ, S)
        s = s + mask_full
        m = jnp.max(s, axis=-1, keepdims=True)
        p = jnp.exp(s - m)
        p = p * pl.reciprocal(jnp.sum(p, axis=-1, keepdims=True), approx=True)
        ctx_sc[:, c] = jnp.dot(p.astype(jnp.bfloat16), v[:, c],
                               preferred_element_type=jnp.float32)  # (TQ, dh)

    attn = jnp.dot(ctx_sc[...].astype(jnp.bfloat16), wo_ref[...],
                   preferred_element_type=jnp.float32) + bo_ref[0]

    h1 = _layernorm(x_q + attn, ln1g_ref[0], ln1b_ref[0])

    inter = jnp.dot(h1.astype(jnp.bfloat16), wi_ref[...],
                    preferred_element_type=jnp.float32) + bi_ref[0]
    # TODO(synk): HF BERT uses exact erf GELU; tanh approximation (~1e-3) used here.
    inter = jax.nn.gelu(inter, approximate=True)
    ffn = jnp.dot(inter.astype(jnp.bfloat16), wo2_ref[...],
                  preferred_element_type=jnp.float32) + bo2_ref[0]
    # TODO(synk): for BERT-large on v7x (64 MiB VMEM), stream wi/wo2 over an
    # extra "arbitrary" grid axis instead of holding the full FFN weights.
    o_ref[0] = _layernorm(h1 + ffn, ln2g_ref[0], ln2b_ref[0]).astype(o_ref.dtype)


def run_bert_layer(x, mask_add, emb_ln, p, num_heads, fuse_input_ln):
    B, S, H = x.shape
    I = p["wi"].shape[1]
    # TQ = S for S <= 512 so K/V are projected exactly once per layer.
    TQ = S if S <= 512 else (512 if S % 512 == 0 else S)
    n_s = S // TQ
    # NOTE (v7x): grid=(B, n_s) with B >= 2 keeps both TensorCores busy even
    # when n_s == 1.

    kernel = functools.partial(bert_layer_kernel, num_heads=num_heads,
                               fuse_input_ln=fuse_input_ln)

    def build():
        rep = _const_spec
        return pl.pallas_call(
            kernel,
            out_shape=jax.ShapeDtypeStruct((B, S, H), jnp.bfloat16),
            grid=(B, n_s),
            in_specs=[
                pl.BlockSpec((1, S, H), lambda b, s: (b, 0, 0)),   # x (full seq)
                pl.BlockSpec((1, 1, S), lambda b, s: (b, 0, 0)),   # additive mask
                rep((1, H)), rep((1, H)),                          # fused input LN
                rep((H, H)), rep((1, H)),                          # wq, bq
                rep((H, H)), rep((1, H)),                          # wk, bk
                rep((H, H)), rep((1, H)),                          # wv, bv
                rep((H, H)), rep((1, H)),                          # wo, bo
                rep((1, H)), rep((1, H)),                          # ln1 gamma/beta
                rep((H, I)), rep((1, I)),                          # wi, bi
                rep((I, H)), rep((1, H)),                          # wo2, bo2
                rep((1, H)), rep((1, H)),                          # ln2 gamma/beta
            ],
            out_specs=pl.BlockSpec((1, TQ, H), lambda b, s: (b, s, 0)),
            scratch_shapes=[pltpu.VMEM((TQ, H), jnp.float32)],     # per-head ctx
            compiler_params=pltpu.CompilerParams(
                dimension_semantics=("parallel", "parallel"),
                vmem_limit_bytes=_vmem_limit_bytes()),
        )

    args = (x, mask_add, emb_ln[0], emb_ln[1],
            p["wq"], p["bq"], p["wk"], p["bk"], p["wv"], p["bv"],
            p["wo"], p["bo"], p["ln1_g"], p["ln1_b"],
            p["wi"], p["bi"], p["wo2"], p["bo2"], p["ln2_g"], p["ln2_b"])
    try:
        return build()(*args)
    except Exception:
        # If single-buffered constant blocks are unsupported on this JAX/Mosaic
        # version, fall back to default double-buffering once and retry.
        if not _SINGLE_BUF["enabled"]:
            raise
        _SINGLE_BUF["enabled"] = False
        return build()(*args)


# ---------------------------------------------------------------------------
# Kernel 2: MLM head transform (dense + GELU + LayerNorm) over token rows
# ---------------------------------------------------------------------------
def mlm_transform_kernel(x_ref, w_ref, b_ref, g_ref, bt_ref, o_ref):
    h = jnp.dot(x_ref[...].astype(jnp.bfloat16), w_ref[...],
                preferred_element_type=jnp.float32) + b_ref[0]
    h = jax.nn.gelu(h, approximate=True)
    o_ref[...] = _layernorm(h, g_ref[0], bt_ref[0]).astype(o_ref.dtype)


def run_mlm_transform(x2d, w, b, g, beta):
    R, H = x2d.shape
    TR = _row_tile(R)
    return pl.pallas_call(
        mlm_transform_kernel,
        out_shape=jax.ShapeDtypeStruct((R, H), jnp.bfloat16),
        grid=(R // TR,),
        in_specs=[pl.BlockSpec((TR, H), lambda r: (r, 0)),
                  pl.BlockSpec((H, H), lambda r: (0, 0)),
                  pl.BlockSpec((1, H), lambda r: (0, 0)),
                  pl.BlockSpec((1, H), lambda r: (0, 0)),
                  pl.BlockSpec((1, H), lambda r: (0, 0))],
        out_specs=pl.BlockSpec((TR, H), lambda r: (r, 0)),
        compiler_params=pltpu.CompilerParams(
            dimension_semantics=("parallel",),
            vmem_limit_bytes=_vmem_limit_bytes()),
    )(x2d, w, b, g, beta)


# ---------------------------------------------------------------------------
# Kernel 3: tied decoder matmul to (lane-padded) vocab logits, with the
# masked-LM logsumexp + target-logit gather fused in (vocab axis "arbitrary").
# ---------------------------------------------------------------------------
def mlm_decoder_kernel(x_ref, w_ref, b_ref, lab_ref,
                       logits_ref, lse_ref, tgt_ref,
                       m_sc, l_sc, t_sc, *, vocab_size):
    v = pl.program_id(1)
    TR, TV = logits_ref.shape

    @pl.when(v == 0)
    def _():
        m_sc[...] = jnp.full_like(m_sc, -jnp.inf)
        l_sc[...] = jnp.zeros_like(l_sc)
        t_sc[...] = jnp.zeros_like(t_sc)

    z = jnp.dot(x_ref[...].astype(jnp.bfloat16), w_ref[...],
                preferred_element_type=jnp.float32) + b_ref[0]        # (TR, TV)
    logits_ref[...] = z

    col = lax.broadcasted_iota(jnp.int32, (TR, TV), 1) + v * TV
    zm = jnp.where(col < vocab_size, z, MASK_VALUE)      # mask lane-padded vocab

    # target logit gather (labels already clamped to [0, V-1] by the caller)
    t_sc[...] += jnp.sum(jnp.where(col == lab_ref[...], z, 0.0),
                         axis=-1, keepdims=True)

    # running logsumexp over the vocab tiles
    m_new = jnp.maximum(m_sc[...], jnp.max(zm, axis=-1, keepdims=True))
    l_sc[...] = (l_sc[...] * jnp.exp(m_sc[...] - m_new)
                 + jnp.sum(jnp.exp(zm - m_new), axis=-1, keepdims=True))
    m_sc[...] = m_new

    @pl.when(v == pl.num_programs(1) - 1)
    def _():
        lse_ref[...] = m_sc[...] + jnp.log(l_sc[...])
        tgt_ref[...] = t_sc[...]


def run_mlm_decoder(x2d, dec_w, dec_b, labels2d, vocab_size):
    R, H = x2d.shape
    Vp = dec_w.shape[1]                       # already padded to multiple of 128
    TR = _row_tile(R, 512)                    # larger row tile: ~2x less weight re-streaming
    TV = _vocab_tile(Vp)
    kernel = functools.partial(mlm_decoder_kernel, vocab_size=vocab_size)
    return pl.pallas_call(
        kernel,
        out_shape=(jax.ShapeDtypeStruct((R, Vp), jnp.float32),   # logits
                   jax.ShapeDtypeStruct((R, 1), jnp.float32),    # logsumexp
                   jax.ShapeDtypeStruct((R, 1), jnp.float32)),   # target logit
        grid=(R // TR, Vp // TV),
        in_specs=[pl.BlockSpec((TR, H), lambda r, v: (r, 0)),
                  pl.BlockSpec((H, TV), lambda r, v: (0, v)),
                  pl.BlockSpec((1, TV), lambda r, v: (0, v)),
                  pl.BlockSpec((TR, 1), lambda r, v: (r, 0))],
        out_specs=(pl.BlockSpec((TR, TV), lambda r, v: (r, v)),
                   pl.BlockSpec((TR, 1), lambda r, v: (r, 0)),
                   pl.BlockSpec((TR, 1), lambda r, v: (r, 0))),
        scratch_shapes=[pltpu.VMEM((TR, 1), jnp.float32),
                        pltpu.VMEM((TR, 1), jnp.float32),
                        pltpu.VMEM((TR, 1), jnp.float32)],
        compiler_params=pltpu.CompilerParams(
            dimension_semantics=("parallel", "arbitrary"),
            vmem_limit_bytes=_vmem_limit_bytes()),
    )(x2d, dec_w, dec_b, labels2d)


# ---------------------------------------------------------------------------
# Full forward (BertForMaskedLM): returns (loss, logits)
# ---------------------------------------------------------------------------
def bert_for_mlm_forward(input_ids, labels, attention_mask, params, num_heads):
    B, S = input_ids.shape
    V = params["word_emb"].shape[0]

    # --- embeddings (gather is plain-JAX glue; LayerNorm fused into layer 0).
    # token_type_ids default to zeros in HF when not passed, so only
    # token_type_emb[0] is used (matches the reference forward signature).
    emb = (params["word_emb"][input_ids]
           + params["pos_emb"][:S][None, :, :]
           + params["tok_type_emb"][0][None, None, :]).astype(jnp.float32)
    # TODO(synk): embedding / hidden / attention-prob dropout are identity at inference.
    x = emb.astype(jnp.bfloat16)              # inter-kernel activations in bf16

    # extended additive attention mask, shape (B, 1, S)
    mask_add = ((1.0 - attention_mask.astype(jnp.float32)) * MASK_VALUE
                ).reshape(B, 1, S)

    # --- encoder stack ---
    emb_ln = (params["emb_ln_g"], params["emb_ln_b"])
    for li, layer_p in enumerate(params["layers"]):
        x = run_bert_layer(x, mask_add, emb_ln, layer_p, num_heads,
                           fuse_input_ln=(li == 0))

    # --- MLM head: transform + tied decoder (with fused LSE / target gather) ---
    x2d = x.reshape(B * S, -1)
    y2d = run_mlm_transform(x2d, params["mlm_w"], params["mlm_b"],
                            params["mlm_ln_g"], params["mlm_ln_b"])

    labels_f = labels.reshape(-1)
    valid = labels_f != -100
    labels_c = jnp.clip(labels_f, 0, V - 1).astype(jnp.int32).reshape(-1, 1)
    logits_pad, lse, tgt = run_mlm_decoder(y2d, params["dec_w"], params["dec_b"],
                                           labels_c, V)
    logits = logits_pad[:, :V].reshape(B, S, V)

    # --- masked-LM cross entropy (ignore_index = -100); scalar glue only,
    # the per-row logsumexp / target logits came out of the decoder kernel. ---
    nll = jnp.where(valid, lse[:, 0] - tgt[:, 0], 0.0)
    loss = jnp.sum(nll) / jnp.maximum(jnp.sum(valid.astype(jnp.float32)), 1.0)
    return loss, logits


# ---------------------------------------------------------------------------
# Deterministic synthetic parameters + example run (small shapes)
# ---------------------------------------------------------------------------
if __name__ == "__main__":
    B, S = 2, 8                 # batch, seq length
    H = 32                      # hidden_size
    NUM_HEADS = 4               # num_attention_heads
    NUM_LAYERS = 2              # num_hidden_layers
    I = 4 * H                   # intermediate_size
    VOCAB = 64
    MAX_POS = 16

    key = jax.random.PRNGKey(0)
    keys = iter(jax.random.split(key, 256))

    def init(shape, dtype=jnp.float32):
        w = jax.random.normal(next(keys), shape, dtype=jnp.float32) * 0.02
        return w.astype(dtype)

    bf16 = jnp.bfloat16
    Vp = ((VOCAB + 127) // 128) * 128          # lane-pad vocab to multiple of 128

    word_emb = init((VOCAB, H))
    params = {
        "word_emb": word_emb,
        "pos_emb": init((MAX_POS, H)),
        "tok_type_emb": init((2, H)),
        "emb_ln_g": jnp.ones((1, H), jnp.float32),
        "emb_ln_b": jnp.zeros((1, H), jnp.float32),
        "layers": [],
        # MLM prediction head (transform + tied decoder)
        "mlm_w": init((H, H), bf16),
        "mlm_b": jnp.zeros((1, H), jnp.float32),
        "mlm_ln_g": jnp.ones((1, H), jnp.float32),
        "mlm_ln_b": jnp.zeros((1, H), jnp.float32),
        "dec_w": jnp.pad(word_emb, ((0, Vp - VOCAB), (0, 0))).T.astype(bf16),
        "dec_b": jnp.zeros((1, Vp), jnp.float32),
    }
    for _ in range(NUM_LAYERS):
        params["layers"].append({
            "wq": init((H, H), bf16), "bq": jnp.zeros((1, H), jnp.float32),
            "wk": init((H, H), bf16), "bk": jnp.zeros((1, H), jnp.float32),
            "wv": init((H, H), bf16), "bv": jnp.zeros((1, H), jnp.float32),
            "wo": init((H, H), bf16), "bo": jnp.zeros((1, H), jnp.float32),
            "ln1_g": jnp.ones((1, H), jnp.float32),
            "ln1_b": jnp.zeros((1, H), jnp.float32),
            "wi": init((H, I), bf16), "bi": jnp.zeros((1, I), jnp.float32),
            "wo2": init((I, H), bf16), "bo2": jnp.zeros((1, H), jnp.float32),
            "ln2_g": jnp.ones((1, H), jnp.float32),
            "ln2_b": jnp.zeros((1, H), jnp.float32),
        })

    input_ids = jax.random.randint(next(keys), (B, S), 0, VOCAB, dtype=jnp.int32)
    attention_mask = jnp.ones((B, S), jnp.float32).at[1, 6:].set(0.0)  # pad tail of sample 1
    labels = jnp.full((B, S), -100, dtype=jnp.int32)
    labels = labels.at[:, 2].set(input_ids[:, 2]).at[:, 5].set(input_ids[:, 5])

    loss, logits = bert_for_mlm_forward(input_ids, labels, attention_mask,
                                        params, NUM_HEADS)
    jax.block_until_ready((loss, logits))
    assert logits.shape == (B, S, VOCAB)
    assert bool(jnp.isfinite(loss))
    assert bool(jnp.all(jnp.isfinite(logits)))
    print("KERNEL_OK")
</pallas_src>

<mosaic_0001>
module attributes {stable_mosaic.version = 11 : i64} {
  func.func @bert_layer_kernel(%arg0: i32, %arg1: i32, %arg2: memref<1x8x32xbf16, #tpu.memory_space<vmem>>, %arg3: memref<1x1x8xf32, #tpu.memory_space<vmem>>, %arg4: memref<1x32xf32, #tpu.memory_space<vmem>>, %arg5: memref<1x32xf32, #tpu.memory_space<vmem>>, %arg6: memref<32x32xbf16, #tpu.memory_space<vmem>>, %arg7: memref<1x32xf32, #tpu.memory_space<vmem>>, %arg8: memref<32x32xbf16, #tpu.memory_space<vmem>>, %arg9: memref<1x32xf32, #tpu.memory_space<vmem>>, %arg10: memref<32x32xbf16, #tpu.memory_space<vmem>>, %arg11: memref<1x32xf32, #tpu.memory_space<vmem>>, %arg12: memref<32x32xbf16, #tpu.memory_space<vmem>>, %arg13: memref<1x32xf32, #tpu.memory_space<vmem>>, %arg14: memref<1x32xf32, #tpu.memory_space<vmem>>, %arg15: memref<1x32xf32, #tpu.memory_space<vmem>>, %arg16: memref<32x128xbf16, #tpu.memory_space<vmem>>, %arg17: memref<1x128xf32, #tpu.memory_space<vmem>>, %arg18: memref<128x32xbf16, #tpu.memory_space<vmem>>, %arg19: memref<1x32xf32, #tpu.memory_space<vmem>>, %arg20: memref<1x32xf32, #tpu.memory_space<vmem>>, %arg21: memref<1x32xf32, #tpu.memory_space<vmem>>, %arg22: memref<1x8x32xbf16, #tpu.memory_space<vmem>>, %arg23: memref<8x32xf32, #tpu.memory_space<vmem>>) attributes {dimension_semantics = [#tpu.dimension_semantics<parallel>, #tpu.dimension_semantics<parallel>], iteration_bounds = array<i64: 2, 1>, scalar_prefetch = 0 : i64, scratch_operands = 1 : i64, tpu.core_type = #tpu.core_type<tc>, window_params = [{transform_indices = @transform_0, window_bounds = array<i64: 1, 8, 32>}, {transform_indices = @transform_1, window_bounds = array<i64: 1, 1, 8>}, {pipeline_mode = #tpu.pipeline_mode<synchronous>, transform_indices = @transform_2, window_bounds = array<i64: 1, 32>}, {pipeline_mode = #tpu.pipeline_mode<synchronous>, transform_indices = @transform_3, window_bounds = array<i64: 1, 32>}, {pipeline_mode = #tpu.pipeline_mode<synchronous>, transform_indices = @transform_4, window_bounds = array<i64: 32, 32>}, {pipeline_mode = #tpu.pipeline_mode<synchronous>, transform_indices = @transform_5, window_bounds = array<i64: 1, 32>}, {pipeline_mode = #tpu.pipeline_mode<synchronous>, transform_indices = @transform_6, window_bounds = array<i64: 32, 32>}, {pipeline_mode = #tpu.pipeline_mode<synchronous>, transform_indices = @transform_7, window_bounds = array<i64: 1, 32>}, {pipeline_mode = #tpu.pipeline_mode<synchronous>, transform_indices = @transform_8, window_bounds = array<i64: 32, 32>}, {pipeline_mode = #tpu.pipeline_mode<synchronous>, transform_indices = @transform_9, window_bounds = array<i64: 1, 32>}, {pipeline_mode = #tpu.pipeline_mode<synchronous>, transform_indices = @transform_10, window_bounds = array<i64: 32, 32>}, {pipeline_mode = #tpu.pipeline_mode<synchronous>, transform_indices = @transform_11, window_bounds = array<i64: 1, 32>}, {pipeline_mode = #tpu.pipeline_mode<synchronous>, transform_indices = @transform_12, window_bounds = array<i64: 1, 32>}, {pipeline_mode = #tpu.pipeline_mode<synchronous>, transform_indices = @transform_13, window_bounds = array<i64: 1, 32>}, {pipeline_mode = #tpu.pipeline_mode<synchronous>, transform_indices = @transform_14, window_bounds = array<i64: 32, 128>}, {pipeline_mode = #tpu.pipeline_mode<synchronous>, transform_indices = @transform_15, window_bounds = array<i64: 1, 128>}, {pipeline_mode = #tpu.pipeline_mode<synchronous>, transform_indices = @transform_16, window_bounds = array<i64: 128, 32>}, {pipeline_mode = #tpu.pipeline_mode<synchronous>, transform_indices = @transform_17, window_bounds = array<i64: 1, 32>}, {pipeline_mode = #tpu.pipeline_mode<synchronous>, transform_indices = @transform_18, window_bounds = array<i64: 1, 32>}, {pipeline_mode = #tpu.pipeline_mode<synchronous>, transform_indices = @transform_19, window_bounds = array<i64: 1, 32>}, {transform_indices = @transform_20, window_bounds = array<i64: 1, 8, 32>}]} {
    %c0 = arith.constant 0 : index
    %c0_0 = arith.constant 0 : index
    %c0_1 = arith.constant 0 : index
    %0 = vector.load %arg2[%c0, %c0_0, %c0_1] : memref<1x8x32xbf16, #tpu.memory_space<vmem>>, vector<1x8x32xbf16>
    %1 = vector.shape_cast %0 : vector<1x8x32xbf16> to vector<8x32xbf16>
    %2 = arith.extf %1 : vector<8x32xbf16> to vector<8x32xf32>
    %c0_2 = arith.constant 0 : index
    %c0_3 = arith.constant 0 : index
    %3 = vector.load %arg4[%c0_2, %c0_3] : memref<1x32xf32, #tpu.memory_space<vmem>>, vector<1x32xf32>
    %4 = vector.shape_cast %3 : vector<1x32xf32> to vector<32xf32>
    %c0_4 = arith.constant 0 : index
    %c0_5 = arith.constant 0 : index
    %5 = vector.load %arg5[%c0_4, %c0_5] : memref<1x32xf32, #tpu.memory_space<vmem>>, vector<1x32xf32>
    %6 = vector.shape_cast %5 : vector<1x32xf32> to vector<32xf32>
    %cst = arith.constant dense<0.000000e+00> : vector<8xf32>
    %7 = vector.multi_reduction <add>, %2, %cst [1] : vector<8x32xf32> to vector<8xf32>
    %8 = vector.shape_cast %7 : vector<8xf32> to vector<8x1xf32>
    %cst_6 = arith.constant 3.200000e+01 : f32
    %9 = vector.broadcast %cst_6 : f32 to vector<8x1xf32>
    %10 = arith.divf %8, %9 : vector<8x1xf32>
    %11 = vector.broadcast %10 : vector<8x1xf32> to vector<8x32xf32>
    %12 = arith.subf %2, %11 : vector<8x32xf32>
    %13 = arith.mulf %12, %12 : vector<8x32xf32>
    %cst_7 = arith.constant dense<0.000000e+00> : vector<8xf32>
    %14 = vector.multi_reduction <add>, %13, %cst_7 [1] : vector<8x32xf32> to vector<8xf32>
    %15 = vector.shape_cast %14 : vector<8xf32> to vector<8x1xf32>
    %cst_8 = arith.constant 3.200000e+01 : f32
    %16 = vector.broadcast %cst_8 : f32 to vector<8x1xf32>
    %17 = arith.divf %15, %16 : vector<8x1xf32>
    %18 = vector.broadcast %10 : vector<8x1xf32> to vector<8x32xf32>
    %19 = arith.subf %2, %18 : vector<8x32xf32>
    %cst_9 = arith.constant 9.99999996E-13 : f32
    %20 = vector.broadcast %cst_9 : f32 to vector<8x1xf32>
    %21 = arith.addf %17, %20 : vector<8x1xf32>
    %22 = math.rsqrt %21 : vector<8x1xf32>
    %23 = vector.broadcast %22 : vector<8x1xf32> to vector<8x32xf32>
    %24 = arith.mulf %19, %23 : vector<8x32xf32>
    %25 = vector.shape_cast %4 : vector<32xf32> to vector<1x32xf32>
    %26 = vector.broadcast %25 : vector<1x32xf32> to vector<8x32xf32>
    %27 = arith.mulf %24, %26 : vector<8x32xf32>
    %28 = vector.shape_cast %6 : vector<32xf32> to vector<1x32xf32>
    %29 = vector.broadcast %28 : vector<1x32xf32> to vector<8x32xf32>
    %30 = arith.addf %27, %29 : vector<8x32xf32>
    %31 = arith.truncf %30 : vector<8x32xf32> to vector<8x32xbf16>
    %32 = arith.truncf %30 : vector<8x32xf32> to vector<8x32xbf16>
    %c0_10 = arith.constant 0 : index
    %c0_11 = arith.constant 0 : index
    %33 = vector.load %arg6[%c0_10, %c0_11] : memref<32x32xbf16, #tpu.memory_space<vmem>>, vector<32x32xbf16>
    %cst_12 = arith.constant dense<0.000000e+00> : vector<8x32xf32>
    %34 = tpu.matmul %32, %33, %cst_12 {dimension_numbers = #tpu.dot_dimension_numbers<[1], [0], [0], [1], [0, 0, 1, 1], [], []>} : vector<8x32xbf16>, vector<32x32xbf16>, vector<8x32xf32> -> vector<8x32xf32>
    %c0_13 = arith.constant 0 : index
    %c0_14 = arith.constant 0 : index
    %35 = vector.load %arg7[%c0_13, %c0_14] : memref<1x32xf32, #tpu.memory_space<vmem>>, vector<1x32xf32>
    %36 = vector.shape_cast %35 : vector<1x32xf32> to vector<32xf32>
    %37 = vector.shape_cast %36 : vector<32xf32> to vector<1x32xf32>
    %38 = vector.broadcast %37 : vector<1x32xf32> to vector<8x32xf32>
    %39 = arith.addf %34, %38 : vector<8x32xf32>
    %cst_15 = arith.constant 0.353553385 : f32
    %40 = vector.broadcast %cst_15 : f32 to vector<8x32xf32>
    %41 = arith.mulf %39, %40 : vector<8x32xf32>
    %c0_16 = arith.constant 0 : index
    %c0_17 = arith.constant 0 : index
    %42 = vector.load %arg8[%c0_16, %c0_17] : memref<32x32xbf16, #tpu.memory_space<vmem>>, vector<32x32xbf16>
    %cst_18 = arith.constant dense<0.000000e+00> : vector<8x32xf32>
    %43 = tpu.matmul %31, %42, %cst_18 {dimension_numbers = #tpu.dot_dimension_numbers<[1], [0], [0], [1], [0, 0, 1, 1], [], []>} : vector<8x32xbf16>, vector<32x32xbf16>, vector<8x32xf32> -> vector<8x32xf32>
    %c0_19 = arith.constant 0 : index
    %c0_20 = arith.constant 0 : index
    %44 = vector.load %arg9[%c0_19, %c0_20] : memref<1x32xf32, #tpu.memory_space<vmem>>, vector<1x32xf32>
    %45 = vector.shape_cast %44 : vector<1x32xf32> to vector<32xf32>
    %46 = vector.shape_cast %45 : vector<32xf32> to vector<1x32xf32>
    %47 = vector.broadcast %46 : vector<1x32xf32> to vector<8x32xf32>
    %48 = arith.addf %43, %47 : vector<8x32xf32>
    %c0_21 = arith.constant 0 : index
    %c0_22 = arith.constant 0 : index
    %49 = vector.load %arg10[%c0_21, %c0_22] : memref<32x32xbf16, #tpu.memory_space<vmem>>, vector<32x32xbf16>
    %cst_23 = arith.constant dense<0.000000e+00> : vector<8x32xf32>
    %50 = tpu.matmul %31, %49, %cst_23 {dimension_numbers = #tpu.dot_dimension_numbers<[1], [0], [0], [1], [0, 0, 1, 1], [], []>} : vector<8x32xbf16>, vector<32x32xbf16>, vector<8x32xf32> -> vector<8x32xf32>
    %c0_24 = arith.constant 0 : index
    %c0_25 = arith.constant 0 : index
    %51 = vector.load %arg11[%c0_24, %c0_25] : memref<1x32xf32, #tpu.memory_space<vmem>>, vector<1x32xf32>
    %52 = vector.shape_cast %51 : vector<1x32xf32> to vector<32xf32>
    %53 = vector.shape_cast %52 : vector<32xf32> to vector<1x32xf32>
    %54 = vector.broadcast %53 : vector<1x32xf32> to vector<8x32xf32>
    %55 = arith.addf %50, %54 : vector<8x32xf32>
    %56 = arith.truncf %41 : vector<8x32xf32> to vector<8x32xbf16>
    %57 = arith.truncf %48 : vector<8x32xf32> to vector<8x32xbf16>
    %58 = arith.truncf %55 : vector<8x32xf32> to vector<8x32xbf16>
    %c0_26 = arith.constant 0 : index
    %c0_27 = arith.constant 0 : index
    %c0_28 = arith.constant 0 : index
    %59 = vector.load %arg3[%c0_26, %c0_27, %c0_28] : memref<1x1x8xf32, #tpu.memory_space<vmem>>, vector<1x1x8xf32>
    %60 = vector.shape_cast %59 : vector<1x1x8xf32> to vector<1x8xf32>
    %61 = vector.shape_cast %60 : vector<1x8xf32> to vector<1x8xf32>
    %62 = vector.broadcast %61 : vector<1x8xf32> to vector<8x8xf32>
    %63 = vector.extract_strided_slice %56 {offsets = [0, 0], sizes = [8, 8], strides = [1, 1]} : vector<8x32xbf16> to vector<8x8xbf16>
    %64 = vector.extract_strided_slice %57 {offsets = [0, 0], sizes = [8, 8], strides = [1, 1]} : vector<8x32xbf16> to vector<8x8xbf16>
    %cst_29 = arith.constant dense<0.000000e+00> : vector<8x8xf32>
    %65 = tpu.matmul %63, %64, %cst_29 {dimension_numbers = #tpu.dot_dimension_numbers<[1], [1], [0], [0], [0, 0, 1, 0], [], []>} : vector<8x8xbf16>, vector<8x8xbf16>, vector<8x8xf32> -> vector<8x8xf32>
    %66 = arith.addf %65, %62 : vector<8x8xf32>
    %cst_30 = arith.constant dense<0xFF800000> : vector<8xf32>
    %67 = vector.multi_reduction <maximumf>, %66, %cst_30 [1] : vector<8x8xf32> to vector<8xf32>
    %68 = vector.shape_cast %67 : vector<8xf32> to vector<8x1xf32>
    %69 = vector.broadcast %68 : vector<8x1xf32> to vector<8x8xf32>
    %70 = arith.subf %66, %69 : vector<8x8xf32>
    %71 = math.exp %70 : vector<8x8xf32>
    %cst_31 = arith.constant dense<0.000000e+00> : vector<8xf32>
    %72 = vector.multi_reduction <add>, %71, %cst_31 [1] : vector<8x8xf32> to vector<8xf32>
    %73 = vector.shape_cast %72 : vector<8xf32> to vector<8x1xf32>
    %74 = tpu.reciprocal %73 {approx = true} : vector<8x1xf32> -> vector<8x1xf32>
    %75 = vector.broadcast %74 : vector<8x1xf32> to vector<8x8xf32>
    %76 = arith.mulf %71, %75 : vector<8x8xf32>
    %77 = arith.truncf %76 : vector<8x8xf32> to vector<8x8xbf16>
    %78 = vector.extract_strided_slice %58 {offsets = [0, 0], sizes = [8, 8], strides = [1, 1]} : vector<8x32xbf16> to vector<8x8xbf16>
    %cst_32 = arith.constant dense<0.000000e+00> : vector<8x8xf32>
    %79 = tpu.matmul %77, %78, %cst_32 {dimension_numbers = #tpu.dot_dimension_numbers<[1], [0], [0], [1], [0, 0, 1, 1], [], []>} : vector<8x8xbf16>, vector<8x8xbf16>, vector<8x8xf32> -> vector<8x8xf32>
    %c0_33 = arith.constant 0 : index
    %c0_34 = arith.constant 0 : index
    %80 = vector.load %arg23[%c0_33, %c0_34] : memref<8x32xf32, #tpu.memory_space<vmem>>, vector<8x8xf32>
    tpu.vector_store %arg23[%c0_33, %c0_34], %79 {strides = array<i32>} : memref<8x32xf32, #tpu.memory_space<vmem>>, vector<8x8xf32>,
    %81 = vector.extract_strided_slice %56 {offsets = [0, 8], sizes = [8, 8], strides = [1, 1]} : vector<8x32xbf16> to vector<8x8xbf16>
    %82 = vector.extract_strided_slice %57 {offsets = [0, 8], sizes = [8, 8], strides = [1, 1]} : vector<8x32xbf16> to vector<8x8xbf16>
    %cst_35 = arith.constant dense<0.000000e+00> : vector<8x8xf32>
    %83 = tpu.matmul %81, %82, %cst_35 {dimension_numbers = #tpu.dot_dimension_numbers<[1], [1], [0], [0], [0, 0, 1, 0], [], []>} : vector<8x8xbf16>, vector<8x8xbf16>, vector<8x8xf32> -> vector<8x8xf32>
    %84 = arith.addf %83, %62 : vector<8x8xf32>
    %cst_36 = arith.constant dense<0xFF800000> : vector<8xf32>
    %85 = vector.multi_reduction <maximumf>, %84, %cst_36 [1] : vector<8x8xf32> to vector<8xf32>
    %86 = vector.shape_cast %85 : vector<8xf32> to vector<8x1xf32>
    %87 = vector.broadcast %86 : vector<8x1xf32> to vector<8x8xf32>
    %88 = arith.subf %84, %87 : vector<8x8xf32>
    %89 = math.exp %88 : vector<8x8xf32>
    %cst_37 = arith.constant dense<0.000000e+00> : vector<8xf32>
    %90 = vector.multi_reduction <add>, %89, %cst_37 [1] : vector<8x8xf32> to vector<8xf32>
    %91 = vector.shape_cast %90 : vector<8xf32> to vector<8x1xf32>
    %92 = tpu.reciprocal %91 {approx = true} : vector<8x1xf32> -> vector<8x1xf32>
    %93 = vector.broadcast %92 : vector<8x1xf32> to vector<8x8xf32>
    %94 = arith.mulf %89, %93 : vector<8x8xf32>
    %95 = arith.truncf %94 : vector<8x8xf32> to vector<8x8xbf16>
    %96 = vector.extract_strided_slice %58 {offsets = [0, 8], sizes = [8, 8], strides = [1, 1]} : vector<8x32xbf16> to vector<8x8xbf16>
    %cst_38 = arith.constant dense<0.000000e+00> : vector<8x8xf32>
    %97 = tpu.matmul %95, %96, %cst_38 {dimension_numbers = #tpu.dot_dimension_numbers<[1], [0], [0], [1], [0, 0, 1, 1], [], []>} : vector<8x8xbf16>, vector<8x8xbf16>, vector<8x8xf32> -> vector<8x8xf32>
    %c0_39 = arith.constant 0 : index
    %c8 = arith.constant 8 : index
    %98 = vector.load %arg23[%c0_39, %c8] : memref<8x32xf32, #tpu.memory_space<vmem>>, vector<8x8xf32>
    tpu.vector_store %arg23[%c0_39, %c8], %97 {strides = array<i32>} : memref<8x32xf32, #tpu.memory_space<vmem>>, vector<8x8xf32>,
    %99 = vector.extract_strided_slice %56 {offsets = [0, 16], sizes = [8, 8], strides = [1, 1]} : vector<8x32xbf16> to vector<8x8xbf16>
    %100 = vector.extract_strided_slice %57 {offsets = [0, 16], sizes = [8, 8], strides = [1, 1]} : vector<8x32xbf16> to vector<8x8xbf16>
    %cst_40 = arith.constant dense<0.000000e+00> : vector<8x8xf32>
    %101 = tpu.matmul %99, %100, %cst_40 {dimension_numbers = #tpu.dot_dimension_numbers<[1], [1], [0], [0], [0, 0, 1, 0], [], []>} : vector<8x8xbf16>, vector<8x8xbf16>, vector<8x8xf32> -> vector<8x8xf32>
    %102 = arith.addf %101, %62 : vector<8x8xf32>
    %cst_41 = arith.constant dense<0xFF800000> : vector<8xf32>
    %103 = vector.multi_reduction <maximumf>, %102, %cst_41 [1] : vector<8x8xf32> to vector<8xf32>
    %104 = vector.shape_cast %103 : vector<8xf32> to vector<8x1xf32>
    %105 = vector.broadcast %104 : vector<8x1xf32> to vector<8x8xf32>
    %106 = arith.subf %102, %105 : vector<8x8xf32>
    %107 = math.exp %106 : vector<8x8xf32>
    %cst_42 = arith.constant dense<0.000000e+00> : vector<8xf32>
    %108 = vector.multi_reduction <add>, %107, %cst_42 [1] : vector<8x8xf32> to vector<8xf32>
    %109 = vector.shape_cast %108 : vector<8xf32> to vector<8x1xf32>
    %110 = tpu.reciprocal %109 {approx = true} : vector<8x1xf32> -> vector<8x1xf32>
    %111 = vector.broadcast %110 : vector<8x1xf32> to vector<8x8xf32>
    %112 = arith.mulf %107, %111 : vector<8x8xf32>
    %113 = arith.truncf %112 : vector<8x8xf32> to vector<8x8xbf16>
    %114 = vector.extract_strided_slice %58 {offsets = [0, 16], sizes = [8, 8], strides = [1, 1]} : vector<8x32xbf16> to vector<8x8xbf16>
    %cst_43 = arith.constant dense<0.000000e+00> : vector<8x8xf32>
    %115 = tpu.matmul %113, %114, %cst_43 {dimension_numbers = #tpu.dot_dimension_numbers<[1], [0], [0], [1], [0, 0, 1, 1], [], []>} : vector<8x8xbf16>, vector<8x8xbf16>, vector<8x8xf32> -> vector<8x8xf32>
    %c0_44 = arith.constant 0 : index
    %c16 = arith.constant 16 : index
    %116 = vector.load %arg23[%c0_44, %c16] : memref<8x32xf32, #tpu.memory_space<vmem>>, vector<8x8xf32>
    tpu.vector_store %arg23[%c0_44, %c16], %115 {strides = array<i32>} : memref<8x32xf32, #tpu.memory_space<vmem>>, vector<8x8xf32>,
    %117 = vector.extract_strided_slice %56 {offsets = [0, 24], sizes = [8, 8], strides = [1, 1]} : vector<8x32xbf16> to vector<8x8xbf16>
    %118 = vector.extract_strided_slice %57 {offsets = [0, 24], sizes = [8, 8], strides = [1, 1]} : vector<8x32xbf16> to vector<8x8xbf16>
    %cst_45 = arith.constant dense<0.000000e+00> : vector<8x8xf32>
    %119 = tpu.matmul %117, %118, %cst_45 {dimension_numbers = #tpu.dot_dimension_numbers<[1], [1], [0], [0], [0, 0, 1, 0], [], []>} : vector<8x8xbf16>, vector<8x8xbf16>, vector<8x8xf32> -> vector<8x8xf32>
    %120 = arith.addf %119, %62 : vector<8x8xf32>
    %cst_46 = arith.constant dense<0xFF800000> : vector<8xf32>
    %121 = vector.multi_reduction <maximumf>, %120, %cst_46 [1] : vector<8x8xf32> to vector<8xf32>
    %122 = vector.shape_cast %121 : vector<8xf32> to vector<8x1xf32>
    %123 = vector.broadcast %122 : vector<8x1xf32> to vector<8x8xf32>
    %124 = arith.subf %120, %123 : vector<8x8xf32>
    %125 = math.exp %124 : vector<8x8xf32>
    %cst_47 = arith.constant dense<0.000000e+00> : vector<8xf32>
    %126 = vector.multi_reduction <add>, %125, %cst_47 [1] : vector<8x8xf32> to vector<8xf32>
    %127 = vector.shape_cast %126 : vector<8xf32> to vector<8x1xf32>
    %128 = tpu.reciprocal %127 {approx = true} : vector<8x1xf32> -> vector<8x1xf32>
    %129 = vector.broadcast %128 : vector<8x1xf32> to vector<8x8xf32>
    %130 = arith.mulf %125, %129 : vector<8x8xf32>
    %131 = arith.truncf %130 : vector<8x8xf32> to vector<8x8xbf16>
    %132 = vector.extract_strided_slice %58 {offsets = [0, 24], sizes = [8, 8], strides = [1, 1]} : vector<8x32xbf16> to vector<8x8xbf16>
    %cst_48 = arith.constant dense<0.000000e+00> : vector<8x8xf32>
    %133 = tpu.matmul %131, %132, %cst_48 {dimension_numbers = #tpu.dot_dimension_numbers<[1], [0], [0], [1], [0, 0, 1, 1], [], []>} : vector<8x8xbf16>, vector<8x8xbf16>, vector<8x8xf32> -> vector<8x8xf32>
    %c0_49 = arith.constant 0 : index
    %c24 = arith.constant 24 : index
    %134 = vector.load %arg23[%c0_49, %c24] : memref<8x32xf32, #tpu.memory_space<vmem>>, vector<8x8xf32>
    tpu.vector_store %arg23[%c0_49, %c24], %133 {strides = array<i32>} : memref<8x32xf32, #tpu.memory_space<vmem>>, vector<8x8xf32>,
    %c0_50 = arith.constant 0 : index
    %c0_51 = arith.constant 0 : index
    %135 = vector.load %arg23[%c0_50, %c0_51] : memref<8x32xf32, #tpu.memory_space<vmem>>, vector<8x32xf32>
    %136 = arith.truncf %135 : vector<8x32xf32> to vector<8x32xbf16>
    %c0_52 = arith.constant 0 : index
    %c0_53 = arith.constant 0 : index
    %137 = vector.load %arg12[%c0_52, %c0_53] : memref<32x32xbf16, #tpu.memory_space<vmem>>, vector<32x32xbf16>
    %cst_54 = arith.constant dense<0.000000e+00> : vector<8x32xf32>
    %138 = tpu.matmul %136, %137, %cst_54 {dimension_numbers = #tpu.dot_dimension_numbers<[1], [0], [0], [1], [0, 0, 1, 1], [], []>} : vector<8x32xbf16>, vector<32x32xbf16>, vector<8x32xf32> -> vector<8x32xf32>
    %c0_55 = arith.constant 0 : index
    %c0_56 = arith.constant 0 : index
    %139 = vector.load %arg13[%c0_55, %c0_56] : memref<1x32xf32, #tpu.memory_space<vmem>>, vector<1x32xf32>
    %140 = vector.shape_cast %139 : vector<1x32xf32> to vector<32xf32>
    %141 = vector.shape_cast %140 : vector<32xf32> to vector<1x32xf32>
    %142 = vector.broadcast %141 : vector<1x32xf32> to vector<8x32xf32>
    %143 = arith.addf %138, %142 : vector<8x32xf32>
    %144 = arith.addf %30, %143 : vector<8x32xf32>
    %c0_57 = arith.constant 0 : index
    %c0_58 = arith.constant 0 : index
    %145 = vector.load %arg14[%c0_57, %c0_58] : memref<1x32xf32, #tpu.memory_space<vmem>>, vector<1x32xf32>
    %146 = vector.shape_cast %145 : vector<1x32xf32> to vector<32xf32>
    %c0_59 = arith.constant 0 : index
    %c0_60 = arith.constant 0 : index
    %147 = vector.load %arg15[%c0_59, %c0_60] : memref<1x32xf32, #tpu.memory_space<vmem>>, vector<1x32xf32>
    %148 = vector.shape_cast %147 : vector<1x32xf32> to vector<32xf32>
    %cst_61 = arith.constant dense<0.000000e+00> : vector<8xf32>
    %149 = vector.multi_reduction <add>, %144, %cst_61 [1] : vector<8x32xf32> to vector<8xf32>
    %150 = vector.shape_cast %149 : vector<8xf32> to vector<8x1xf32>
    %cst_62 = arith.constant 3.200000e+01 : f32
    %151 = vector.broadcast %cst_62 : f32 to vector<8x1xf32>
    %152 = arith.divf %150, %151 : vector<8x1xf32>
    %153 = vector.broadcast %152 : vector<8x1xf32> to vector<8x32xf32>
    %154 = arith.subf %144, %153 : vector<8x32xf32>
    %155 = arith.mulf %154, %154 : vector<8x32xf32>
    %cst_63 = arith.constant dense<0.000000e+00> : vector<8xf32>
    %156 = vector.multi_reduction <add>, %155, %cst_63 [1] : vector<8x32xf32> to vector<8xf32>
    %157 = vector.shape_cast %156 : vector<8xf32> to vector<8x1xf32>
    %cst_64 = arith.constant 3.200000e+01 : f32
    %158 = vector.broadcast %cst_64 : f32 to vector<8x1xf32>
    %159 = arith.divf %157, %158 : vector<8x1xf32>
    %160 = vector.broadcast %152 : vector<8x1xf32> to vector<8x32xf32>
    %161 = arith.subf %144, %160 : vector<8x32xf32>
    %cst_65 = arith.constant 9.99999996E-13 : f32
    %162 = vector.broadcast %cst_65 : f32 to vector<8x1xf32>
    %163 = arith.addf %159, %162 : vector<8x1xf32>
    %164 = math.rsqrt %163 : vector<8x1xf32>
    %165 = vector.broadcast %164 : vector<8x1xf32> to vector<8x32xf32>
    %166 = arith.mulf %161, %165 : vector<8x32xf32>
    %167 = vector.shape_cast %146 : vector<32xf32> to vector<1x32xf32>
    %168 = vector.broadcast %167 : vector<1x32xf32> to vector<8x32xf32>
    %169 = arith.mulf %166, %168 : vector<8x32xf32>
    %170 = vector.shape_cast %148 : vector<32xf32> to vector<1x32xf32>
    %171 = vector.broadcast %170 : vector<1x32xf32> to vector<8x32xf32>
    %172 = arith.addf %169, %171 : vector<8x32xf32>
    %173 = arith.truncf %172 : vector<8x32xf32> to vector<8x32xbf16>
    %c0_66 = arith.constant 0 : index
    %c0_67 = arith.constant 0 : index
    %174 = vector.load %arg16[%c0_66, %c0_67] : memref<32x128xbf16, #tpu.memory_space<vmem>>, vector<32x128xbf16>
    %cst_68 = arith.constant dense<0.000000e+00> : vector<8x128xf32>
    %175 = tpu.matmul %173, %174, %cst_68 {dimension_numbers = #tpu.dot_dimension_numbers<[1], [0], [0], [1], [0, 0, 1, 1], [], []>} : vector<8x32xbf16>, vector<32x128xbf16>, vector<8x128xf32> -> vector<8x128xf32>
    %c0_69 = arith.constant 0 : index
    %c0_70 = arith.constant 0 : index
    %176 = vector.load %arg17[%c0_69, %c0_70] : memref<1x128xf32, #tpu.memory_space<vmem>>, vector<1x128xf32>
    %177 = vector.shape_cast %176 : vector<1x128xf32> to vector<128xf32>
    %178 = vector.shape_cast %177 : vector<128xf32> to vector<1x128xf32>
    %179 = vector.broadcast %178 : vector<1x128xf32> to vector<8x128xf32>
    %180 = arith.addf %175, %179 : vector<8x128xf32>
    %181 = arith.mulf %180, %180 : vector<8x128xf32>
    %182 = arith.mulf %180, %181 : vector<8x128xf32>
    %cst_71 = arith.constant 4.471500e-02 : f32
    %183 = vector.broadcast %cst_71 : f32 to vector<8x128xf32>
    %184 = arith.mulf %183, %182 : vector<8x128xf32>
    %185 = arith.addf %180, %184 : vector<8x128xf32>
    %cst_72 = arith.constant 0.797884583 : f32
    %186 = vector.broadcast %cst_72 : f32 to vector<8x128xf32>
    %187 = arith.mulf %186, %185 : vector<8x128xf32>
    %188 = math.tanh %187 : vector<8x128xf32>
    %cst_73 = arith.constant 1.000000e+00 : f32
    %189 = vector.broadcast %cst_73 : f32 to vector<8x128xf32>
    %190 = arith.addf %189, %188 : vector<8x128xf32>
    %cst_74 = arith.constant 5.000000e-01 : f32
    %191 = vector.broadcast %cst_74 : f32 to vector<8x128xf32>
    %192 = arith.mulf %191, %190 : vector<8x128xf32>
    %193 = arith.mulf %180, %192 : vector<8x128xf32>
    %194 = arith.truncf %193 : vector<8x128xf32> to vector<8x128xbf16>
    %c0_75 = arith.constant 0 : index
    %c0_76 = arith.constant 0 : index
    %195 = vector.load %arg18[%c0_75, %c0_76] : memref<128x32xbf16, #tpu.memory_space<vmem>>, vector<128x32xbf16>
    %cst_77 = arith.constant dense<0.000000e+00> : vector<8x32xf32>
    %196 = tpu.matmul %194, %195, %cst_77 {dimension_numbers = #tpu.dot_dimension_numbers<[1], [0], [0], [1], [0, 0, 1, 1], [], []>} : vector<8x128xbf16>, vector<128x32xbf16>, vector<8x32xf32> -> vector<8x32xf32>
    %c0_78 = arith.constant 0 : index
    %c0_79 = arith.constant 0 : index
    %197 = vector.load %arg19[%c0_78, %c0_79] : memref<1x32xf32, #tpu.memory_space<vmem>>, vector<1x32xf32>
    %198 = vector.shape_cast %197 : vector<1x32xf32> to vector<32xf32>
    %199 = vector.shape_cast %198 : vector<32xf32> to vector<1x32xf32>
    %200 = vector.broadcast %199 : vector<1x32xf32> to vector<8x32xf32>
    %201 = arith.addf %196, %200 : vector<8x32xf32>
    %202 = arith.addf %172, %201 : vector<8x32xf32>
    %c0_80 = arith.constant 0 : index
    %c0_81 = arith.constant 0 : index
    %203 = vector.load %arg20[%c0_80, %c0_81] : memref<1x32xf32, #tpu.memory_space<vmem>>, vector<1x32xf32>
    %204 = vector.shape_cast %203 : vector<1x32xf32> to vector<32xf32>
    %c0_82 = arith.constant 0 : index
    %c0_83 = arith.constant 0 : index
    %205 = vector.load %arg21[%c0_82, %c0_83] : memref<1x32xf32, #tpu.memory_space<vmem>>, vector<1x32xf32>
    %206 = vector.shape_cast %205 : vector<1x32xf32> to vector<32xf32>
    %cst_84 = arith.constant dense<0.000000e+00> : vector<8xf32>
    %207 = vector.multi_reduction <add>, %202, %cst_84 [1] : vector<8x32xf32> to vector<8xf32>
    %208 = vector.shape_cast %207 : vector<8xf32> to vector<8x1xf32>
    %cst_85 = arith.constant 3.200000e+01 : f32
    %209 = vector.broadcast %cst_85 : f32 to vector<8x1xf32>
    %210 = arith.divf %208, %209 : vector<8x1xf32>
    %211 = vector.broadcast %210 : vector<8x1xf32> to vector<8x32xf32>
    %212 = arith.subf %202, %211 : vector<8x32xf32>
    %213 = arith.mulf %212, %212 : vector<8x32xf32>
    %cst_86 = arith.constant dense<0.000000e+00> : vector<8xf32>
    %214 = vector.multi_reduction <add>, %213, %cst_86 [1] : vector<8x32xf32> to vector<8xf32>
    %215 = vector.shape_cast %214 : vector<8xf32> to vector<8x1xf32>
    %cst_87 = arith.constant 3.200000e+01 : f32
    %216 = vector.broadcast %cst_87 : f32 to vector<8x1xf32>
    %217 = arith.divf %215, %216 : vector<8x1xf32>
    %218 = vector.broadcast %210 : vector<8x1xf32> to vector<8x32xf32>
    %219 = arith.subf %202, %218 : vector<8x32xf32>
    %cst_88 = arith.constant 9.99999996E-13 : f32
    %220 = vector.broadcast %cst_88 : f32 to vector<8x1xf32>
    %221 = arith.addf %217, %220 : vector<8x1xf32>
    %222 = math.rsqrt %221 : vector<8x1xf32>
    %223 = vector.broadcast %222 : vector<8x1xf32> to vector<8x32xf32>
    %224 = arith.mulf %219, %223 : vector<8x32xf32>
    %225 = vector.shape_cast %204 : vector<32xf32> to vector<1x32xf32>
    %226 = vector.broadcast %225 : vector<1x32xf32> to vector<8x32xf32>
    %227 = arith.mulf %224, %226 : vector<8x32xf32>
    %228 = vector.shape_cast %206 : vector<32xf32> to vector<1x32xf32>
    %229 = vector.broadcast %228 : vector<1x32xf32> to vector<8x32xf32>
    %230 = arith.addf %227, %229 : vector<8x32xf32>
    %231 = arith.truncf %230 : vector<8x32xf32> to vector<8x32xbf16>
    %c0_89 = arith.constant 0 : index
    %c0_90 = arith.constant 0 : index
    %c0_91 = arith.constant 0 : index
    %232 = vector.load %arg22[%c0_89, %c0_90, %c0_91] : memref<1x8x32xbf16, #tpu.memory_space<vmem>>, vector<1x8x32xbf16>
    %233 = vector.shape_cast %232 : vector<1x8x32xbf16> to vector<8x32xbf16>
    %234 = vector.shape_cast %231 : vector<8x32xbf16> to vector<1x8x32xbf16>
    tpu.vector_store %arg22[%c0_89, %c0_90, %c0_91], %234 {strides = array<i32>} : memref<1x8x32xbf16, #tpu.memory_space<vmem>>, vector<1x8x32xbf16>,
    return
  }
  func.func @transform_0(%arg0: i32, %arg1: i32) -> (i32, i32, i32) {
    %c0_i32 = arith.constant 0 : i32
    %c0_i32_0 = arith.constant 0 : i32
    %c0_i32_1 = arith.constant 0 : i32
    return %arg0, %c0_i32, %c0_i32_0 : i32, i32, i32
  }
  func.func @transform_1(%arg0: i32, %arg1: i32) -> (i32, i32, i32) {
    %c0_i32 = arith.constant 0 : i32
    %c0_i32_0 = arith.constant 0 : i32
    %c0_i32_1 = arith.constant 0 : i32
    return %arg0, %c0_i32, %c0_i32_0 : i32, i32, i32
  }
  func.func @transform_2(%arg0: i32, %arg1: i32) -> (i32, i32) {
    %c0_i32 = arith.constant 0 : i32
    %c0_i32_0 = arith.constant 0 : i32
    %c0_i32_1 = arith.constant 0 : i32
    return %c0_i32, %c0_i32_0 : i32, i32
  }
  func.func @transform_3(%arg0: i32, %arg1: i32) -> (i32, i32) {
    %c0_i32 = arith.constant 0 : i32
    %c0_i32_0 = arith.constant 0 : i32
    %c0_i32_1 = arith.constant 0 : i32
    return %c0_i32, %c0_i32_0 : i32, i32
  }
  func.func @transform_4(%arg0: i32, %arg1: i32) -> (i32, i32) {
    %c0_i32 = arith.constant 0 : i32
    %c0_i32_0 = arith.constant 0 : i32
    %c0_i32_1 = arith.constant 0 : i32
    return %c0_i32, %c0_i32_0 : i32, i32
  }
  func.func @transform_5(%arg0: i32, %arg1: i32) -> (i32, i32) {
    %c0_i32 = arith.constant 0 : i32
    %c0_i32_0 = arith.constant 0 : i32
    %c0_i32_1 = arith.constant 0 : i32
    return %c0_i32, %c0_i32_0 : i32, i32
  }
  func.func @transform_6(%arg0: i32, %arg1: i32) -> (i32, i32) {
    %c0_i32 = arith.constant 0 : i32
    %c0_i32_0 = arith.constant 0 : i32
    %c0_i32_1 = arith.constant 0 : i32
    return %c0_i32, %c0_i32_0 : i32, i32
  }
  func.func @transform_7(%arg0: i32, %arg1: i32) -> (i32, i32) {
    %c0_i32 = arith.constant 0 : i32
    %c0_i32_0 = arith.constant 0 : i32
    %c0_i32_1 = arith.constant 0 : i32
    return %c0_i32, %c0_i32_0 : i32, i32
  }
  func.func @transform_8(%arg0: i32, %arg1: i32) -> (i32, i32) {
    %c0_i32 = arith.constant 0 : i32
    %c0_i32_0 = arith.constant 0 : i32
    %c0_i32_1 = arith.constant 0 : i32
    return %c0_i32, %c0_i32_0 : i32, i32
  }
  func.func @transform_9(%arg0: i32, %arg1: i32) -> (i32, i32) {
    %c0_i32 = arith.constant 0 : i32
    %c0_i32_0 = arith.constant 0 : i32
    %c0_i32_1 = arith.constant 0 : i32
    return %c0_i32, %c0_i32_0 : i32, i32
  }
  func.func @transform_10(%arg0: i32, %arg1: i32) -> (i32, i32) {
    %c0_i32 = arith.constant 0 : i32
    %c0_i32_0 = arith.constant 0 : i32
    %c0_i32_1 = arith.constant 0 : i32
    return %c0_i32, %c0_i32_0 : i32, i32
  }
  func.func @transform_11(%arg0: i32, %arg1: i32) -> (i32, i32) {
    %c0_i32 = arith.constant 0 : i32
    %c0_i32_0 = arith.constant 0 : i32
    %c0_i32_1 = arith.constant 0 : i32
    return %c0_i32, %c0_i32_0 : i32, i32
  }
  func.func @transform_12(%arg0: i32, %arg1: i32) -> (i32, i32) {
    %c0_i32 = arith.constant 0 : i32
    %c0_i32_0 = arith.constant 0 : i32
    %c0_i32_1 = arith.constant 0 : i32
    return %c0_i32, %c0_i32_0 : i32, i32
  }
  func.func @transform_13(%arg0: i32, %arg1: i32) -> (i32, i32) {
    %c0_i32 = arith.constant 0 : i32
    %c0_i32_0 = arith.constant 0 : i32
    %c0_i32_1 = arith.constant 0 : i32
    return %c0_i32, %c0_i32_0 : i32, i32
  }
  func.func @transform_14(%arg0: i32, %arg1: i32) -> (i32, i32) {
    %c0_i32 = arith.constant 0 : i32
    %c0_i32_0 = arith.constant 0 : i32
    %c0_i32_1 = arith.constant 0 : i32
    return %c0_i32, %c0_i32_0 : i32, i32
  }
  func.func @transform_15(%arg0: i32, %arg1: i32) -> (i32, i32) {
    %c0_i32 = arith.constant 0 : i32
    %c0_i32_0 = arith.constant 0 : i32
    %c0_i32_1 = arith.constant 0 : i32
    return %c0_i32, %c0_i32_0 : i32, i32
  }
  func.func @transform_16(%arg0: i32, %arg1: i32) -> (i32, i32) {
    %c0_i32 = arith.constant 0 : i32
    %c0_i32_0 = arith.constant 0 : i32
    %c0_i32_1 = arith.constant 0 : i32
    return %c0_i32, %c0_i32_0 : i32, i32
  }
  func.func @transform_17(%arg0: i32, %arg1: i32) -> (i32, i32) {
    %c0_i32 = arith.constant 0 : i32
    %c0_i32_0 = arith.constant 0 : i32
    %c0_i32_1 = arith.constant 0 : i32
    return %c0_i32, %c0_i32_0 : i32, i32
  }
  func.func @transform_18(%arg0: i32, %arg1: i32) -> (i32, i32) {
    %c0_i32 = arith.constant 0 : i32
    %c0_i32_0 = arith.constant 0 : i32
    %c0_i32_1 = arith.constant 0 : i32
    return %c0_i32, %c0_i32_0 : i32, i32
  }
  func.func @transform_19(%arg0: i32, %arg1: i32) -> (i32, i32) {
    %c0_i32 = arith.constant 0 : i32
    %c0_i32_0 = arith.constant 0 : i32
    %c0_i32_1 = arith.constant 0 : i32
    return %c0_i32, %c0_i32_0 : i32, i32
  }
  func.func @transform_20(%arg0: i32, %arg1: i32) -> (i32, i32, i32) {
    %c0_i32 = arith.constant 0 : i32
    %c0_i32_0 = arith.constant 0 : i32
    return %arg0, %arg1, %c0_i32 : i32, i32, i32
  }
}

module attributes {stable_mosaic.version = 11 : i64} {
  func.func @bert_layer_kernel(%arg0: i32, %arg1: i32, %arg2: memref<1x8x32xbf16, #tpu.memory_space<vmem>>, %arg3: memref<1x1x8xf32, #tpu.memory_space<vmem>>, %arg4: memref<1x32xf32, #tpu.memory_space<vmem>>, %arg5: memref<1x32xf32, #tpu.memory_space<vmem>>, %arg6: memref<32x32xbf16, #tpu.memory_space<vmem>>, %arg7: memref<1x32xf32, #tpu.memory_space<vmem>>, %arg8: memref<32x32xbf16, #tpu.memory_space<vmem>>, %arg9: memref<1x32xf32, #tpu.memory_space<vmem>>, %arg10: memref<32x32xbf16, #tpu.memory_space<vmem>>, %arg11: memref<1x32xf32, #tpu.memory_space<vmem>>, %arg12: memref<32x32xbf16, #tpu.memory_space<vmem>>, %arg13: memref<1x32xf32, #tpu.memory_space<vmem>>, %arg14: memref<1x32xf32, #tpu.memory_space<vmem>>, %arg15: memref<1x32xf32, #tpu.memory_space<vmem>>, %arg16: memref<32x128xbf16, #tpu.memory_space<vmem>>, %arg17: memref<1x128xf32, #tpu.memory_space<vmem>>, %arg18: memref<128x32xbf16, #tpu.memory_space<vmem>>, %arg19: memref<1x32xf32, #tpu.memory_space<vmem>>, %arg20: memref<1x32xf32, #tpu.memory_space<vmem>>, %arg21: memref<1x32xf32, #tpu.memory_space<vmem>>, %arg22: memref<1x8x32xbf16, #tpu.memory_space<vmem>>, %arg23: memref<8x32xf32, #tpu.memory_space<vmem>>) attributes {dimension_semantics = [#tpu.dimension_semantics<parallel>, #tpu.dimension_semantics<parallel>], iteration_bounds = array<i64: 2, 1>, scalar_prefetch = 0 : i64, scratch_operands = 1 : i64, tpu.core_type = #tpu.core_type<tc>, window_params = [{transform_indices = @transform_0, window_bounds = array<i64: 1, 8, 32>}, {transform_indices = @transform_1, window_bounds = array<i64: 1, 1, 8>}, {pipeline_mode = #tpu.pipeline_mode<synchronous>, transform_indices = @transform_2, window_bounds = array<i64: 1, 32>}, {pipeline_mode = #tpu.pipeline_mode<synchronous>, transform_indices = @transform_3, window_bounds = array<i64: 1, 32>}, {pipeline_mode = #tpu.pipeline_mode<synchronous>, transform_indices = @transform_4, window_bounds = array<i64: 32, 32>}, {pipeline_mode = #tpu.pipeline_mode<synchronous>, transform_indices = @transform_5, window_bounds = array<i64: 1, 32>}, {pipeline_mode = #tpu.pipeline_mode<synchronous>, transform_indices = @transform_6, window_bounds = array<i64: 32, 32>}, {pipeline_mode = #tpu.pipeline_mode<synchronous>, transform_indices = @transform_7, window_bounds = array<i64: 1, 32>}, {pipeline_mode = #tpu.pipeline_mode<synchronous>, transform_indices = @transform_8, window_bounds = array<i64: 32, 32>}, {pipeline_mode = #tpu.pipeline_mode<synchronous>, transform_indices = @transform_9, window_bounds = array<i64: 1, 32>}, {pipeline_mode = #tpu.pipeline_mode<synchronous>, transform_indices = @transform_10, window_bounds = array<i64: 32, 32>}, {pipeline_mode = #tpu.pipeline_mode<synchronous>, transform_indices = @transform_11, window_bounds = array<i64: 1, 32>}, {pipeline_mode = #tpu.pipeline_mode<synchronous>, transform_indices = @transform_12, window_bounds = array<i64: 1, 32>}, {pipeline_mode = #tpu.pipeline_mode<synchronous>, transform_indices = @transform_13, window_bounds = array<i64: 1, 32>}, {pipeline_mode = #tpu.pipeline_mode<synchronous>, transform_indices = @transform_14, window_bounds = array<i64: 32, 128>}, {pipeline_mode = #tpu.pipeline_mode<synchronous>, transform_indices = @transform_15, window_bounds = array<i64: 1, 128>}, {pipeline_mode = #tpu.pipeline_mode<synchronous>, transform_indices = @transform_16, window_bounds = array<i64: 128, 32>}, {pipeline_mode = #tpu.pipeline_mode<synchronous>, transform_indices = @transform_17, window_bounds = array<i64: 1, 32>}, {pipeline_mode = #tpu.pipeline_mode<synchronous>, transform_indices = @transform_18, window_bounds = array<i64: 1, 32>}, {pipeline_mode = #tpu.pipeline_mode<synchronous>, transform_indices = @transform_19, window_bounds = array<i64: 1, 32>}, {transform_indices = @transform_20, window_bounds = array<i64: 1, 8, 32>}]} {
    %c0 = arith.constant 0 : index
    %c0_0 = arith.constant 0 : index
    %c0_1 = arith.constant 0 : index
    %0 = vector.load %arg2[%c0, %c0_0, %c0_1] : memref<1x8x32xbf16, #tpu.memory_space<vmem>>, vector<1x8x32xbf16>
    %1 = vector.shape_cast %0 : vector<1x8x32xbf16> to vector<8x32xbf16>
    %2 = arith.extf %1 : vector<8x32xbf16> to vector<8x32xf32>
    %c0_2 = arith.constant 0 : index
    %c0_3 = arith.constant 0 : index
    %3 = vector.load %arg4[%c0_2, %c0_3] : memref<1x32xf32, #tpu.memory_space<vmem>>, vector<1x32xf32>
    %4 = vector.shape_cast %3 : vector<1x32xf32> to vector<32xf32>
    %c0_4 = arith.constant 0 : index
    %c0_5 = arith.constant 0 : index
    %5 = vector.load %arg5[%c0_4, %c0_5] : memref<1x32xf32, #tpu.memory_space<vmem>>, vector<1x32xf32>
    %6 = vector.shape_cast %5 : vector<1x32xf32> to vector<32xf32>
    %cst = arith.constant dense<0.000000e+00> : vector<8xf32>
    %7 = vector.multi_reduction <add>, %2, %cst [1] : vector<8x32xf32> to vector<8xf32>
    %8 = vector.shape_cast %7 : vector<8xf32> to vector<8x1xf32>
    %cst_6 = arith.constant 3.200000e+01 : f32
    %9 = vector.broadcast %cst_6 : f32 to vector<8x1xf32>
    %10 = arith.divf %8, %9 : vector<8x1xf32>
    %11 = vector.broadcast %10 : vector<8x1xf32> to vector<8x32xf32>
    %12 = arith.subf %2, %11 : vector<8x32xf32>
    %13 = arith.mulf %12, %12 : vector<8x32xf32>
    %cst_7 = arith.constant dense<0.000000e+00> : vector<8xf32>
    %14 = vector.multi_reduction <add>, %13, %cst_7 [1] : vector<8x32xf32> to vector<8xf32>
    %15 = vector.shape_cast %14 : vector<8xf32> to vector<8x1xf32>
    %cst_8 = arith.constant 3.200000e+01 : f32
    %16 = vector.broadcast %cst_8 : f32 to vector<8x1xf32>
    %17 = arith.divf %15, %16 : vector<8x1xf32>
    %18 = vector.broadcast %10 : vector<8x1xf32> to vector<8x32xf32>
    %19 = arith.subf %2, %18 : vector<8x32xf32>
    %cst_9 = arith.constant 9.99999996E-13 : f32
    %20 = vector.broadcast %cst_9 : f32 to vector<8x1xf32>
    %21 = arith.addf %17, %20 : vector<8x1xf32>
    %22 = math.rsqrt %21 : vector<8x1xf32>
    %23 = vector.broadcast %22 : vector<8x1xf32> to vector<8x32xf32>
    %24 = arith.mulf %19, %23 : vector<8x32xf32>
    %25 = vector.shape_cast %4 : vector<32xf32> to vector<1x32xf32>
    %26 = vector.broadcast %25 : vector<1x32xf32> to vector<8x32xf32>
    %27 = arith.mulf %24, %26 : vector<8x32xf32>
    %28 = vector.shape_cast %6 : vector<32xf32> to vector<1x32xf32>
    %29 = vector.broadcast %28 : vector<1x32xf32> to vector<8x32xf32>
    %30 = arith.addf %27, %29 : vector<8x32xf32>
    %31 = arith.truncf %30 : vector<8x32xf32> to vector<8x32xbf16>
    %32 = arith.truncf %30 : vector<8x32xf32> to vector<8x32xbf16>
    %c0_10 = arith.constant 0 : index
    %c0_11 = arith.constant 0 : index
    %33 = vector.load %arg6[%c0_10, %c0_11] : memref<32x32xbf16, #tpu.memory_space<vmem>>, vector<32x32xbf16>
    %cst_12 = arith.constant dense<0.000000e+00> : vector<8x32xf32>
    %34 = tpu.matmul %32, %33, %cst_12 {dimension_numbers = #tpu.dot_dimension_numbers<[1], [0], [0], [1], [0, 0, 1, 1], [], []>} : vector<8x32xbf16>, vector<32x32xbf16>, vector<8x32xf32> -> vector<8x32xf32>
    %c0_13 = arith.constant 0 : index
    %c0_14 = arith.constant 0 : index
    %35 = vector.load %arg7[%c0_13, %c0_14] : memref<1x32xf32, #tpu.memory_space<vmem>>, vector<1x32xf32>
    %36 = vector.shape_cast %35 : vector<1x32xf32> to vector<32xf32>
    %37 = vector.shape_cast %36 : vector<32xf32> to vector<1x32xf32>
    %38 = vector.broadcast %37 : vector<1x32xf32> to vector<8x32xf32>
    %39 = arith.addf %34, %38 : vector<8x32xf32>
    %cst_15 = arith.constant 0.353553385 : f32
    %40 = vector.broadcast %cst_15 : f32 to vector<8x32xf32>
    %41 = arith.mulf %39, %40 : vector<8x32xf32>
    %c0_16 = arith.constant 0 : index
    %c0_17 = arith.constant 0 : index
    %42 = vector.load %arg8[%c0_16, %c0_17] : memref<32x32xbf16, #tpu.memory_space<vmem>>, vector<32x32xbf16>
    %cst_18 = arith.constant dense<0.000000e+00> : vector<8x32xf32>
    %43 = tpu.matmul %31, %42, %cst_18 {dimension_numbers = #tpu.dot_dimension_numbers<[1], [0], [0], [1], [0, 0, 1, 1], [], []>} : vector<8x32xbf16>, vector<32x32xbf16>, vector<8x32xf32> -> vector<8x32xf32>
    %c0_19 = arith.constant 0 : index
    %c0_20 = arith.constant 0 : index
    %44 = vector.load %arg9[%c0_19, %c0_20] : memref<1x32xf32, #tpu.memory_space<vmem>>, vector<1x32xf32>
    %45 = vector.shape_cast %44 : vector<1x32xf32> to vector<32xf32>
    %46 = vector.shape_cast %45 : vector<32xf32> to vector<1x32xf32>
    %47 = vector.broadcast %46 : vector<1x32xf32> to vector<8x32xf32>
    %48 = arith.addf %43, %47 : vector<8x32xf32>
    %c0_21 = arith.constant 0 : index
    %c0_22 = arith.constant 0 : index
    %49 = vector.load %arg10[%c0_21, %c0_22] : memref<32x32xbf16, #tpu.memory_space<vmem>>, vector<32x32xbf16>
    %cst_23 = arith.constant dense<0.000000e+00> : vector<8x32xf32>
    %50 = tpu.matmul %31, %49, %cst_23 {dimension_numbers = #tpu.dot_dimension_numbers<[1], [0], [0], [1], [0, 0, 1, 1], [], []>} : vector<8x32xbf16>, vector<32x32xbf16>, vector<8x32xf32> -> vector<8x32xf32>
    %c0_24 = arith.constant 0 : index
    %c0_25 = arith.constant 0 : index
    %51 = vector.load %arg11[%c0_24, %c0_25] : memref<1x32xf32, #tpu.memory_space<vmem>>, vector<1x32xf32>
    %52 = vector.shape_cast %51 : vector<1x32xf32> to vector<32xf32>
    %53 = vector.shape_cast %52 : vector<32xf32> to vector<1x32xf32>
    %54 = vector.broadcast %53 : vector<1x32xf32> to vector<8x32xf32>
    %55 = arith.addf %50, %54 : vector<8x32xf32>
    %56 = arith.truncf %41 : vector<8x32xf32> to vector<8x32xbf16>
    %57 = arith.truncf %48 : vector<8x32xf32> to vector<8x32xbf16>
    %58 = arith.truncf %55 : vector<8x32xf32> to vector<8x32xbf16>
    %c0_26 = arith.constant 0 : index
    %c0_27 = arith.constant 0 : index
    %c0_28 = arith.constant 0 : index
    %59 = vector.load %arg3[%c0_26, %c0_27, %c0_28] : memref<1x1x8xf32, #tpu.memory_space<vmem>>, vector<1x1x8xf32>
    %60 = vector.shape_cast %59 : vector<1x1x8xf32> to vector<1x8xf32>
    %61 = vector.shape_cast %60 : vector<1x8xf32> to vector<1x8xf32>
    %62 = vector.broadcast %61 : vector<1x8xf32> to vector<8x8xf32>
    %63 = vector.extract_strided_slice %56 {offsets = [0, 0], sizes = [8, 8], strides = [1, 1]} : vector<8x32xbf16> to vector<8x8xbf16>
    %64 = vector.extract_strided_slice %57 {offsets = [0, 0], sizes = [8, 8], strides = [1, 1]} : vector<8x32xbf16> to vector<8x8xbf16>
    %cst_29 = arith.constant dense<0.000000e+00> : vector<8x8xf32>
    %65 = tpu.matmul %63, %64, %cst_29 {dimension_numbers = #tpu.dot_dimension_numbers<[1], [1], [0], [0], [0, 0, 1, 0], [], []>} : vector<8x8xbf16>, vector<8x8xbf16>, vector<8x8xf32> -> vector<8x8xf32>
    %66 = arith.addf %65, %62 : vector<8x8xf32>
    %cst_30 = arith.constant dense<0xFF800000> : vector<8xf32>
    %67 = vector.multi_reduction <maximumf>, %66, %cst_30 [1] : vector<8x8xf32> to vector<8xf32>
    %68 = vector.shape_cast %67 : vector<8xf32> to vector<8x1xf32>
    %69 = vector.broadcast %68 : vector<8x1xf32> to vector<8x8xf32>
    %70 = arith.subf %66, %69 : vector<8x8xf32>
    %71 = math.exp %70 : vector<8x8xf32>
    %cst_31 = arith.constant dense<0.000000e+00> : vector<8xf32>
    %72 = vector.multi_reduction <add>, %71, %cst_31 [1] : vector<8x8xf32> to vector<8xf32>
    %73 = vector.shape_cast %72 : vector<8xf32> to vector<8x1xf32>
    %74 = tpu.reciprocal %73 {approx = true} : vector<8x1xf32> -> vector<8x1xf32>
    %75 = vector.broadcast %74 : vector<8x1xf32> to vector<8x8xf32>
    %76 = arith.mulf %71, %75 : vector<8x8xf32>
    %77 = arith.truncf %76 : vector<8x8xf32> to vector<8x8xbf16>
    %78 = vector.extract_strided_slice %58 {offsets = [0, 0], sizes = [8, 8], strides = [1, 1]} : vector<8x32xbf16> to vector<8x8xbf16>
    %cst_32 = arith.constant dense<0.000000e+00> : vector<8x8xf32>
    %79 = tpu.matmul %77, %78, %cst_32 {dimension_numbers = #tpu.dot_dimension_numbers<[1], [0], [0], [1], [0, 0, 1, 1], [], []>} : vector<8x8xbf16>, vector<8x8xbf16>, vector<8x8xf32> -> vector<8x8xf32>
    %c0_33 = arith.constant 0 : index
    %c0_34 = arith.constant 0 : index
    %80 = vector.load %arg23[%c0_33, %c0_34] : memref<8x32xf32, #tpu.memory_space<vmem>>, vector<8x8xf32>
    tpu.vector_store %arg23[%c0_33, %c0_34], %79 {strides = array<i32>} : memref<8x32xf32, #tpu.memory_space<vmem>>, vector<8x8xf32>,
    %81 = vector.extract_strided_slice %56 {offsets = [0, 8], sizes = [8, 8], strides = [1, 1]} : vector<8x32xbf16> to vector<8x8xbf16>
    %82 = vector.extract_strided_slice %57 {offsets = [0, 8], sizes = [8, 8], strides = [1, 1]} : vector<8x32xbf16> to vector<8x8xbf16>
    %cst_35 = arith.constant dense<0.000000e+00> : vector<8x8xf32>
    %83 = tpu.matmul %81, %82, %cst_35 {dimension_numbers = #tpu.dot_dimension_numbers<[1], [1], [0], [0], [0, 0, 1, 0], [], []>} : vector<8x8xbf16>, vector<8x8xbf16>, vector<8x8xf32> -> vector<8x8xf32>
    %84 = arith.addf %83, %62 : vector<8x8xf32>
    %cst_36 = arith.constant dense<0xFF800000> : vector<8xf32>
    %85 = vector.multi_reduction <maximumf>, %84, %cst_36 [1] : vector<8x8xf32> to vector<8xf32>
    %86 = vector.shape_cast %85 : vector<8xf32> to vector<8x1xf32>
    %87 = vector.broadcast %86 : vector<8x1xf32> to vector<8x8xf32>
    %88 = arith.subf %84, %87 : vector<8x8xf32>
    %89 = math.exp %88 : vector<8x8xf32>
    %cst_37 = arith.constant dense<0.000000e+00> : vector<8xf32>
    %90 = vector.multi_reduction <add>, %89, %cst_37 [1] : vector<8x8xf32> to vector<8xf32>
    %91 = vector.shape_cast %90 : vector<8xf32> to vector<8x1xf32>
    %92 = tpu.reciprocal %91 {approx = true} : vector<8x1xf32> -> vector<8x1xf32>
    %93 = vector.broadcast %92 : vector<8x1xf32> to vector<8x8xf32>
    %94 = arith.mulf %89, %93 : vector<8x8xf32>
    %95 = arith.truncf %94 : vector<8x8xf32> to vector<8x8xbf16>
    %96 = vector.extract_strided_slice %58 {offsets = [0, 8], sizes = [8, 8], strides = [1, 1]} : vector<8x32xbf16> to vector<8x8xbf16>
    %cst_38 = arith.constant dense<0.000000e+00> : vector<8x8xf32>
    %97 = tpu.matmul %95, %96, %cst_38 {dimension_numbers = #tpu.dot_dimension_numbers<[1], [0], [0], [1], [0, 0, 1, 1], [], []>} : vector<8x8xbf16>, vector<8x8xbf16>, vector<8x8xf32> -> vector<8x8xf32>
    %c0_39 = arith.constant 0 : index
    %c8 = arith.constant 8 : index
    %98 = vector.load %arg23[%c0_39, %c8] : memref<8x32xf32, #tpu.memory_space<vmem>>, vector<8x8xf32>
    tpu.vector_store %arg23[%c0_39, %c8], %97 {strides = array<i32>} : memref<8x32xf32, #tpu.memory_space<vmem>>, vector<8x8xf32>,
    %99 = vector.extract_strided_slice %56 {offsets = [0, 16], sizes = [8, 8], strides = [1, 1]} : vector<8x32xbf16> to vector<8x8xbf16>
    %100 = vector.extract_strided_slice %57 {offsets = [0, 16], sizes = [8, 8], strides = [1, 1]} : vector<8x32xbf16> to vector<8x8xbf16>
    %cst_40 = arith.constant dense<0.000000e+00> : vector<8x8xf32>
    %101 = tpu.matmul %99, %100, %cst_40 {dimension_numbers = #tpu.dot_dimension_numbers<[1], [1], [0], [0], [0, 0, 1, 0], [], []>} : vector<8x8xbf16>, vector<8x8xbf16>, vector<8x8xf32> -> vector<8x8xf32>
    %102 = arith.addf %101, %62 : vector<8x8xf32>
    %cst_41 = arith.constant dense<0xFF800000> : vector<8xf32>
    %103 = vector.multi_reduction <maximumf>, %102, %cst_41 [1] : vector<8x8xf32> to vector<8xf32>
    %104 = vector.shape_cast %103 : vector<8xf32> to vector<8x1xf32>
    %105 = vector.broadcast %104 : vector<8x1xf32> to vector<8x8xf32>
    %106 = arith.subf %102, %105 : vector<8x8xf32>
    %107 = math.exp %106 : vector<8x8xf32>
    %cst_42 = arith.constant dense<0.000000e+00> : vector<8xf32>
    %108 = vector.multi_reduction <add>, %107, %cst_42 [1] : vector<8x8xf32> to vector<8xf32>
    %109 = vector.shape_cast %108 : vector<8xf32> to vector<8x1xf32>
    %110 = tpu.reciprocal %109 {approx = true} : vector<8x1xf32> -> vector<8x1xf32>
    %111 = vector.broadcast %110 : vector<8x1xf32> to vector<8x8xf32>
    %112 = arith.mulf %107, %111 : vector<8x8xf32>
    %113 = arith.truncf %112 : vector<8x8xf32> to vector<8x8xbf16>
    %114 = vector.extract_strided_slice %58 {offsets = [0, 16], sizes = [8, 8], strides = [1, 1]} : vector<8x32xbf16> to vector<8x8xbf16>
    %cst_43 = arith.constant dense<0.000000e+00> : vector<8x8xf32>
    %115 = tpu.matmul %113, %114, %cst_43 {dimension_numbers = #tpu.dot_dimension_numbers<[1], [0], [0], [1], [0, 0, 1, 1], [], []>} : vector<8x8xbf16>, vector<8x8xbf16>, vector<8x8xf32> -> vector<8x8xf32>
    %c0_44 = arith.constant 0 : index
    %c16 = arith.constant 16 : index
    %116 = vector.load %arg23[%c0_44, %c16] : memref<8x32xf32, #tpu.memory_space<vmem>>, vector<8x8xf32>
    tpu.vector_store %arg23[%c0_44, %c16], %115 {strides = array<i32>} : memref<8x32xf32, #tpu.memory_space<vmem>>, vector<8x8xf32>,
    %117 = vector.extract_strided_slice %56 {offsets = [0, 24], sizes = [8, 8], strides = [1, 1]} : vector<8x32xbf16> to vector<8x8xbf16>
    %118 = vector.extract_strided_slice %57 {offsets = [0, 24], sizes = [8, 8], strides = [1, 1]} : vector<8x32xbf16> to vector<8x8xbf16>
    %cst_45 = arith.constant dense<0.000000e+00> : vector<8x8xf32>
    %119 = tpu.matmul %117, %118, %cst_45 {dimension_numbers = #tpu.dot_dimension_numbers<[1], [1], [0], [0], [0, 0, 1, 0], [], []>} : vector<8x8xbf16>, vector<8x8xbf16>, vector<8x8xf32> -> vector<8x8xf32>
    %120 = arith.addf %119, %62 : vector<8x8xf32>
    %cst_46 = arith.constant dense<0xFF800000> : vector<8xf32>
    %121 = vector.multi_reduction <maximumf>, %120, %cst_46 [1] : vector<8x8xf32> to vector<8xf32>
    %122 = vector.shape_cast %121 : vector<8xf32> to vector<8x1xf32>
    %123 = vector.broadcast %122 : vector<8x1xf32> to vector<8x8xf32>
    %124 = arith.subf %120, %123 : vector<8x8xf32>
    %125 = math.exp %124 : vector<8x8xf32>
    %cst_47 = arith.constant dense<0.000000e+00> : vector<8xf32>
    %126 = vector.multi_reduction <add>, %125, %cst_47 [1] : vector<8x8xf32> to vector<8xf32>
    %127 = vector.shape_cast %126 : vector<8xf32> to vector<8x1xf32>
    %128 = tpu.reciprocal %127 {approx = true} : vector<8x1xf32> -> vector<8x1xf32>
    %129 = vector.broadcast %128 : vector<8x1xf32> to vector<8x8xf32>
    %130 = arith.mulf %125, %129 : vector<8x8xf32>
    %131 = arith.truncf %130 : vector<8x8xf32> to vector<8x8xbf16>
    %132 = vector.extract_strided_slice %58 {offsets = [0, 24], sizes = [8, 8], strides = [1, 1]} : vector<8x32xbf16> to vector<8x8xbf16>
    %cst_48 = arith.constant dense<0.000000e+00> : vector<8x8xf32>
    %133 = tpu.matmul %131, %132, %cst_48 {dimension_numbers = #tpu.dot_dimension_numbers<[1], [0], [0], [1], [0, 0, 1, 1], [], []>} : vector<8x8xbf16>, vector<8x8xbf16>, vector<8x8xf32> -> vector<8x8xf32>
    %c0_49 = arith.constant 0 : index
    %c24 = arith.constant 24 : index
    %134 = vector.load %arg23[%c0_49, %c24] : memref<8x32xf32, #tpu.memory_space<vmem>>, vector<8x8xf32>
    tpu.vector_store %arg23[%c0_49, %c24], %133 {strides = array<i32>} : memref<8x32xf32, #tpu.memory_space<vmem>>, vector<8x8xf32>,
    %c0_50 = arith.constant 0 : index
    %c0_51 = arith.constant 0 : index
    %135 = vector.load %arg23[%c0_50, %c0_51] : memref<8x32xf32, #tpu.memory_space<vmem>>, vector<8x32xf32>
    %136 = arith.truncf %135 : vector<8x32xf32> to vector<8x32xbf16>
    %c0_52 = arith.constant 0 : index
    %c0_53 = arith.constant 0 : index
    %137 = vector.load %arg12[%c0_52, %c0_53] : memref<32x32xbf16, #tpu.memory_space<vmem>>, vector<32x32xbf16>
    %cst_54 = arith.constant dense<0.000000e+00> : vector<8x32xf32>
    %138 = tpu.matmul %136, %137, %cst_54 {dimension_numbers = #tpu.dot_dimension_numbers<[1], [0], [0], [1], [0, 0, 1, 1], [], []>} : vector<8x32xbf16>, vector<32x32xbf16>, vector<8x32xf32> -> vector<8x32xf32>
    %c0_55 = arith.constant 0 : index
    %c0_56 = arith.constant 0 : index
    %139 = vector.load %arg13[%c0_55, %c0_56] : memref<1x32xf32, #tpu.memory_space<vmem>>, vector<1x32xf32>
    %140 = vector.shape_cast %139 : vector<1x32xf32> to vector<32xf32>
    %141 = vector.shape_cast %140 : vector<32xf32> to vector<1x32xf32>
    %142 = vector.broadcast %141 : vector<1x32xf32> to vector<8x32xf32>
    %143 = arith.addf %138, %142 : vector<8x32xf32>
    %144 = arith.addf %30, %143 : vector<8x32xf32>
    %c0_57 = arith.constant 0 : index
    %c0_58 = arith.constant 0 : index
    %145 = vector.load %arg14[%c0_57, %c0_58] : memref<1x32xf32, #tpu.memory_space<vmem>>, vector<1x32xf32>
    %146 = vector.shape_cast %145 : vector<1x32xf32> to vector<32xf32>
    %c0_59 = arith.constant 0 : index
    %c0_60 = arith.constant 0 : index
    %147 = vector.load %arg15[%c0_59, %c0_60] : memref<1x32xf32, #tpu.memory_space<vmem>>, vector<1x32xf32>
    %148 = vector.shape_cast %147 : vector<1x32xf32> to vector<32xf32>
    %cst_61 = arith.constant dense<0.000000e+00> : vector<8xf32>
    %149 = vector.multi_reduction <add>, %144, %cst_61 [1] : vector<8x32xf32> to vector<8xf32>
    %150 = vector.shape_cast %149 : vector<8xf32> to vector<8x1xf32>
    %cst_62 = arith.constant 3.200000e+01 : f32
    %151 = vector.broadcast %cst_62 : f32 to vector<8x1xf32>
    %152 = arith.divf %150, %151 : vector<8x1xf32>
    %153 = vector.broadcast %152 : vector<8x1xf32> to vector<8x32xf32>
    %154 = arith.subf %144, %153 : vector<8x32xf32>
    %155 = arith.mulf %154, %154 : vector<8x32xf32>
    %cst_63 = arith.constant dense<0.000000e+00> : vector<8xf32>
    %156 = vector.multi_reduction <add>, %155, %cst_63 [1] : vector<8x32xf32> to vector<8xf32>
    %157 = vector.shape_cast %156 : vector<8xf32> to vector<8x1xf32>
    %cst_64 = arith.constant 3.200000e+01 : f32
    %158 = vector.broadcast %cst_64 : f32 to vector<8x1xf32>
    %159 = arith.divf %157, %158 : vector<8x1xf32>
    %160 = vector.broadcast %152 : vector<8x1xf32> to vector<8x32xf32>
    %161 = arith.subf %144, %160 : vector<8x32xf32>
    %cst_65 = arith.constant 9.99999996E-13 : f32
    %162 = vector.broadcast %cst_65 : f32 to vector<8x1xf32>
    %163 = arith.addf %159, %162 : vector<8x1xf32>
    %164 = math.rsqrt %163 : vector<8x1xf32>
    %165 = vector.broadcast %164 : vector<8x1xf32> to vector<8x32xf32>
    %166 = arith.mulf %161, %165 : vector<8x32xf32>
    %167 = vector.shape_cast %146 : vector<32xf32> to vector<1x32xf32>
    %168 = vector.broadcast %167 : vector<1x32xf32> to vector<8x32xf32>
    %169 = arith.mulf %166, %168 : vector<8x32xf32>
    %170 = vector.shape_cast %148 : vector<32xf32> to vector<1x32xf32>
    %171 = vector.broadcast %170 : vector<1x32xf32> to vector<8x32xf32>
    %172 = arith.addf %169, %171 : vector<8x32xf32>
    %173 = arith.truncf %172 : vector<8x32xf32> to vector<8x32xbf16>
    %c0_66 = arith.constant 0 : index
    %c0_67 = arith.constant 0 : index
    %174 = vector.load %arg16[%c0_66, %c0_67] : memref<32x128xbf16, #tpu.memory_space<vmem>>, vector<32x128xbf16>
    %cst_68 = arith.constant dense<0.000000e+00> : vector<8x128xf32>
    %175 = tpu.matmul %173, %174, %cst_68 {dimension_numbers = #tpu.dot_dimension_numbers<[1], [0], [0], [1], [0, 0, 1, 1], [], []>} : vector<8x32xbf16>, vector<32x128xbf16>, vector<8x128xf32> -> vector<8x128xf32>
    %c0_69 = arith.constant 0 : index
    %c0_70 = arith.constant 0 : index
    %176 = vector.load %arg17[%c0_69, %c0_70] : memref<1x128xf32, #tpu.memory_space<vmem>>, vector<1x128xf32>
    %177 = vector.shape_cast %176 : vector<1x128xf32> to vector<128xf32>
    %178 = vector.shape_cast %177 : vector<128xf32> to vector<1x128xf32>
    %179 = vector.broadcast %178 : vector<1x128xf32> to vector<8x128xf32>
    %180 = arith.addf %175, %179 : vector<8x128xf32>
    %181 = arith.mulf %180, %180 : vector<8x128xf32>
    %182 = arith.mulf %180, %181 : vector<8x128xf32>
    %cst_71 = arith.constant 4.471500e-02 : f32
    %183 = vector.broadcast %cst_71 : f32 to vector<8x128xf32>
    %184 = arith.mulf %183, %182 : vector<8x128xf32>
    %185 = arith.addf %180, %184 : vector<8x128xf32>
    %cst_72 = arith.constant 0.797884583 : f32
    %186 = vector.broadcast %cst_72 : f32 to vector<8x128xf32>
    %187 = arith.mulf %186, %185 : vector<8x128xf32>
    %188 = math.tanh %187 : vector<8x128xf32>
    %cst_73 = arith.constant 1.000000e+00 : f32
    %189 = vector.broadcast %cst_73 : f32 to vector<8x128xf32>
    %190 = arith.addf %189, %188 : vector<8x128xf32>
    %cst_74 = arith.constant 5.000000e-01 : f32
    %191 = vector.broadcast %cst_74 : f32 to vector<8x128xf32>
    %192 = arith.mulf %191, %190 : vector<8x128xf32>
    %193 = arith.mulf %180, %192 : vector<8x128xf32>
    %194 = arith.truncf %193 : vector<8x128xf32> to vector<8x128xbf16>
    %c0_75 = arith.constant 0 : index
    %c0_76 = arith.constant 0 : index
    %195 = vector.load %arg18[%c0_75, %c0_76] : memref<128x32xbf16, #tpu.memory_space<vmem>>, vector<128x32xbf16>
    %cst_77 = arith.constant dense<0.000000e+00> : vector<8x32xf32>
    %196 = tpu.matmul %194, %195, %cst_77 {dimension_numbers = #tpu.dot_dimension_numbers<[1], [0], [0], [1], [0, 0, 1, 1], [], []>} : vector<8x128xbf16>, vector<128x32xbf16>, vector<8x32xf32> -> vector<8x32xf32>
    %c0_78 = arith.constant 0 : index
    %c0_79 = arith.constant 0 : index
    %197 = vector.load %arg19[%c0_78, %c0_79] : memref<1x32xf32, #tpu.memory_space<vmem>>, vector<1x32xf32>
    %198 = vector.shape_cast %197 : vector<1x32xf32> to vector<32xf32>
    %199 = vector.shape_cast %198 : vector<32xf32> to vector<1x32xf32>
    %200 = vector.broadcast %199 : vector<1x32xf32> to vector<8x32xf32>
    %201 = arith.addf %196, %200 : vector<8x32xf32>
    %202 = arith.addf %172, %201 : vector<8x32xf32>
    %c0_80 = arith.constant 0 : index
    %c0_81 = arith.constant 0 : index
    %203 = vector.load %arg20[%c0_80, %c0_81] : memref<1x32xf32, #tpu.memory_space<vmem>>, vector<1x32xf32>
    %204 = vector.shape_cast %203 : vector<1x32xf32> to vector<32xf32>
    %c0_82 = arith.constant 0 : index
    %c0_83 = arith.constant 0 : index
    %205 = vector.load %arg21[%c0_82, %c0_83] : memref<1x32xf32, #tpu.memory_space<vmem>>, vector<1x32xf32>
    %206 = vector.shape_cast %205 : vector<1x32xf32> to vector<32xf32>
    %cst_84 = arith.constant dense<0.000000e+00> : vector<8xf32>
    %207 = vector.multi_reduction <add>, %202, %cst_84 [1] : vector<8x32xf32> to vector<8xf32>
    %208 = vector.shape_cast %207 : vector<8xf32> to vector<8x1xf32>
    %cst_85 = arith.constant 3.200000e+01 : f32
    %209 = vector.broadcast %cst_85 : f32 to vector<8x1xf32>
    %210 = arith.divf %208, %209 : vector<8x1xf32>
    %211 = vector.broadcast %210 : vector<8x1xf32> to vector<8x32xf32>
    %212 = arith.subf %202, %211 : vector<8x32xf32>
    %213 = arith.mulf %212, %212 : vector<8x32xf32>
    %cst_86 = arith.constant dense<0.000000e+00> : vector<8xf32>
    %214 = vector.multi_reduction <add>, %213, %cst_86 [1] : vector<8x32xf32> to vector<8xf32>
    %215 = vector.shape_cast %214 : vector<8xf32> to vector<8x1xf32>
    %cst_87 = arith.constant 3.200000e+01 : f32
    %216 = vector.broadcast %cst_87 : f32 to vector<8x1xf32>
    %217 = arith.divf %215, %216 : vector<8x1xf32>
    %218 = vector.broadcast %210 : vector<8x1xf32> to vector<8x32xf32>
    %219 = arith.subf %202, %218 : vector<8x32xf32>
    %cst_88 = arith.constant 9.99999996E-13 : f32
    %220 = vector.broadcast %cst_88 : f32 to vector<8x1xf32>
    %221 = arith.addf %217, %220 : vector<8x1xf32>
    %222 = math.rsqrt %221 : vector<8x1xf32>
    %223 = vector.broadcast %222 : vector<8x1xf32> to vector<8x32xf32>
    %224 = arith.mulf %219, %223 : vector<8x32xf32>
    %225 = vector.shape_cast %204 : vector<32xf32> to vector<1x32xf32>
    %226 = vector.broadcast %225 : vector<1x32xf32> to vector<8x32xf32>
    %227 = arith.mulf %224, %226 : vector<8x32xf32>
    %228 = vector.shape_cast %206 : vector<32xf32> to vector<1x32xf32>
    %229 = vector.broadcast %228 : vector<1x32xf32> to vector<8x32xf32>
    %230 = arith.addf %227, %229 : vector<8x32xf32>
    %231 = arith.truncf %230 : vector<8x32xf32> to vector<8x32xbf16>
    %c0_89 = arith.constant 0 : index
    %c0_90 = arith.constant 0 : index
    %c0_91 = arith.constant 0 : index
    %232 = vector.load %arg22[%c0_89, %c0_90, %c0_91] : memref<1x8x32xbf16, #tpu.memory_space<vmem>>, vector<1x8x32xbf16>
    %233 = vector.shape_cast %232 : vector<1x8x32xbf16> to vector<8x32xbf16>
    %234 = vector.shape_cast %231 : vector<8x32xbf16> to vector<1x8x32xbf16>
    tpu.vector_store %arg22[%c0_89, %c0_90, %c0_91], %234 {strides = array<i32>} : memref<1x8x32xbf16, #tpu.memory_space<vmem>>, vector<1x8x32xbf16>,
    return
  }
  func.func @transform_0(%arg0: i32, %arg1: i32) -> (i32, i32, i32) {
    %c0_i32 = arith.constant 0 : i32
    %c0_i32_0 = arith.constant 0 : i32
    %c0_i32_1 = arith.constant 0 : i32
    return %arg0, %c0_i32, %c0_i32_0 : i32, i32, i32
  }
  func.func @transform_1(%arg0: i32, %arg1: i32) -> (i32, i32, i32) {
    %c0_i32 = arith.constant 0 : i32
    %c0_i32_0 = arith.constant 0 : i32
    %c0_i32_1 = arith.constant 0 : i32
    return %arg0, %c0_i32, %c0_i32_0 : i32, i32, i32
  }
  func.func @transform_2(%arg0: i32, %arg1: i32) -> (i32, i32) {
    %c0_i32 = arith.constant 0 : i32
    %c0_i32_0 = arith.constant 0 : i32
    %c0_i32_1 = arith.constant 0 : i32
    return %c0_i32, %c0_i32_0 : i32, i32
  }
  func.func @transform_3(%arg0: i32, %arg1: i32) -> (i32, i32) {
    %c0_i32 = arith.constant 0 : i32
    %c0_i32_0 = arith.constant 0 : i32
    %c0_i32_1 = arith.constant 0 : i32
    return %c0_i32, %c0_i32_0 : i32, i32
  }
  func.func @transform_4(%arg0: i32, %arg1: i32) -> (i32, i32) {
    %c0_i32 = arith.constant 0 : i32
    %c0_i32_0 = arith.constant 0 : i32
    %c0_i32_1 = arith.constant 0 : i32
    return %c0_i32, %c0_i32_0 : i32, i32
  }
  func.func @transform_5(%arg0: i32, %arg1: i32) -> (i32, i32) {
    %c0_i32 = arith.constant 0 : i32
    %c0_i32_0 = arith.constant 0 : i32
    %c0_i32_1 = arith.constant 0 : i32
    return %c0_i32, %c0_i32_0 : i32, i32
  }
  func.func @transform_6(%arg0: i32, %arg1: i32) -> (i32, i32) {
    %c0_i32 = arith.constant 0 : i32
    %c0_i32_0 = arith.constant 0 : i32
    %c0_i32_1 = arith.constant 0 : i32
    return %c0_i32, %c0_i32_0 : i32, i32
  }
  func.func @transform_7(%arg0: i32, %arg1: i32) -> (i32, i32) {
    %c0_i32 = arith.constant 0 : i32
    %c0_i32_0 = arith.constant 0 : i32
    %c0_i32_1 = arith.constant 0 : i32
    return %c0_i32, %c0_i32_0 : i32, i32
  }
  func.func @transform_8(%arg0: i32, %arg1: i32) -> (i32, i32) {
    %c0_i32 = arith.constant 0 : i32
    %c0_i32_0 = arith.constant 0 : i32
    %c0_i32_1 = arith.constant 0 : i32
    return %c0_i32, %c0_i32_0 : i32, i32
  }
  func.func @transform_9(%arg0: i32, %arg1: i32) -> (i32, i32) {
    %c0_i32 = arith.constant 0 : i32
    %c0_i32_0 = arith.constant 0 : i32
    %c0_i32_1 = arith.constant 0 : i32
    return %c0_i32, %c0_i32_0 : i32, i32
  }
  func.func @transform_10(%arg0: i32, %arg1: i32) -> (i32, i32) {
    %c0_i32 = arith.constant 0 : i32
    %c0_i32_0 = arith.constant 0 : i32
    %c0_i32_1 = arith.constant 0 : i32
    return %c0_i32, %c0_i32_0 : i32, i32
  }
  func.func @transform_11(%arg0: i32, %arg1: i32) -> (i32, i32) {
    %c0_i32 = arith.constant 0 : i32
    %c0_i32_0 = arith.constant 0 : i32
    %c0_i32_1 = arith.constant 0 : i32
    return %c0_i32, %c0_i32_0 : i32, i32
  }
  func.func @transform_12(%arg0: i32, %arg1: i32) -> (i32, i32) {
    %c0_i32 = arith.constant 0 : i32
    %c0_i32_0 = arith.constant 0 : i32
    %c0_i32_1 = arith.constant 0 : i32
    return %c0_i32, %c0_i32_0 : i32, i32
  }
  func.func @transform_13(%arg0: i32, %arg1: i32) -> (i32, i32) {
    %c0_i32 = arith.constant 0 : i32
    %c0_i32_0 = arith.constant 0 : i32
    %c0_i32_1 = arith.constant 0 : i32
    return %c0_i32, %c0_i32_0 : i32, i32
  }
  func.func @transform_14(%arg0: i32, %arg1: i32) -> (i32, i32) {
    %c0_i32 = arith.constant 0 : i32
    %c0_i32_0 = arith.constant 0 : i32
    %c0_i32_1 = arith.constant 0 : i32
    return %c0_i32, %c0_i32_0 : i32, i32
  }
  func.func @transform_15(%arg0: i32, %arg1: i32) -> (i32, i32) {
    %c0_i32 = arith.constant 0 : i32
    %c0_i32_0 = arith.constant 0 : i32
    %c0_i32_1 = arith.constant 0 : i32
    return %c0_i32, %c0_i32_0 : i32, i32
  }
  func.func @transform_16(%arg0: i32, %arg1: i32) -> (i32, i32) {
    %c0_i32 = arith.constant 0 : i32
    %c0_i32_0 = arith.constant 0 : i32
    %c0_i32_1 = arith.constant 0 : i32
    return %c0_i32, %c0_i32_0 : i32, i32
  }
  func.func @transform_17(%arg0: i32, %arg1: i32) -> (i32, i32) {
    %c0_i32 = arith.constant 0 : i32
    %c0_i32_0 = arith.constant 0 : i32
    %c0_i32_1 = arith.constant 0 : i32
    return %c0_i32, %c0_i32_0 : i32, i32
  }
  func.func @transform_18(%arg0: i32, %arg1: i32) -> (i32, i32) {
    %c0_i32 = arith.constant 0 : i32
    %c0_i32_0 = arith.constant 0 : i32
    %c0_i32_1 = arith.constant 0 : i32
    return %c0_i32, %c0_i32_0 : i32, i32
  }
  func.func @transform_19(%arg0: i32, %arg1: i32) -> (i32, i32) {
    %c0_i32 = arith.constant 0 : i32
    %c0_i32_0 = arith.constant 0 : i32
    %c0_i32_1 = arith.constant 0 : i32
    return %c0_i32, %c0_i32_0 : i32, i32
  }
  func.func @transform_20(%arg0: i32, %arg1: i32) -> (i32, i32, i32) {
    %c0_i32 = arith.constant 0 : i32
    %c0_i32_0 = arith.constant 0 : i32
    return %arg0, %arg1, %c0_i32 : i32, i32, i32
  }
}

</mosaic_0001>

<bundles_post_ra>
// kernel: tpu_custom_call.1
= control target key start
LH: loop header
LB: loop body
LE: loop exit
PB: predicated region body
PF: predicated region fallthrough
CT: control target
= control target key end

     0   :  { %s2225_s0 = inlined_call_operand.hbm [shape: bf16[2,8,32], index: 0, kind: input, shape index: {}]   ;;  %s2226_s1 = inlined_call_operand.hbm [shape: f32[2,1,8], index: 1, kind: input, shape index: {}]   ;;  %s2227_s2 = inlined_call_operand.vmem [shape: f32[1,32], index: 2, kind: input, shape index: {}]   ;;  %s2228_s3 = inlined_call_operand.vmem [shape: f32[1,32], index: 3, kind: input, shape index: {}]   ;;  %s2229_s4 = inlined_call_operand.vmem [shape: bf16[32,32], index: 4, kind: input, shape index: {}]   ;;  %s2230_s5 = inlined_call_operand.vmem [shape: f32[1,32], index: 5, kind: input, shape index: {}]   ;;  %s2231_s6 = inlined_call_operand.vmem [shape: bf16[32,32], index: 6, kind: input, shape index: {}]   ;;  %s2232_s7 = inlined_call_operand.vmem [shape: f32[1,32], index: 7, kind: input, shape index: {}]   ;;  %s2233_s8 = inlined_call_operand.vmem [shape: bf16[32,32], index: 8, kind: input, shape index: {}]   ;;  %s2234_s9 = inlined_call_operand.vmem [shape: f32[1,32], index: 9, kind: input, shape index: {}]   ;;  %s2235_s10 = inlined_call_operand.vmem [shape: bf16[32,32], index: 10, kind: input, shape index: {}]   ;;  %s2236_s11 = inlined_call_operand.vmem [shape: f32[1,32], index: 11, kind: input, shape index: {}]   ;;  %s2237_s12 = inlined_call_operand.vmem [shape: f32[1,32], index: 12, kind: input, shape index: {}]   ;;  %s2238_s13 = inlined_call_operand.vmem [shape: f32[1,32], index: 13, kind: input, shape index: {}]   ;;  %s2239_s14 = inlined_call_operand.vmem [shape: bf16[32,128], index: 14, kind: input, shape index: {}]   ;;  %s2240_s15 = inlined_call_operand.vmem [shape: f32[1,128], index: 15, kind: input, shape index: {}]   ;;  %s2241_s16 = inlined_call_operand.vmem [shape: bf16[128,32], index: 16, kind: input, shape index: {}]   ;;  %s2242_s17 = inlined_call_operand.vmem [shape: f32[1,32], index: 17, kind: input, shape index: {}]   ;;  %s2243_s18 = inlined_call_operand.vmem [shape: f32[1,32], index: 18, kind: input, shape index: {}]   ;;  %s2244_s19 = inlined_call_operand.vmem [shape: f32[1,32], index: 19, kind: input, shape index: {}]   ;;  %s2245_s20 = inlined_call_operand.hbm [shape: bf16[2,8,32], index: 20, kind: output, shape index: {}]  }
   0x1   :  { %2254 = sst [smem:[#allocation19_spill]] %s2225_s0 }
   0x2   :  { %2255 = sst [smem:[#allocation20_spill]] %s2226_s1 }
   0x3   :  { %2256 = sst [smem:[#allocation21_spill]] %s2227_s2 }
   0x4   :  { %2257 = sst [smem:[#allocation22_spill]] %s2228_s3 }
   0x5   :  { %2258 = sst [smem:[#allocation23_spill]] %s2229_s4 }
   0x6   :  { %2259 = sst [smem:[#allocation24_spill]] %s2237_s12 }
   0x7   :  { %2260 = sst [smem:[#allocation25_spill]] %s2238_s13 }
   0x8   :  { %2261 = sst [smem:[#allocation26_spill]] %s2240_s15 }
   0x9   :  { %2262 = sst [smem:[#allocation27_spill]] %s2242_s17 }
   0xa   :  { %2263 = sst [smem:[#allocation28_spill]] %s2243_s18 }
   0xb   :  { %2264 = sst [smem:[#allocation29_spill]] %s2244_s19 }
   0xc   :  { %2265 = sst [smem:[#allocation30_spill]] %s2245_s20 }
   0xd   :  { %25 = vsyncpa [#allocation4], 0 }
   0xe   :  { %27 = vsyncpa [#allocation4 + $0x1], 0 }
   0xf   :  { %28 = vsyncpa [#allocation7], 0 }
  0x10   :  { %30 = vsyncpa [#allocation7 + $0x1], 0 }
  0x11   :  { %31 = vsyncpa [#allocation5], 0 }
  0x12   :  { %33 = vsyncpa [#allocation5 + $0x1], 0  ;;  %s1937_s1 = smov 0   ;;  %s1939_s22 = smov 0  }
  0x13   :  { %s1941_s23 = smov 0   ;;  %s1943_s24 = smov 0  }
  0x14   :  { %s1945_s2 = smov 0   ;;  %s1947_s25 = smov 0  }
  0x15 LB: > { %2266 = sst [smem:[#allocation12_spill]] %s1803_s1  ;;  %s1448_s3 = sadd.s32 4294967295, %s1823_s25   ;;  %s1823_s25 = sphi %s1947_s25, %s39_s25   ;;  %s1819_s2 = sphi %s1945_s2, %s2299_s2   ;;  %s1815_s24 = sphi %s1943_s24, %s2298_s24   ;;  %s1811_s23 = sphi %s1941_s23, %s2294_s23   ;;  %s1807_s22 = sphi %s1939_s22, %s2297_s22   ;;  %s1803_s1 = sphi %s1937_s1, %s2296_s1  }
  0x16   : > { %2267 = sst [smem:[#allocation13_spill]] %s1811_s23  ;;  %s1449_s26 = sadd.s32 4294967294, %s1823_s25  }
  0x17   : > { %2268 = sst [smem:[#allocation14_spill]] %s1815_s24  ;;  %s51_s27 = sadd.s32 1, %s1819_s2 }
  0x18   : > { %s58_s28 = sadd.s32 1, %s1811_s23  ;;  %p53_p0 = scmp.ge.s32.totalorder %s51_s27, 2 }
  0x19   : > { %p65_p1 = scmp.ne.s32.totalorder %s1811_s23, %s1807_s22  ;;  %p66_p2 = scmp.eq.s32.totalorder %s1823_s25, 0 }
  0x1a   : > { %p71_p3 = scmp.ne.s32.totalorder %s1807_s22, %s1803_s1  ;;  %s2301_s27 = smov (%p53_p0, %s51_s27), 0 }
  0x1b   : > { %2269 = sst [smem:[#allocation15_spill]] %s2301_s27  ;;  %p1978_p4 = por %p66_p2, %p65_p1 }
  0x1c   : > { %p72_p5 = scmp.eq.s32.totalorder %s1448_s3, 0  ;;  %s55_s29 = ssub.s32 %s1819_s2, %s2301_s27 }
  0x1d   : > { %p501_p6 = scmp.eq.s32.totalorder %s1448_s3, 1  ;;  %p56_p7 = scmp.eq.s32.totalorder %s55_s29, 0 }
  0x1e   : > { %p1984_p8 = por %p72_p5, %p71_p3  ;;  %p507_p10 = scmp.eq.s32.totalorder %s1449_s26, 1 }
  0x1f   : > { %p1988_p9 = por %p501_p6, %p65_p1  ;;  %p1451_p12 = scmp.ge.s32.totalorder %s1823_s25, 2 }
  0x20   : > { %s1993_s21 = scalar_select %p56_p7, %s1811_s23, %s58_s28  }
  0x21   : > { %s2272_s0 = scalar_select %p1988_p9, 1, 0 }
  0x22   : > { %2274 = sst [smem:[#allocation17_spill]] %s1993_s21  ;;  %p1995_p11 = por %p507_p10, %p71_p3 }
  0x23   : > { %2273 = sst [smem:[#allocation16_spill]] %s2272_s0  ;;  %p1581_p13 = scmp.lt.s32.totalorder %s1823_s25, 2 }
  0x24   : > { %s2275_s1 = scalar_select %p1995_p11, 1, 0 }
  0x25   : > { %s581_s3 = sand.u32 1, %s1811_s23   ;;  %s1453_s27 = sshll.u32 %s1819_s2, 2 }
  0x26   : > { %2276 = sst [smem:[#allocation18_spill]] %s2275_s1  ;;  %s1452_s29 = sshll.u32 %s581_s3, 2 }
  0x27   : > { %s2277_s18 = sld [smem:[#allocation19_spill]]  ;;  %s585_s0 = scalar_lea.vmem [#allocation3], %s1452_s29 }
  0x28   : > { %s593_s17 = sshll.u32 %s585_s0, 4  ;;  %p1571_p0 = pnand %p1581_p13, %p1978_p4  ;;  %s594_s17 = int_to_ptr.vmem [resolvable:$true] %s593_s17 }
  0x29   : > { %p1454_p1 = scmp.ge.s32.totalorder %s1823_s25, 1  ;;  %p615_p2 = scmp.lt.s32.totalorder %s1823_s25, 3 }
  0x2a   : > { %s582_s28 = scalar_lea.sflag [#allocation4], %s581_s3  ;;  %s2278_s1 = sld [smem:[#allocation20_spill]] }
  0x2b   : > { %p616_p3 = pnand %p1454_p1, %p615_p2  ;;  %s603_s13 = scalar_lea.vmem [#allocation6], %s581_s3 }
  0x2c   : > { %s610_s12 = sshll.u32 %s603_s13, 4  ;;  %s2015_s20 = sand.u32 (!%p616_p3), 1, %s1807_s22   ;;  %s611_s12 = int_to_ptr.vmem [resolvable:$true] %s610_s12 }
  0x2d   : > { %s589_s24 = scalar_lea.hbm %s2277_s18, %s1453_s27  ;;  %s601_s18 = scalar_lea.sflag [#allocation7], %s581_s3 }
  0x2e   : > { %s591_s26 = sshll.u32 %s589_s24, 4  ;;  %619 = sbr.rel (%p616_p3) target bundleno = 2227 (0x8b3), region = 100  ;;  %s592_s26 = int_to_ptr.hbm [resolvable:$true] %s591_s26 }
  0x2f   : > { %1573 = dma.hbm_to_vmem [thread:$0]  (!%p1571_p0), %s592_s26, 64, %s594_s17, %s582_s28  }
  0x30   : > { %s606_s15 = scalar_lea.hbm %s2278_s1, %s1819_s2  ;;  %s1455_s17 = sshll.u32 (!%p616_p3), %s2015_s20, 2 }
  0x31   : > { %s608_s19 = sshll.u32 %s606_s15, 4  ;;  %s622_s24 = scalar_lea.sflag (!%p616_p3), [#allocation4], %s2015_s20  ;;  %s609_s19 = int_to_ptr.hbm [resolvable:$true] %s608_s19 }
  0x32   : > { %1576 = dma.hbm_to_vmem [thread:$0]  (!%p1571_p0), %s609_s19, 16, %s611_s12, %s601_s18  }
  0x33   : > { %s625_s23 = scalar_lea.vmem [#allocation3], %s1455_s17 }
  0x34   : > { %1790 = dma.done.wait (%p1984_p8), %s622_s24, 64  }
  0x35   : > { %1792 = vsyncadd (%p1984_p8), %s622_s24, 4294967232  ;;  %s632_s12 = scalar_lea.sflag [#allocation7], %s2015_s20  ;;  %s634_s13 = scalar_lea.vmem [#allocation6], %s2015_s20 }
  0x36   : > { %1794 = dma.done.wait (%p1984_p8), %s632_s12, 16  }
  0x37   : > { %1796 = vsyncadd (%p1984_p8), %s632_s12, 4294967280  ;;  %vm701_vm0 = vcmask 261120   ;;  %v697_v0 = vld [vmem:[%s625_s23] sm:$0xf]  ;;  %v1825_v3 = vmov 32.0   ;;  %s2279_s27 = sld [smem:[#allocation23_spill]] }
  0x38   : > { %v698_v1 = vunpack.c.l.bf16 %v697_v0  ;;  %1651 = vrcp.f32 %v1825_v3  ;;  %v1549_v16 = vld [vmem:[%s2231_s6 + $0x8] sm:$0xff]  ;;  %v1548_v18 = vld [vmem:[%s2231_s6] sm:$0xff]  ;;  %s2280_s12 = sld [smem:[#allocation21_spill]]  ;;  %vm850_vm5 = vcmask 64512   ;;  %s1826_s29 = smov 112   ;;  %vm885_vm6 = vcmask 1043456  }
  0x39   : > { %803 = vmatpush.bf16.msra.mxu2 %v1549_v16  ;;  %v1551_v19 = vld [vmem:[%s2233_s8 + $0x8] sm:$0xff]  ;;  %v1550_v22 = vld [vmem:[%s2233_s8] sm:$0xff]  ;;  %s2281_s4 = sld [smem:[#allocation22_spill]]  ;;  %s1827_s26 = smov 120   ;;  %vm972_vm7 = vcmask 130112   ;;  %vm1034_vm8 = vcmask 195712  }
  0x3a   : > { %v702_v2 = vsel %vm701_vm0, %v698_v1, 0.0  ;;  %v1640_v37 = vld [vmem:[%s2230_s5] ss:$0 sm:$0xff]  ;;  %s1828_s18 = smov 104   ;;  %s1830_s24 = smov 16   ;;  %vm1096_vm9 = vcmask 261312  }
  0x3b   : > { %703 = vadd.xlane.f32.xlu0 %v702_v2  ;;  %v1641_v41 = vld [vmem:[%s2232_s7] ss:$0 sm:$0xff]  ;;  %s1831_s23 = smov 24   ;;  %s2283_s15 = sld [smem:[#allocation25_spill]] }
  0x3c   : > { %v1642_v53 = vld [vmem:[%s2234_s9] ss:$0 sm:$0xff]  ;;  %s2284_s1 = sld [smem:[#allocation26_spill]] }
  0x3d   : > { %v1547_v15 = vld [vmem:[%s2279_s27 + $0x8] sm:$0xff]  ;;  %v1546_v17 = vld [vmem:[%s2279_s27] sm:$0xff]  ;;  %804 = vmatpush.bf16.msra.mxu2 %v1548_v18  ;;  %s2285_s0 = sld [smem:[#allocation27_spill]] }
  0x3e   : > { %v1652_v4 = vpop.eup %1651  ;;  %769 = vmatpush.bf16.msra.mxu0 %v1547_v15  ;;  %v1638_v30 = vld [vmem:[%s2280_s12] ss:$0 sm:$0xff]  ;;  %s2286_s21 = sld [smem:[#allocation14_spill]] }
  0x3f   : > { %v706_v5 = vmul.f32 32.0, %v1652_v4  ;;  %vm710_vm1 = vweird.f32 %v1652_v4  ;;  %v1639_v33 = vld [vmem:[%s2281_s4] ss:$0 sm:$0xff]  ;;  %s2287_s28 = sld [smem:[#allocation28_spill]]  ;;  %s695_s4 = scalar_lea.vmem [#allocation8], %s1455_s17 }
  0x40   : > { %v1643_v3 = vld [vmem:[%s634_s13] ss:$0 sm:$0xff]  ;;  %s1829_s13 = smov 8   ;;  %s2289_s12 = sld [smem:[#allocation30_spill]] }
  0x41   : > { %v707_v6 = vsub.f32 1.0, %v706_v5  ;;  %836 = vmatpush.bf16.msrb.mxu2 %v1551_v19  ;;  %s1347_s30 = sshll.u32 %s695_s4, 4  ;;  %s1348_s30 = int_to_ptr.vmem [resolvable:$true] %s1347_s30 }
  0x42   : > { %770 = vmatpush.bf16.msra.mxu0 %v1546_v17 }
  0x43   : > { %v708_v7 = vmul.f32 %v1652_v4, %v707_v6 }
  0x44   : > { %s1543_s3 = sshll.u32 %s2286_s21, 2  ;;  %s1334_s21 = scalar_lea.sflag [#allocation5], %s2015_s20 }
  0x45   : > { %v709_v8 = vadd.f32 %v1652_v4, %v708_v7  ;;  %837 = vmatpush.bf16.msrb.mxu2 %v1550_v22 }
  0x46   : > { %s1757_s17 = scalar_lea.hbm %s2289_s12, 8 }
  0x47   : > { %v2032_v9 = vsel %vm710_vm1, %v1652_v4, %v709_v8 }
  0xae   : > { %v704_v10 = vpop.xlane.xlu0 %703 }
  0xaf   : > { %v712_v11 = vmul.f32 %v2032_v9, %v704_v10 }
  0xb1   : > { %v713_v12 = vsub.f32 %v698_v1, %v712_v11 }
  0xb3   : > { %v714_v13 = vmul.f32 %v713_v12, %v713_v12 }
  0xb5   : > { %v715_v14 = vsel %vm701_vm0, %v714_v13, 0.0 }
  0xb6   : > { %716 = vadd.xlane.f32.xlu0 %v715_v14 }
 0x129   : > { %v717_v20 = vpop.xlane.xlu0 %716 }
 0x12a   : > { %v718_v21 = vmul.f32 %v717_v20, %v2032_v9 }
 0x12c   : > { %v719_v23 = vadd.f32 1e-12, %v718_v21 }
 0x12e   : > { %1653 = vrsqrt.f32 %v719_v23  ;;  %vm726_vm3 = vweird.f32 %v719_v23 }
 0x134   : > { %v1654_v24 = vpop.eup %1653 }
 0x135   : > { %v721_v25 = vmul.f32 %v1654_v24, %v719_v23  ;;  %vm727_vm2 = vweird.f32 %v1654_v24 }
 0x136   : > { %vm728_vm4 = vmor %vm726_vm3, %vm727_vm2 }
 0x137   : > { %v722_v26 = vmul.f32 %v1654_v24, %v721_v25 }
 0x139   : > { %v723_v27 = vmul.f32 0.5, %v722_v26 }
 0x13b   : > { %v724_v28 = vsub.f32 1.5, %v723_v27 }
 0x13d   : > { %v725_v29 = vmul.f32 %v1654_v24, %v724_v28 }
 0x13f   : > { %v729_v31 = vsel %vm728_vm4, %v1654_v24, %v725_v29 }
 0x140   : > { %v730_v32 = vmul.f32 %v729_v31, %v713_v12 }
 0x142   : > { %v734_v34 = vmul.f32 %v1638_v30, %v730_v32 }
 0x144   : > { %v2061_v35 = vadd.f32 %v1639_v33, %v734_v34 }
 0x146   : > { %v739_v36 = vpack.c.bf16 %v2061_v35, %v2061_v35 }
 0x148   : > { %1465 = vmatmul.msk.bf16.vlgmr.msra.gmra.mxu0 %vm701_vm0, %v739_v36  ;;  %1474 = vmatmul.msk.bf16.vlgmr.msra.gmra.mxu2 %vm701_vm0, %v739_v36 }
 0x158   : > { %1483 = vmatmul.msk.bf16.vlgmr.msrb.gmra.mxu2 %vm701_vm0, %v739_v36 }
 0x1c5   : > { %v772_v38 = vpop.f32.mrf.mxu0 }
 0x1c6   : > { %v773_v39 = vadd.f32 %v1640_v37, %v772_v38 }
 0x1c8   : > { %v776_v40 = vmul.f32 0.35355338, %v773_v39 }
 0x1ca   : > { %v843_v42 = vpack.c.bf16 %v776_v40, %v776_v40 }
 0x1cb   : > { %v806_v43 = vpop.f32.mrf.mxu2 }
 0x1cc   : > { %v904_v44 = vunpack.c.l.b16 %v843_v42  ;;  %v807_v45 = vadd.f32 %v1641_v41, %v806_v43 }
 0x1cd   : > { %v774_v46 = vpop.f32.mrf.mxu0 }
 0x1ce   : > { %v844_v47 = vpack.c.bf16 %v807_v45, %v807_v45  ;;  %v905_v48 = vpack.c.b16 %v904_v44, %v904_v44 }
 0x1d0   : > { %v909_v49 = vunpack.c.l.b16 %v844_v47  ;;  %974 = vrot.lane.b32.xlu0 %v905_v48, %s1826_s29  ;;  %v855_v50 = vsel %vm850_vm5, %v844_v47, 0 }
 0x1d1   : > { %864 = vmatpush.bf16.xpose.msra.mxu3 %v855_v50 }
 0x1d2   : > { %v910_v51 = vpack.c.b16 %v909_v49, %v909_v49 }
 0x1d3   : > { %v808_v52 = vpop.f32.mrf.mxu2 }
 0x1d4   : > { %976 = vrot.lane.b32.xlu2 %v910_v51, %s1826_s29  ;;  %911 = vrot.lane.b32.xlu1 %v910_v51, %s1827_s26 }
 0x1d8   : > { %1484 = vmatmul.msk.bf16.vlgmr.msra.gmra.mxu3 %vm850_vm5, %v843_v42 }
 0x1db   : > { %v839_v54 = vpop.f32.mrf.mxu2 }
 0x1dc   : > { %v840_v55 = vadd.f32 %v1642_v53, %v839_v54  ;;  %1038 = vrot.lane.b32.xlu2 %v910_v51, %s1828_s18  ;;  %906 = vrot.lane.b32.xlu1 %v905_v48, %s1827_s26 }
 0x1de   : > { %v2084_v56 = vpack.c.bf16 %v840_v55, %v840_v55 }
 0x1e0   : > { %v887_v57 = vsel %vm885_vm6, %v2084_v56, 0  ;;  %v945_v47 = vunpack.c.l.b16 %v2084_v56 }
 0x1e1   : > { %896 = vmatpush.bf16.msrb.mxu0 %v887_v57 }
 0x1e3   : > { %v841_v58 = vpop.f32.mrf.mxu2 }
 0x1e4   : > { %1036 = vrot.lane.b32.xlu1 %v905_v48, %s1828_s18  ;;  %v946_v48 = vpack.c.b16 %v945_v47, %v945_v47 }
 0x22e   : > { %v977_v59 = vpop.permute.xlu2 %976 }
 0x22f   : > { %v982_v60 = vsel %vm850_vm5, %v977_v59, 0 }
 0x230   : > { %991 = vmatpush.bf16.xpose.msrb.mxu3 %v982_v60 }
 0x236   : > { %v1039_v62 = vpop.permute.xlu2 %1038 }
 0x237   : > { %v1044_v1 = vsel %vm850_vm5, %v1039_v62, 0 }
 0x242   : > { %v975_v61 = vpop.permute.xlu0 %974 }
 0x243   : > { %1488 = vmatmul.msk.bf16.vlgmr.msrb.gmra.mxu3 %vm850_vm5, %v975_v61 }
 0x246   : > { %v912_v63 = vpop.permute.xlu1 %911 }
 0x247   : > { %v917_v0 = vsel %vm850_vm5, %v912_v63, 0 }
 0x248   : > { %926 = vmatpush.bf16.xpose.msra.mxu1 %v917_v0 }
 0x24e   : > { %v907_v2 = vpop.permute.xlu1 %906 }
 0x24f   : > { %1486 = vmatmul.msk.bf16.vlgmr.msra.gmra.mxu1 %vm850_vm5, %v907_v2 }
 0x250   : > { %1053 = vmatpush.bf16.xpose.msrb.mxu1 %v1044_v1 }
 0x256   : > { %v1037_v6 = vpop.permute.xlu1 %1036 }
 0x25b   : > { %v866_v4 = vpop.f32.mrf.mxu3 }
 0x25c   : > { %v867_v5 = vadd.f32 %v1643_v3, %v866_v4 }
 0x25e   : > { %v870_v7 = vsel %vm850_vm5, %v867_v5, -inf }
 0x25f   : > { %1490 = vmatmul.msk.bf16.vlgmr.msrb.gmra.mxu1 %vm850_vm5, %v1037_v6  ;;  %871 = vmax.xlane.f32.xlu1 %v870_v7 }
 0x263   : > { %v868_v8 = vpop.f32.mrf.mxu3 }
 0x2c6   : > { %v993_v10 = vpop.f32.mrf.mxu3 }
 0x2c7   : > { %v994_v16 = vadd.f32 %v1643_v3, %v993_v10 }
 0x2c9   : > { %v997_v20 = vsel %vm850_vm5, %v994_v16, -inf }
 0x2cc   : > { %v928_v11 = vpop.f32.mrf.mxu1 }
 0x2cd   : > { %v929_v12 = vadd.f32 %v1643_v3, %v928_v11 }
 0x2ce   : > { %v995_v13 = vpop.f32.mrf.mxu3 }
 0x2cf   : > { %v932_v14 = vsel %vm850_vm5, %v929_v12, -inf }
 0x2d0   : > { %933 = vmax.xlane.f32.xlu2 %v932_v14  ;;  %v1553_v14 = vld [vmem:[%s2235_s10 + $0x8] sm:$0xff] }
 0x2d1   : > { %1129 = vmatpush.bf16.msra.mxu3 %v1553_v14 }
 0x2d2   : > { %v872_v15 = vpop.xlane.xlu1 %871 }
 0x2d3   : > { %v873_v17 = vsub.f32 %v867_v5, %v872_v15  ;;  %v1552_v15 = vld [vmem:[%s2235_s10] sm:$0xff] }
 0x2d4   : > { %v930_v18 = vpop.f32.mrf.mxu1 }
 0x2d5   : > { %v874_v19 = vmul.f32 1.442695, %v873_v17  ;;  %1130 = vmatpush.bf16.msra.mxu3 %v1552_v15 }
 0x2d7   : > { %1655 = vpow2.f32 %v874_v19  ;;  %v1644_v19 = vld [vmem:[%s2236_s11] ss:$0 sm:$0xff] }
 0x2d8   : > { %998 = vmax.xlane.f32.xlu2 %v997_v20 }
 0x2dc   : > { %v1055_v21 = vpop.f32.mrf.mxu1 }
 0x2dd   : > { %v1656_v22 = vpop.eup %1655  ;;  %v1056_v23 = vadd.f32 %v1643_v3, %v1055_v21 }
 0x2de   : > { %v876_v24 = vsel %vm850_vm5, %v1656_v22, 0.0 }
 0x2df   : > { %877 = vadd.xlane.f32.xlu1 %v876_v24  ;;  %v1059_v25 = vsel %vm850_vm5, %v1056_v23, -inf }
 0x2e0   : > { %1060 = vmax.xlane.f32.xlu0 %v1059_v25 }
 0x2e4   : > { %v1057_v26 = vpop.f32.mrf.mxu1 }
 0x343   : > { %v934_v27 = vpop.xlane.xlu2 %933 }
 0x344   : > { %v935_v28 = vsub.f32 %v929_v12, %v934_v27 }
 0x346   : > { %v936_v29 = vmul.f32 1.442695, %v935_v28 }
 0x348   : > { %1657 = vpow2.f32 %v936_v29 }
 0x34b   : > { %v999_v30 = vpop.xlane.xlu2 %998 }
 0x34c   : > { %v1000_v31 = vsub.f32 %v994_v16, %v999_v30  ;;  %v1555_v30 = vld [vmem:[%s2239_s14 + $0x8] sm:$0xff] }
 0x34e   : > { %v1658_v32 = vpop.eup %1657  ;;  %v1001_v33 = vmul.f32 1.442695, %v1000_v31  ;;  %v1563_v31 = vld [vmem:[%s2241_s16 + $0x38] sm:$0xff] }
 0x34f   : > { %v938_v34 = vsel %vm850_vm5, %v1658_v32, 0.0  ;;  %1284 = vmatpush.bf16.msra.mxu1 %v1563_v31 }
 0x350   : > { %1659 = vpow2.f32 %v1001_v33  ;;  %939 = vadd.xlane.f32.xlu2 %v938_v34 }
 0x352   : > { %v878_v36 = vpop.xlane.xlu1 %877 }
 0x353   : > { %1661 = vrcp.f32 %v878_v36  ;;  %v1061_v37 = vpop.xlane.xlu0 %1060 }
 0x354   : > { %v1062_v38 = vsub.f32 %v1056_v23, %v1061_v37 }
 0x356   : > { %v1660_v39 = vpop.eup %1659  ;;  %v1063_v40 = vmul.f32 1.442695, %v1062_v38 }
 0x357   : > { %v1003_v41 = vsel %vm850_vm5, %v1660_v39, 0.0 }
 0x358   : > { %1663 = vpow2.f32 %v1063_v40  ;;  %1004 = vadd.xlane.f32.xlu0 %v1003_v41 }
 0x359   : > { %v1662_v42 = vpop.eup %1661 }
 0x35a   : > { %v880_v43 = vmul.f32 %v1662_v42, %v1656_v22 }
 0x35c   : > { %v881_v44 = vpack.c.bf16 %v880_v43, %v880_v43 }
 0x35e   : > { %v1664_v45 = vpop.eup %1663  ;;  %1485 = vmatmul.msk.bf16.vlgmr.msrb.gmra.mxu0 %vm850_vm5, %v881_v44  ;;  %v1646_v44 = vld [vmem:[%s2283_s15] ss:$0 sm:$0xff]  ;;  %s1345_s15 = scalar_lea.hbm %s2289_s12, %s1543_s3 }
 0x35f   : > { %v1065_v46 = vsel %vm850_vm5, %v1664_v45, 0.0 }
 0x360   : > { %1066 = vadd.xlane.f32.xlu1 %v1065_v46 }
 0x368   : > { %947 = vrot.lane.b32.xlu2 %v946_v48, %s1827_s26 }
 0x36c   : > { %1009 = vrot.lane.b32.xlu0 %v946_v48, %s1826_s29 }
 0x379   : > { %1071 = vrot.lane.b32.xlu1 %v946_v48, %s1828_s18 }
 0x3c3   : > { %v940_v49 = vpop.xlane.xlu2 %939 }
 0x3c4   : > { %1665 = vrcp.f32 %v940_v49  ;;  %v1562_v49 = vld [vmem:[%s2241_s16 + $0x30] sm:$0xff] }
 0x3c5   : > { %1285 = vmatpush.bf16.msra.mxu1 %v1562_v49 }
 0x3ca   : > { %v1666_v50 = vpop.eup %1665 }
 0x3cb   : > { %v942_v51 = vmul.f32 %v1666_v50, %v1658_v32  ;;  %v948_v52 = vpop.permute.xlu2 %947  ;;  %v1005_v55 = vpop.xlane.xlu0 %1004  ;;  %v1561_v50 = vld [vmem:[%s2241_s16 + $0x28] sm:$0xff] }
 0x3cc   : > { %v953_v53 = vsel %vm885_vm6, %v948_v52, 0  ;;  %1667 = vrcp.f32 %v1005_v55  ;;  %1286 = vmatpush.bf16.msra.mxu1 %v1561_v50  ;;  %v1559_v52 = vld [vmem:[%s2241_s16 + $0x18] sm:$0xff]  ;;  %v1556_v55 = vld [vmem:[%s2241_s16] sm:$0xff] }
 0x3cd   : > { %v943_v54 = vpack.c.bf16 %v942_v51, %v942_v51  ;;  %962 = vmatpush.bf16.msra.mxu2 %v953_v53  ;;  %v1560_v51 = vld [vmem:[%s2241_s16 + $0x20] sm:$0xff]  ;;  %v1558_v53 = vld [vmem:[%s2241_s16 + $0x10] sm:$0xff] }
 0x3d0   : > { %1487 = vmatmul.msk.bf16.vlgmr.msra.gmra.mxu2 %vm850_vm5, %v943_v54  ;;  %1287 = vmatpush.bf16.msra.mxu1 %v1560_v51  ;;  %v1557_v54 = vld [vmem:[%s2241_s16 + $0x8] sm:$0xff] }
 0x3d2   : > { %v1668_v56 = vpop.eup %1667 }
 0x3d3   : > { %v1007_v58 = vmul.f32 %v1668_v56, %v1660_v39  ;;  %v1067_v59 = vpop.xlane.xlu1 %1066  ;;  %v1647_v56 = vld [vmem:[%s2284_s1] ss:$0 sm:$0xff] }
 0x3d4   : > { %1669 = vrcp.f32 %v1067_v59  ;;  %1288 = vmatpush.bf16.msra.mxu1 %v1559_v52 }
 0x3d5   : > { %v1008_v62 = vpack.c.bf16 %v1007_v58, %v1007_v58 }
 0x3d8   : > { %1289 = vmatpush.bf16.msra.mxu1 %v1558_v53 }
 0x3da   : > { %v1670_v0 = vpop.eup %1669 }
 0x3db   : > { %v898_v57 = vpop.f32.mrf.mxu0  ;;  %v1069_v1 = vmul.f32 %v1670_v0, %v1664_v45 }
 0x3dc   : > { %902 = vst.msk [vmem:[#allocation2] sm:$0xff] %vm850_vm5, %v898_v57  ;;  %1290 = vmatpush.bf16.msra.mxu1 %v1557_v54 }
 0x3dd   : > { %v1070_v4 = vpack.c.bf16 %v1069_v1, %v1069_v1 }
 0x3de   : > { %v1010_v60 = vpop.permute.xlu0 %1009 }
 0x3df   : > { %v1015_v61 = vsel %vm885_vm6, %v1010_v60, 0 }
 0x3e0   : > { %1024 = vmatpush.bf16.msra.mxu0 %v1015_v61  ;;  %1291 = vmatpush.bf16.msra.mxu1 %v1556_v55 }
 0x3e3   : > { %v900_v63 = vpop.f32.mrf.mxu0  ;;  %1489 = vmatmul.msk.bf16.vlgmr.msra.gmra.mxu0 %vm850_vm5, %v1008_v62 }
 0x3e4   : > { %1199 = vmatpush.bf16.msrb.mxu0 %v1555_v30 }
 0x3eb   : > { %v1072_v2 = vpop.permute.xlu1 %1071 }
 0x3ec   : > { %v1077_v3 = vsel %vm885_vm6, %v1072_v2, 0 }
 0x3ed   : > { %1086 = vmatpush.bf16.msrb.mxu2 %v1077_v3 }
 0x3f0   : > { %1491 = vmatmul.msk.bf16.vlgmr.msrb.gmra.mxu2 %vm850_vm5, %v1070_v4 }
 0x453   : > { %v964_v5 = vpop.f32.mrf.mxu2 }
 0x454   : > { %969 = vrot.lane.b32.xlu2 %v964_v5, %s1829_s13  ;;  %s2288_s13 = sld [smem:[#allocation29_spill]] }
 0x45b   : > { %v966_v6 = vpop.f32.mrf.mxu2 }
 0x45c   : > { %v1648_v6 = vld [vmem:[%s2285_s0] ss:$0 sm:$0xff]  ;;  %s1349_s0 = sshll.u32 %s1345_s15, 4  ;;  %s1350_s0 = int_to_ptr.hbm [resolvable:$true] %s1349_s0 }
 0x45d   : > { %s1751_s29 = sshra.s32 %s1350_s0, 4  ;;  %s1752_s29 = int_to_ptr.hbm [resolvable:$true] %s1751_s29 }
 0x45e   : > { %s1753_s26 = scalar_lea.hbm %s1752_s29, 4  ;;  %p1758_p7 = scmp.lt.s32.totalorder %s1752_s29, %s2289_s12 }
 0x45f   : > { %p1754_p4 = scmp.ne.s32.totalorder %s1752_s29, %s1753_s26  ;;  %p1759_p8 = scmp.lt.s32.totalorder %s1757_s17, %s1753_s26 }
 0x460   : > { %v1026_v7 = vpop.f32.mrf.mxu0 }
 0x461   : > { %1031 = vrot.lane.b32.xlu2 %v1026_v7, %s1830_s24  ;;  %s2282_s24 = sld [smem:[#allocation24_spill]]  ;;  %p1755_p5 = pnand %p1754_p4, %p1988_p9 }
 0x462   : > { %p1760_p10 = por %p1759_p8, %p1758_p7 }
 0x463   : > { %p1756_p6 = pneg %p1755_p5 }
 0x465   : > { %p1761_p13 = pnand %p1760_p10, %p1756_p6 }
 0x467   : > { %v1645_v42 = vld [vmem:[%s2282_s24] ss:$0 sm:$0xff] }
 0x468   : > { %v1028_v8 = vpop.f32.mrf.mxu0 }
 0x473   : > { %v1088_v10 = vpop.f32.mrf.mxu2 }
 0x474   : > { %1093 = vrot.lane.b32.xlu0 %v1088_v10, %s1831_s23 }
 0x47b   : > { %v1090_v11 = vpop.f32.mrf.mxu2 }
 0x4ae   : > { %v970_v12 = vpop.permute.xlu2 %969 }
 0x4af   : > { %973 = vst.msk [vmem:[#allocation2] sm:$0xff] %vm972_vm7, %v970_v12 }
 0x4bb   : > { %v1032_v13 = vpop.permute.xlu2 %1031 }
 0x4bc   : > { %1035 = vst.msk [vmem:[#allocation2] sm:$0xff] %vm1034_vm8, %v1032_v13 }
 0x4e6   : > { %v1094_v16 = vpop.permute.xlu0 %1093 }
 0x4e7   : > { %1097 = vst.msk [vmem:[#allocation2] sm:$0xff] %vm1096_vm9, %v1094_v16 }
 0x4ee   : > { %v1098_v17 = vld [vmem:[#allocation2] sm:$0xff] }
 0x4ef   : > { %v1099_v18 = vpack.c.bf16 %v1098_v17, %v1098_v17 }
 0x4f1   : > { %1500 = vmatmul.msk.bf16.vlgmr.msra.gmra.mxu3 %vm701_vm0, %v1099_v18 }
 0x574   : > { %v1132_v20 = vpop.f32.mrf.mxu3 }
 0x575   : > { %v1133_v21 = vadd.f32 %v1644_v19, %v1132_v20 }
 0x577   : > { %v1136_v22 = vadd.f32 %v1133_v21, %v2061_v35  ;;  %v1554_v35 = vld [vmem:[%s2239_s14] sm:$0xff] }
 0x578   : > { %1200 = vmatpush.bf16.msrb.mxu0 %v1554_v35 }
 0x579   : > { %v1139_v23 = vsel %vm701_vm0, %v1136_v22, 0.0 }
 0x57a   : > { %1140 = vadd.xlane.f32.xlu1 %v1139_v23 }
 0x57c   : > { %v1134_v24 = vpop.f32.mrf.mxu3 }
 0x5ed   : > { %v1141_v25 = vpop.xlane.xlu1 %1140 }
 0x5ee   : > { %v1142_v26 = vmul.f32 %v1141_v25, %v2032_v9 }
 0x5f0   : > { %v1143_v27 = vsub.f32 %v1136_v22, %v1142_v26 }
 0x5f2   : > { %v1144_v28 = vmul.f32 %v1143_v27, %v1143_v27 }
 0x5f4   : > { %v1145_v29 = vsel %vm701_vm0, %v1144_v28, 0.0 }
 0x5f5   : > { %1146 = vadd.xlane.f32.xlu2 %v1145_v29 }
 0x668   : > { %v1147_v32 = vpop.xlane.xlu2 %1146 }
 0x669   : > { %v1148_v33 = vmul.f32 %v1147_v32, %v2032_v9 }
 0x66b   : > { %v1149_v34 = vadd.f32 1e-12, %v1148_v33 }
 0x66d   : > { %1671 = vrsqrt.f32 %v1149_v34  ;;  %vm1156_vm11 = vweird.f32 %v1149_v34 }
 0x673   : > { %v1672_v36 = vpop.eup %1671 }
 0x674   : > { %v1151_v37 = vmul.f32 %v1672_v36, %v1149_v34  ;;  %vm1157_vm10 = vweird.f32 %v1672_v36 }
 0x675   : > { %vm1158_vm12 = vmor %vm1156_vm11, %vm1157_vm10 }
 0x676   : > { %v1152_v38 = vmul.f32 %v1672_v36, %v1151_v37 }
 0x678   : > { %v1153_v39 = vmul.f32 0.5, %v1152_v38 }
 0x67a   : > { %v1154_v40 = vsub.f32 1.5, %v1153_v39 }
 0x67c   : > { %v1155_v41 = vmul.f32 %v1672_v36, %v1154_v40 }
 0x67e   : > { %v1159_v43 = vsel %vm1158_vm12, %v1672_v36, %v1155_v41 }
 0x67f   : > { %v1160_v45 = vmul.f32 %v1159_v43, %v1143_v27  ;;  %v1649_v27 = vld [vmem:[%s2287_s28] ss:$0 sm:$0xff] }
 0x681   : > { %v1164_v46 = vmul.f32 %v1645_v42, %v1160_v45 }
 0x683   : > { %v1168_v47 = vadd.f32 %v1646_v44, %v1164_v46 }
 0x685   : > { %v1169_v48 = vpack.c.bf16 %v1168_v47, %v1168_v47 }
 0x687   : > { %1509 = vmatmul.msk.bf16.vlgmr.msrb.gmra.mxu0 %vm701_vm0, %v1169_v48 }
 0x704   : > { %v1202_v57 = vpop.f32.mrf.mxu0 }
 0x705   : > { %v1203_v58 = vadd.f32 %v1647_v56, %v1202_v57 }
 0x707   : > { %v1206_v59 = vmul.f32 %v1203_v58, %v1203_v58 }
 0x709   : > { %v1207_v60 = vmul.f32 %v1206_v59, %v1203_v58 }
 0x70b   : > { %v1208_v61 = vmul.f32 0.044715, %v1207_v60 }
 0x70c   : > { %v1204_v62 = vpop.f32.mrf.mxu0 }
 0x70d   : > { %v1209_v63 = vadd.f32 %v1208_v61, %v1203_v58 }
 0x70f   : > { %v1210_v0 = vmul.f32 0.7978846, %v1209_v63 }
 0x711   : > { %1673 = vtanh.f32 %v1210_v0 }
 0x717   : > { %v1674_v1 = vpop.eup %1673 }
 0x718   : > { %v1212_v2 = vadd.f32 1.0, %v1674_v1 }
 0x71a   : > { %v1213_v3 = vmul.f32 0.5, %v1212_v2 }
 0x71c   : > { %v1214_v4 = vmul.f32 %v1213_v3, %v1203_v58 }
 0x71e   : > { %v1215_v5 = vpack.c.bf16 %v1214_v4, %v1214_v4 }
 0x720   : > { %1292 = vmatmul.bf16.vlgmr.msra.gmra.mxu1 %v1215_v5 }
 0x79d   : > { %v1293_v7 = vpop.f32.mrf.mxu1 }
 0x79e   : > { %v1294_v8 = vadd.f32 %v1648_v6, %v1293_v7 }
 0x7a0   : > { %v1297_v10 = vadd.f32 %v1294_v8, %v1168_v47 }
 0x7a2   : > { %v1300_v11 = vsel %vm701_vm0, %v1297_v10, 0.0 }
 0x7a3   : > { %1301 = vadd.xlane.f32.xlu0 %v1300_v11 }
 0x7a5   : > { %v1295_v12 = vpop.f32.mrf.mxu1 }
 0x816   : > { %v1302_v13 = vpop.xlane.xlu0 %1301 }
 0x817   : > { %v1303_v14 = vmul.f32 %v1302_v13, %v2032_v9 }
 0x819   : > { %v1304_v15 = vsub.f32 %v1297_v10, %v1303_v14 }
 0x81b   : > { %v1305_v16 = vmul.f32 %v1304_v15, %v1304_v15 }
 0x81d   : > { %v1306_v17 = vsel %vm701_vm0, %v1305_v16, 0.0  ;;  %vm1331_vm0 = vcmask 257024  }
 0x81e   : > { %1307 = vadd.xlane.f32.xlu1 %v1306_v17 }
 0x891   : > { %v1308_v18 = vpop.xlane.xlu1 %1307 }
 0x892   : > { %v1309_v19 = vmul.f32 %v1308_v18, %v2032_v9  ;;  %v1650_v9 = vld [vmem:[%s2288_s13] ss:$0 sm:$0xff] }
 0x894   : > { %v1310_v20 = vadd.f32 1e-12, %v1309_v19 }
 0x896   : > { %1675 = vrsqrt.f32 %v1310_v20  ;;  %vm1317_vm14 = vweird.f32 %v1310_v20 }
 0x89c   : > { %v1676_v21 = vpop.eup %1675 }
 0x89d   : > { %v1312_v22 = vmul.f32 %v1676_v21, %v1310_v20  ;;  %vm1318_vm13 = vweird.f32 %v1676_v21 }
 0x89e   : > { %vm1319_vm15 = vmor %vm1317_vm14, %vm1318_vm13 }
 0x89f   : > { %v1313_v23 = vmul.f32 %v1676_v21, %v1312_v22 }
 0x8a1   : > { %v1314_v24 = vmul.f32 0.5, %v1313_v23 }
 0x8a3   : > { %v1315_v25 = vsub.f32 1.5, %v1314_v24 }
 0x8a5   : > { %v1316_v26 = vmul.f32 %v1676_v21, %v1315_v25 }
 0x8a7   : > { %v1320_v28 = vsel %vm1319_vm15, %v1676_v21, %v1316_v26 }
 0x8a8   : > { %v1321_v29 = vmul.f32 %v1320_v28, %v1304_v15 }
 0x8aa   : > { %v1325_v30 = vmul.f32 %v1649_v27, %v1321_v29 }
 0x8ac   : > { %v1329_v35 = vadd.f32 %v1650_v9, %v1325_v30 }
 0x8ae   : > { %v1330_v31 = vpack.c.bf16 %v1329_v35, %v1329_v35 }
 0x8b0   : > { %1332 = vst.msk [vmem:[%s695_s4] sm:$0xf] %vm1331_vm0, %v1330_v31 }
 0x8b1   : > { %1764 = shalt.err (!%p1761_p13)
}
 0x8b2   : > { %1568 = dma.vmem_to_hbm [thread:$0]  (%p1988_p9), %s1348_s30, 64, %s1350_s0, %s1334_s21  }
 0x8b3 PF: > { %s2291_s20 = sld [smem:[#allocation12_spill]]  ;;  %p1578_p0 = pnand %p1451_p12, %p1995_p11 }
 0x8b5   : > { %p1579_p1 = pneg %p1578_p0 }
 0x8b9   : > { %s1361_s24 = sand.u32 1, %s2291_s20  }
 0x8ba   : > { %s1362_s23 = scalar_lea.sflag [#allocation5], %s1361_s24 }
 0x8bb   : > { %1798 = dma.done.wait (%p1579_p1), %s1362_s23, 64  }
 0x8bc   : > { %1800 = vsyncadd (%p1579_p1), %s1362_s23, 4294967232  ;;  %s39_s25 = sadd.s32 1, %s1823_s25   ;;  %s2293_s15 = sld [smem:[#allocation13_spill]] }
 0x8bd   : > { %p36_p2 = scmp.ge.s32.totalorder %s39_s25, 4   ;;  %s2294_s23 = sld [smem:[#allocation17_spill]] }
 0x8be   : > { %s2295_s4 = sld [smem:[#allocation15_spill]]  ;;  %s2296_s1 = smov %s1807_s22 }
 0x8bf   : > { %s2298_s24 = smov %s1819_s2 }
 0x8c0   :  { %38 = sbr.rel (!%p36_p2) target bundleno = 21 (0x15), region = 158 }
 0x8c2   : > { %s2297_s22 = smov %s2293_s15 }
 0x8c4   : > { %s2299_s2 = smov %s2295_s4 }
 0x8c5   :  { %1368 = vsyncpa [#allocation4], 1 }
 0x8c6   :  { %1370 = vsyncpa [#allocation4 + $0x1], 1 }
 0x8c7   :  { %1371 = vsyncpa [#allocation7], 1 }
 0x8c8   :  { %1373 = vsyncpa [#allocation7 + $0x1], 1 }
 0x8c9   :  { %1374 = vsyncpa [#allocation5], 1 }
 0x8ca   :  { %1376 = vsyncpa [#allocation5 + $0x1], 1 }

// kernel: tpu_custom_call.1
= control target key start
LH: loop header
LB: loop body
LE: loop exit
PB: predicated region body
PF: predicated region fallthrough
CT: control target
= control target key end

     0   :  { %s2225_s0 = inlined_call_operand.hbm [shape: bf16[2,8,32], index: 0, kind: input, shape index: {}]   ;;  %s2226_s1 = inlined_call_operand.hbm [shape: f32[2,1,8], index: 1, kind: input, shape index: {}]   ;;  %s2227_s2 = inlined_call_operand.vmem [shape: f32[1,32], index: 2, kind: input, shape index: {}]   ;;  %s2228_s3 = inlined_call_operand.vmem [shape: f32[1,32], index: 3, kind: input, shape index: {}]   ;;  %s2229_s4 = inlined_call_operand.vmem [shape: bf16[32,32], index: 4, kind: input, shape index: {}]   ;;  %s2230_s5 = inlined_call_operand.vmem [shape: f32[1,32], index: 5, kind: input, shape index: {}]   ;;  %s2231_s6 = inlined_call_operand.vmem [shape: bf16[32,32], index: 6, kind: input, shape index: {}]   ;;  %s2232_s7 = inlined_call_operand.vmem [shape: f32[1,32], index: 7, kind: input, shape index: {}]   ;;  %s2233_s8 = inlined_call_operand.vmem [shape: bf16[32,32], index: 8, kind: input, shape index: {}]   ;;  %s2234_s9 = inlined_call_operand.vmem [shape: f32[1,32], index: 9, kind: input, shape index: {}]   ;;  %s2235_s10 = inlined_call_operand.vmem [shape: bf16[32,32], index: 10, kind: input, shape index: {}]   ;;  %s2236_s11 = inlined_call_operand.vmem [shape: f32[1,32], index: 11, kind: input, shape index: {}]   ;;  %s2237_s12 = inlined_call_operand.vmem [shape: f32[1,32], index: 12, kind: input, shape index: {}]   ;;  %s2238_s13 = inlined_call_operand.vmem [shape: f32[1,32], index: 13, kind: input, shape index: {}]   ;;  %s2239_s14 = inlined_call_operand.vmem [shape: bf16[32,128], index: 14, kind: input, shape index: {}]   ;;  %s2240_s15 = inlined_call_operand.vmem [shape: f32[1,128], index: 15, kind: input, shape index: {}]   ;;  %s2241_s16 = inlined_call_operand.vmem [shape: bf16[128,32], index: 16, kind: input, shape index: {}]   ;;  %s2242_s17 = inlined_call_operand.vmem [shape: f32[1,32], index: 17, kind: input, shape index: {}]   ;;  %s2243_s18 = inlined_call_operand.vmem [shape: f32[1,32], index: 18, kind: input, shape index: {}]   ;;  %s2244_s19 = inlined_call_operand.vmem [shape: f32[1,32], index: 19, kind: input, shape index: {}]   ;;  %s2245_s20 = inlined_call_operand.hbm [shape: bf16[2,8,32], index: 20, kind: output, shape index: {}]  }
   0x1   :  { %2254 = sst [smem:[#allocation19_spill]] %s2225_s0 }
   0x2   :  { %2255 = sst [smem:[#allocation20_spill]] %s2226_s1 }
   0x3   :  { %2256 = sst [smem:[#allocation21_spill]] %s2227_s2 }
   0x4   :  { %2257 = sst [smem:[#allocation22_spill]] %s2228_s3 }
   0x5   :  { %2258 = sst [smem:[#allocation23_spill]] %s2229_s4 }
   0x6   :  { %2259 = sst [smem:[#allocation24_spill]] %s2237_s12 }
   0x7   :  { %2260 = sst [smem:[#allocation25_spill]] %s2238_s13 }
   0x8   :  { %2261 = sst [smem:[#allocation26_spill]] %s2240_s15 }
   0x9   :  { %2262 = sst [smem:[#allocation27_spill]] %s2242_s17 }
   0xa   :  { %2263 = sst [smem:[#allocation28_spill]] %s2243_s18 }
   0xb   :  { %2264 = sst [smem:[#allocation29_spill]] %s2244_s19 }
   0xc   :  { %2265 = sst [smem:[#allocation30_spill]] %s2245_s20 }
   0xd   :  { %25 = vsyncpa [#allocation4], 0 }
   0xe   :  { %27 = vsyncpa [#allocation4 + $0x1], 0 }
   0xf   :  { %28 = vsyncpa [#allocation7], 0 }
  0x10   :  { %30 = vsyncpa [#allocation7 + $0x1], 0 }
  0x11   :  { %31 = vsyncpa [#allocation5], 0 }
  0x12   :  { %33 = vsyncpa [#allocation5 + $0x1], 0  ;;  %s1937_s1 = smov 0   ;;  %s1939_s22 = smov 0  }
  0x13   :  { %s1941_s23 = smov 0   ;;  %s1943_s24 = smov 0  }
  0x14   :  { %s1945_s2 = smov 0   ;;  %s1947_s25 = smov 0  }
  0x15 LB: > { %2266 = sst [smem:[#allocation12_spill]] %s1803_s1  ;;  %s1448_s3 = sadd.s32 4294967295, %s1823_s25   ;;  %s1823_s25 = sphi %s1947_s25, %s39_s25   ;;  %s1819_s2 = sphi %s1945_s2, %s2299_s2   ;;  %s1815_s24 = sphi %s1943_s24, %s2298_s24   ;;  %s1811_s23 = sphi %s1941_s23, %s2294_s23   ;;  %s1807_s22 = sphi %s1939_s22, %s2297_s22   ;;  %s1803_s1 = sphi %s1937_s1, %s2296_s1  }
  0x16   : > { %2267 = sst [smem:[#allocation13_spill]] %s1811_s23  ;;  %s1449_s26 = sadd.s32 4294967294, %s1823_s25  }
  0x17   : > { %2268 = sst [smem:[#allocation14_spill]] %s1815_s24  ;;  %s51_s27 = sadd.s32 1, %s1819_s2 }
  0x18   : > { %s58_s28 = sadd.s32 1, %s1811_s23  ;;  %p53_p0 = scmp.ge.s32.totalorder %s51_s27, 2 }
  0x19   : > { %p65_p1 = scmp.ne.s32.totalorder %s1811_s23, %s1807_s22  ;;  %p66_p2 = scmp.eq.s32.totalorder %s1823_s25, 0 }
  0x1a   : > { %p71_p3 = scmp.ne.s32.totalorder %s1807_s22, %s1803_s1  ;;  %s2301_s27 = smov (%p53_p0, %s51_s27), 0 }
  0x1b   : > { %2269 = sst [smem:[#allocation15_spill]] %s2301_s27  ;;  %p1978_p4 = por %p66_p2, %p65_p1 }
  0x1c   : > { %p72_p5 = scmp.eq.s32.totalorder %s1448_s3, 0  ;;  %s55_s29 = ssub.s32 %s1819_s2, %s2301_s27 }
  0x1d   : > { %p501_p6 = scmp.eq.s32.totalorder %s1448_s3, 1  ;;  %p56_p7 = scmp.eq.s32.totalorder %s55_s29, 0 }
  0x1e   : > { %p1984_p8 = por %p72_p5, %p71_p3  ;;  %p507_p10 = scmp.eq.s32.totalorder %s1449_s26, 1 }
  0x1f   : > { %p1988_p9 = por %p501_p6, %p65_p1  ;;  %p1451_p12 = scmp.ge.s32.totalorder %s1823_s25, 2 }
  0x20   : > { %s1993_s21 = scalar_select %p56_p7, %s1811_s23, %s58_s28  }
  0x21   : > { %s2272_s0 = scalar_select %p1988_p9, 1, 0 }
  0x22   : > { %2274 = sst [smem:[#allocation17_spill]] %s1993_s21  ;;  %p1995_p11 = por %p507_p10, %p71_p3 }
  0x23   : > { %2273 = sst [smem:[#allocation16_spill]] %s2272_s0  ;;  %p1581_p13 = scmp.lt.s32.totalorder %s1823_s25, 2 }
  0x24   : > { %s2275_s1 = scalar_select %p1995_p11, 1, 0 }
  0x25   : > { %s581_s3 = sand.u32 1, %s1811_s23   ;;  %s1453_s27 = sshll.u32 %s1819_s2, 2 }
  0x26   : > { %2276 = sst [smem:[#allocation18_spill]] %s2275_s1  ;;  %s1452_s29 = sshll.u32 %s581_s3, 2 }
  0x27   : > { %s2277_s18 = sld [smem:[#allocation19_spill]]  ;;  %s585_s0 = scalar_lea.vmem [#allocation3], %s1452_s29 }
  0x28   : > { %s593_s17 = sshll.u32 %s585_s0, 4  ;;  %p1571_p0 = pnand %p1581_p13, %p1978_p4  ;;  %s594_s17 = int_to_ptr.vmem [resolvable:$true] %s593_s17 }
  0x29   : > { %p1454_p1 = scmp.ge.s32.totalorder %s1823_s25, 1  ;;  %p615_p2 = scmp.lt.s32.totalorder %s1823_s25, 3 }
  0x2a   : > { %s582_s28 = scalar_lea.sflag [#allocation4], %s581_s3  ;;  %s2278_s1 = sld [smem:[#allocation20_spill]] }
  0x2b   : > { %p616_p3 = pnand %p1454_p1, %p615_p2  ;;  %s603_s13 = scalar_lea.vmem [#allocation6], %s581_s3 }
  0x2c   : > { %s610_s12 = sshll.u32 %s603_s13, 4  ;;  %s2015_s20 = sand.u32 (!%p616_p3), 1, %s1807_s22   ;;  %s611_s12 = int_to_ptr.vmem [resolvable:$true] %s610_s12 }
  0x2d   : > { %s589_s24 = scalar_lea.hbm %s2277_s18, %s1453_s27  ;;  %s601_s18 = scalar_lea.sflag [#allocation7], %s581_s3 }
  0x2e   : > { %s591_s26 = sshll.u32 %s589_s24, 4  ;;  %619 = sbr.rel (%p616_p3) target bundleno = 2227 (0x8b3), region = 100  ;;  %s592_s26 = int_to_ptr.hbm [resolvable:$true] %s591_s26 }
  0x2f   : > { %1573 = dma.hbm_to_vmem [thread:$0]  (!%p1571_p0), %s592_s26, 64, %s594_s17, %s582_s28  }
  0x30   : > { %s606_s15 = scalar_lea.hbm %s2278_s1, %s1819_s2  ;;  %s1455_s17 = sshll.u32 (!%p616_p3), %s2015_s20, 2 }
  0x31   : > { %s608_s19 = sshll.u32 %s606_s15, 4  ;;  %s622_s24 = scalar_lea.sflag (!%p616_p3), [#allocation4], %s2015_s20  ;;  %s609_s19 = int_to_ptr.hbm [resolvable:$true] %s608_s19 }
  0x32   : > { %1576 = dma.hbm_to_vmem [thread:$0]  (!%p1571_p0), %s609_s19, 16, %s611_s12, %s601_s18  }
  0x33   : > { %s625_s23 = scalar_lea.vmem [#allocation3], %s1455_s17 }
  0x34   : > { %1790 = dma.done.wait (%p1984_p8), %s622_s24, 64  }
  0x35   : > { %1792 = vsyncadd (%p1984_p8), %s622_s24, 4294967232  ;;  %s632_s12 = scalar_lea.sflag [#allocation7], %s2015_s20  ;;  %s634_s13 = scalar_lea.vmem [#allocation6], %s2015_s20 }
  0x36   : > { %1794 = dma.done.wait (%p1984_p8), %s632_s12, 16  }
  0x37   : > { %1796 = vsyncadd (%p1984_p8), %s632_s12, 4294967280  ;;  %vm701_vm0 = vcmask 261120   ;;  %v697_v0 = vld [vmem:[%s625_s23] sm:$0xf]  ;;  %v1825_v3 = vmov 32.0   ;;  %s2279_s27 = sld [smem:[#allocation23_spill]] }
  0x38   : > { %v698_v1 = vunpack.c.l.bf16 %v697_v0  ;;  %1651 = vrcp.f32 %v1825_v3  ;;  %v1549_v16 = vld [vmem:[%s2231_s6 + $0x8] sm:$0xff]  ;;  %v1548_v18 = vld [vmem:[%s2231_s6] sm:$0xff]  ;;  %s2280_s12 = sld [smem:[#allocation21_spill]]  ;;  %vm850_vm5 = vcmask 64512   ;;  %s1826_s29 = smov 112   ;;  %vm885_vm6 = vcmask 1043456  }
  0x39   : > { %803 = vmatpush.bf16.msra.mxu2 %v1549_v16  ;;  %v1551_v19 = vld [vmem:[%s2233_s8 + $0x8] sm:$0xff]  ;;  %v1550_v22 = vld [vmem:[%s2233_s8] sm:$0xff]  ;;  %s2281_s4 = sld [smem:[#allocation22_spill]]  ;;  %s1827_s26 = smov 120   ;;  %vm972_vm7 = vcmask 130112   ;;  %vm1034_vm8 = vcmask 195712  }
  0x3a   : > { %v702_v2 = vsel %vm701_vm0, %v698_v1, 0.0  ;;  %v1640_v37 = vld [vmem:[%s2230_s5] ss:$0 sm:$0xff]  ;;  %s1828_s18 = smov 104   ;;  %s1830_s24 = smov 16   ;;  %vm1096_vm9 = vcmask 261312  }
  0x3b   : > { %703 = vadd.xlane.f32.xlu0 %v702_v2  ;;  %v1641_v41 = vld [vmem:[%s2232_s7] ss:$0 sm:$0xff]  ;;  %s1831_s23 = smov 24   ;;  %s2283_s15 = sld [smem:[#allocation25_spill]] }
  0x3c   : > { %v1642_v53 = vld [vmem:[%s2234_s9] ss:$0 sm:$0xff]  ;;  %s2284_s1 = sld [smem:[#allocation26_spill]] }
  0x3d   : > { %v1547_v15 = vld [vmem:[%s2279_s27 + $0x8] sm:$0xff]  ;;  %v1546_v17 = vld [vmem:[%s2279_s27] sm:$0xff]  ;;  %804 = vmatpush.bf16.msra.mxu2 %v1548_v18  ;;  %s2285_s0 = sld [smem:[#allocation27_spill]] }
  0x3e   : > { %v1652_v4 = vpop.eup %1651  ;;  %769 = vmatpush.bf16.msra.mxu0 %v1547_v15  ;;  %v1638_v30 = vld [vmem:[%s2280_s12] ss:$0 sm:$0xff]  ;;  %s2286_s21 = sld [smem:[#allocation14_spill]] }
  0x3f   : > { %v706_v5 = vmul.f32 32.0, %v1652_v4  ;;  %vm710_vm1 = vweird.f32 %v1652_v4  ;;  %v1639_v33 = vld [vmem:[%s2281_s4] ss:$0 sm:$0xff]  ;;  %s2287_s28 = sld [smem:[#allocation28_spill]]  ;;  %s695_s4 = scalar_lea.vmem [#allocation8], %s1455_s17 }
  0x40   : > { %v1643_v3 = vld [vmem:[%s634_s13] ss:$0 sm:$0xff]  ;;  %s1829_s13 = smov 8   ;;  %s2289_s12 = sld [smem:[#allocation30_spill]] }
  0x41   : > { %v707_v6 = vsub.f32 1.0, %v706_v5  ;;  %836 = vmatpush.bf16.msrb.mxu2 %v1551_v19  ;;  %s1347_s30 = sshll.u32 %s695_s4, 4  ;;  %s1348_s30 = int_to_ptr.vmem [resolvable:$true] %s1347_s30 }
  0x42   : > { %770 = vmatpush.bf16.msra.mxu0 %v1546_v17 }
  0x43   : > { %v708_v7 = vmul.f32 %v1652_v4, %v707_v6 }
  0x44   : > { %s1543_s3 = sshll.u32 %s2286_s21, 2  ;;  %s1334_s21 = scalar_lea.sflag [#allocation5], %s2015_s20 }
  0x45   : > { %v709_v8 = vadd.f32 %v1652_v4, %v708_v7  ;;  %837 = vmatpush.bf16.msrb.mxu2 %v1550_v22 }
  0x46   : > { %s1757_s17 = scalar_lea.hbm %s2289_s12, 8 }
  0x47   : > { %v2032_v9 = vsel %vm710_vm1, %v1652_v4, %v709_v8 }
  0xae   : > { %v704_v10 = vpop.xlane.xlu0 %703 }
  0xaf   : > { %v712_v11 = vmul.f32 %v2032_v9, %v704_v10 }
  0xb1   : > { %v713_v12 = vsub.f32 %v698_v1, %v712_v11 }
  0xb3   : > { %v714_v13 = vmul.f32 %v713_v12, %v713_v12 }
  0xb5   : > { %v715_v14 = vsel %vm701_vm0, %v714_v13, 0.0 }
  0xb6   : > { %716 = vadd.xlane.f32.xlu0 %v715_v14 }
 0x129   : > { %v717_v20 = vpop.xlane.xlu0 %716 }
 0x12a   : > { %v718_v21 = vmul.f32 %v717_v20, %v2032_v9 }
 0x12c   : > { %v719_v23 = vadd.f32 1e-12, %v718_v21 }
 0x12e   : > { %1653 = vrsqrt.f32 %v719_v23  ;;  %vm726_vm3 = vweird.f32 %v719_v23 }
 0x134   : > { %v1654_v24 = vpop.eup %1653 }
 0x135   : > { %v721_v25 = vmul.f32 %v1654_v24, %v719_v23  ;;  %vm727_vm2 = vweird.f32 %v1654_v24 }
 0x136   : > { %vm728_vm4 = vmor %vm726_vm3, %vm727_vm2 }
 0x137   : > { %v722_v26 = vmul.f32 %v1654_v24, %v721_v25 }
 0x139   : > { %v723_v27 = vmul.f32 0.5, %v722_v26 }
 0x13b   : > { %v724_v28 = vsub.f32 1.5, %v723_v27 }
 0x13d   : > { %v725_v29 = vmul.f32 %v1654_v24, %v724_v28 }
 0x13f   : > { %v729_v31 = vsel %vm728_vm4, %v1654_v24, %v725_v29 }
 0x140   : > { %v730_v32 = vmul.f32 %v729_v31, %v713_v12 }
 0x142   : > { %v734_v34 = vmul.f32 %v1638_v30, %v730_v32 }
 0x144   : > { %v2061_v35 = vadd.f32 %v1639_v33, %v734_v34 }
 0x146   : > { %v739_v36 = vpack.c.bf16 %v2061_v35, %v2061_v35 }
 0x148   : > { %1465 = vmatmul.msk.bf16.vlgmr.msra.gmra.mxu0 %vm701_vm0, %v739_v36  ;;  %1474 = vmatmul.msk.bf16.vlgmr.msra.gmra.mxu2 %vm701_vm0, %v739_v36 }
 0x158   : > { %1483 = vmatmul.msk.bf16.vlgmr.msrb.gmra.mxu2 %vm701_vm0, %v739_v36 }
 0x1c5   : > { %v772_v38 = vpop.f32.mrf.mxu0 }
 0x1c6   : > { %v773_v39 = vadd.f32 %v1640_v37, %v772_v38 }
 0x1c8   : > { %v776_v40 = vmul.f32 0.35355338, %v773_v39 }
 0x1ca   : > { %v843_v42 = vpack.c.bf16 %v776_v40, %v776_v40 }
 0x1cb   : > { %v806_v43 = vpop.f32.mrf.mxu2 }
 0x1cc   : > { %v904_v44 = vunpack.c.l.b16 %v843_v42  ;;  %v807_v45 = vadd.f32 %v1641_v41, %v806_v43 }
 0x1cd   : > { %v774_v46 = vpop.f32.mrf.mxu0 }
 0x1ce   : > { %v844_v47 = vpack.c.bf16 %v807_v45, %v807_v45  ;;  %v905_v48 = vpack.c.b16 %v904_v44, %v904_v44 }
 0x1d0   : > { %v909_v49 = vunpack.c.l.b16 %v844_v47  ;;  %974 = vrot.lane.b32.xlu0 %v905_v48, %s1826_s29  ;;  %v855_v50 = vsel %vm850_vm5, %v844_v47, 0 }
 0x1d1   : > { %864 = vmatpush.bf16.xpose.msra.mxu3 %v855_v50 }
 0x1d2   : > { %v910_v51 = vpack.c.b16 %v909_v49, %v909_v49 }
 0x1d3   : > { %v808_v52 = vpop.f32.mrf.mxu2 }
 0x1d4   : > { %976 = vrot.lane.b32.xlu2 %v910_v51, %s1826_s29  ;;  %911 = vrot.lane.b32.xlu1 %v910_v51, %s1827_s26 }
 0x1d8   : > { %1484 = vmatmul.msk.bf16.vlgmr.msra.gmra.mxu3 %vm850_vm5, %v843_v42 }
 0x1db   : > { %v839_v54 = vpop.f32.mrf.mxu2 }
 0x1dc   : > { %v840_v55 = vadd.f32 %v1642_v53, %v839_v54  ;;  %1038 = vrot.lane.b32.xlu2 %v910_v51, %s1828_s18  ;;  %906 = vrot.lane.b32.xlu1 %v905_v48, %s1827_s26 }
 0x1de   : > { %v2084_v56 = vpack.c.bf16 %v840_v55, %v840_v55 }
 0x1e0   : > { %v887_v57 = vsel %vm885_vm6, %v2084_v56, 0  ;;  %v945_v47 = vunpack.c.l.b16 %v2084_v56 }
 0x1e1   : > { %896 = vmatpush.bf16.msrb.mxu0 %v887_v57 }
 0x1e3   : > { %v841_v58 = vpop.f32.mrf.mxu2 }
 0x1e4   : > { %1036 = vrot.lane.b32.xlu1 %v905_v48, %s1828_s18  ;;  %v946_v48 = vpack.c.b16 %v945_v47, %v945_v47 }
 0x22e   : > { %v977_v59 = vpop.permute.xlu2 %976 }
 0x22f   : > { %v982_v60 = vsel %vm850_vm5, %v977_v59, 0 }
 0x230   : > { %991 = vmatpush.bf16.xpose.msrb.mxu3 %v982_v60 }
 0x236   : > { %v1039_v62 = vpop.permute.xlu2 %1038 }
 0x237   : > { %v1044_v1 = vsel %vm850_vm5, %v1039_v62, 0 }
 0x242   : > { %v975_v61 = vpop.permute.xlu0 %974 }
 0x243   : > { %1488 = vmatmul.msk.bf16.vlgmr.msrb.gmra.mxu3 %vm850_vm5, %v975_v61 }
 0x246   : > { %v912_v63 = vpop.permute.xlu1 %911 }
 0x247   : > { %v917_v0 = vsel %vm850_vm5, %v912_v63, 0 }
 0x248   : > { %926 = vmatpush.bf16.xpose.msra.mxu1 %v917_v0 }
 0x24e   : > { %v907_v2 = vpop.permute.xlu1 %906 }
 0x24f   : > { %1486 = vmatmul.msk.bf16.vlgmr.msra.gmra.mxu1 %vm850_vm5, %v907_v2 }
 0x250   : > { %1053 = vmatpush.bf16.xpose.msrb.mxu1 %v1044_v1 }
 0x256   : > { %v1037_v6 = vpop.permute.xlu1 %1036 }
 0x25b   : > { %v866_v4 = vpop.f32.mrf.mxu3 }
 0x25c   : > { %v867_v5 = vadd.f32 %v1643_v3, %v866_v4 }
 0x25e   : > { %v870_v7 = vsel %vm850_vm5, %v867_v5, -inf }
 0x25f   : > { %1490 = vmatmul.msk.bf16.vlgmr.msrb.gmra.mxu1 %vm850_vm5, %v1037_v6  ;;  %871 = vmax.xlane.f32.xlu1 %v870_v7 }
 0x263   : > { %v868_v8 = vpop.f32.mrf.mxu3 }
 0x2c6   : > { %v993_v10 = vpop.f32.mrf.mxu3 }
 0x2c7   : > { %v994_v16 = vadd.f32 %v1643_v3, %v993_v10 }
 0x2c9   : > { %v997_v20 = vsel %vm850_vm5, %v994_v16, -inf }
 0x2cc   : > { %v928_v11 = vpop.f32.mrf.mxu1 }
 0x2cd   : > { %v929_v12 = vadd.f32 %v1643_v3, %v928_v11 }
 0x2ce   : > { %v995_v13 = vpop.f32.mrf.mxu3 }
 0x2cf   : > { %v932_v14 = vsel %vm850_vm5, %v929_v12, -inf }
 0x2d0   : > { %933 = vmax.xlane.f32.xlu2 %v932_v14  ;;  %v1553_v14 = vld [vmem:[%s2235_s10 + $0x8] sm:$0xff] }
 0x2d1   : > { %1129 = vmatpush.bf16.msra.mxu3 %v1553_v14 }
 0x2d2   : > { %v872_v15 = vpop.xlane.xlu1 %871 }
 0x2d3   : > { %v873_v17 = vsub.f32 %v867_v5, %v872_v15  ;;  %v1552_v15 = vld [vmem:[%s2235_s10] sm:$0xff] }
 0x2d4   : > { %v930_v18 = vpop.f32.mrf.mxu1 }
 0x2d5   : > { %v874_v19 = vmul.f32 1.442695, %v873_v17  ;;  %1130 = vmatpush.bf16.msra.mxu3 %v1552_v15 }
 0x2d7   : > { %1655 = vpow2.f32 %v874_v19  ;;  %v1644_v19 = vld [vmem:[%s2236_s11] ss:$0 sm:$0xff] }
 0x2d8   : > { %998 = vmax.xlane.f32.xlu2 %v997_v20 }
 0x2dc   : > { %v1055_v21 = vpop.f32.mrf.mxu1 }
 0x2dd   : > { %v1656_v22 = vpop.eup %1655  ;;  %v1056_v23 = vadd.f32 %v1643_v3, %v1055_v21 }
 0x2de   : > { %v876_v24 = vsel %vm850_vm5, %v1656_v22, 0.0 }
 0x2df   : > { %877 = vadd.xlane.f32.xlu1 %v876_v24  ;;  %v1059_v25 = vsel %vm850_vm5, %v1056_v23, -inf }
 0x2e0   : > { %1060 = vmax.xlane.f32.xlu0 %v1059_v25 }
 0x2e4   : > { %v1057_v26 = vpop.f32.mrf.mxu1 }
 0x343   : > { %v934_v27 = vpop.xlane.xlu2 %933 }
 0x344   : > { %v935_v28 = vsub.f32 %v929_v12, %v934_v27 }
 0x346   : > { %v936_v29 = vmul.f32 1.442695, %v935_v28 }
 0x348   : > { %1657 = vpow2.f32 %v936_v29 }
 0x34b   : > { %v999_v30 = vpop.xlane.xlu2 %998 }
 0x34c   : > { %v1000_v31 = vsub.f32 %v994_v16, %v999_v30  ;;  %v1555_v30 = vld [vmem:[%s2239_s14 + $0x8] sm:$0xff] }
 0x34e   : > { %v1658_v32 = vpop.eup %1657  ;;  %v1001_v33 = vmul.f32 1.442695, %v1000_v31  ;;  %v1563_v31 = vld [vmem:[%s2241_s16 + $0x38] sm:$0xff] }
 0x34f   : > { %v938_v34 = vsel %vm850_vm5, %v1658_v32, 0.0  ;;  %1284 = vmatpush.bf16.msra.mxu1 %v1563_v31 }
 0x350   : > { %1659 = vpow2.f32 %v1001_v33  ;;  %939 = vadd.xlane.f32.xlu2 %v938_v34 }
 0x352   : > { %v878_v36 = vpop.xlane.xlu1 %877 }
 0x353   : > { %1661 = vrcp.f32 %v878_v36  ;;  %v1061_v37 = vpop.xlane.xlu0 %1060 }
 0x354   : > { %v1062_v38 = vsub.f32 %v1056_v23, %v1061_v37 }
 0x356   : > { %v1660_v39 = vpop.eup %1659  ;;  %v1063_v40 = vmul.f32 1.442695, %v1062_v38 }
 0x357   : > { %v1003_v41 = vsel %vm850_vm5, %v1660_v39, 0.0 }
 0x358   : > { %1663 = vpow2.f32 %v1063_v40  ;;  %1004 = vadd.xlane.f32.xlu0 %v1003_v41 }
 0x359   : > { %v1662_v42 = vpop.eup %1661 }
 0x35a   : > { %v880_v43 = vmul.f32 %v1662_v42, %v1656_v22 }
 0x35c   : > { %v881_v44 = vpack.c.bf16 %v880_v43, %v880_v43 }
 0x35e   : > { %v1664_v45 = vpop.eup %1663  ;;  %1485 = vmatmul.msk.bf16.vlgmr.msrb.gmra.mxu0 %vm850_vm5, %v881_v44  ;;  %v1646_v44 = vld [vmem:[%s2283_s15] ss:$0 sm:$0xff]  ;;  %s1345_s15 = scalar_lea.hbm %s2289_s12, %s1543_s3 }
 0x35f   : > { %v1065_v46 = vsel %vm850_vm5, %v1664_v45, 0.0 }
 0x360   : > { %1066 = vadd.xlane.f32.xlu1 %v1065_v46 }
 0x368   : > { %947 = vrot.lane.b32.xlu2 %v946_v48, %s1827_s26 }
 0x36c   : > { %1009 = vrot.lane.b32.xlu0 %v946_v48, %s1826_s29 }
 0x379   : > { %1071 = vrot.lane.b32.xlu1 %v946_v48, %s1828_s18 }
 0x3c3   : > { %v940_v49 = vpop.xlane.xlu2 %939 }
 0x3c4   : > { %1665 = vrcp.f32 %v940_v49  ;;  %v1562_v49 = vld [vmem:[%s2241_s16 + $0x30] sm:$0xff] }
 0x3c5   : > { %1285 = vmatpush.bf16.msra.mxu1 %v1562_v49 }
 0x3ca   : > { %v1666_v50 = vpop.eup %1665 }
 0x3cb   : > { %v942_v51 = vmul.f32 %v1666_v50, %v1658_v32  ;;  %v948_v52 = vpop.permute.xlu2 %947  ;;  %v1005_v55 = vpop.xlane.xlu0 %1004  ;;  %v1561_v50 = vld [vmem:[%s2241_s16 + $0x28] sm:$0xff] }
 0x3cc   : > { %v953_v53 = vsel %vm885_vm6, %v948_v52, 0  ;;  %1667 = vrcp.f32 %v1005_v55  ;;  %1286 = vmatpush.bf16.msra.mxu1 %v1561_v50  ;;  %v1559_v52 = vld [vmem:[%s2241_s16 + $0x18] sm:$0xff]  ;;  %v1556_v55 = vld [vmem:[%s2241_s16] sm:$0xff] }
 0x3cd   : > { %v943_v54 = vpack.c.bf16 %v942_v51, %v942_v51  ;;  %962 = vmatpush.bf16.msra.mxu2 %v953_v53  ;;  %v1560_v51 = vld [vmem:[%s2241_s16 + $0x20] sm:$0xff]  ;;  %v1558_v53 = vld [vmem:[%s2241_s16 + $0x10] sm:$0xff] }
 0x3d0   : > { %1487 = vmatmul.msk.bf16.vlgmr.msra.gmra.mxu2 %vm850_vm5, %v943_v54  ;;  %1287 = vmatpush.bf16.msra.mxu1 %v1560_v51  ;;  %v1557_v54 = vld [vmem:[%s2241_s16 + $0x8] sm:$0xff] }
 0x3d2   : > { %v1668_v56 = vpop.eup %1667 }
 0x3d3   : > { %v1007_v58 = vmul.f32 %v1668_v56, %v1660_v39  ;;  %v1067_v59 = vpop.xlane.xlu1 %1066  ;;  %v1647_v56 = vld [vmem:[%s2284_s1] ss:$0 sm:$0xff] }
 0x3d4   : > { %1669 = vrcp.f32 %v1067_v59  ;;  %1288 = vmatpush.bf16.msra.mxu1 %v1559_v52 }
 0x3d5   : > { %v1008_v62 = vpack.c.bf16 %v1007_v58, %v1007_v58 }
 0x3d8   : > { %1289 = vmatpush.bf16.msra.mxu1 %v1558_v53 }
 0x3da   : > { %v1670_v0 = vpop.eup %1669 }
 0x3db   : > { %v898_v57 = vpop.f32.mrf.mxu0  ;;  %v1069_v1 = vmul.f32 %v1670_v0, %v1664_v45 }
 0x3dc   : > { %902 = vst.msk [vmem:[#allocation2] sm:$0xff] %vm850_vm5, %v898_v57  ;;  %1290 = vmatpush.bf16.msra.mxu1 %v1557_v54 }
 0x3dd   : > { %v1070_v4 = vpack.c.bf16 %v1069_v1, %v1069_v1 }
 0x3de   : > { %v1010_v60 = vpop.permute.xlu0 %1009 }
 0x3df   : > { %v1015_v61 = vsel %vm885_vm6, %v1010_v60, 0 }
 0x3e0   : > { %1024 = vmatpush.bf16.msra.mxu0 %v1015_v61  ;;  %1291 = vmatpush.bf16.msra.mxu1 %v1556_v55 }
 0x3e3   : > { %v900_v63 = vpop.f32.mrf.mxu0  ;;  %1489 = vmatmul.msk.bf16.vlgmr.msra.gmra.mxu0 %vm850_vm5, %v1008_v62 }
 0x3e4   : > { %1199 = vmatpush.bf16.msrb.mxu0 %v1555_v30 }
 0x3eb   : > { %v1072_v2 = vpop.permute.xlu1 %1071 }
 0x3ec   : > { %v1077_v3 = vsel %vm885_vm6, %v1072_v2, 0 }
 0x3ed   : > { %1086 = vmatpush.bf16.msrb.mxu2 %v1077_v3 }
 0x3f0   : > { %1491 = vmatmul.msk.bf16.vlgmr.msrb.gmra.mxu2 %vm850_vm5, %v1070_v4 }
 0x453   : > { %v964_v5 = vpop.f32.mrf.mxu2 }
 0x454   : > { %969 = vrot.lane.b32.xlu2 %v964_v5, %s1829_s13  ;;  %s2288_s13 = sld [smem:[#allocation29_spill]] }
 0x45b   : > { %v966_v6 = vpop.f32.mrf.mxu2 }
 0x45c   : > { %v1648_v6 = vld [vmem:[%s2285_s0] ss:$0 sm:$0xff]  ;;  %s1349_s0 = sshll.u32 %s1345_s15, 4  ;;  %s1350_s0 = int_to_ptr.hbm [resolvable:$true] %s1349_s0 }
 0x45d   : > { %s1751_s29 = sshra.s32 %s1350_s0, 4  ;;  %s1752_s29 = int_to_ptr.hbm [resolvable:$true] %s1751_s29 }
 0x45e   : > { %s1753_s26 = scalar_lea.hbm %s1752_s29, 4  ;;  %p1758_p7 = scmp.lt.s32.totalorder %s1752_s29, %s2289_s12 }
 0x45f   : > { %p1754_p4 = scmp.ne.s32.totalorder %s1752_s29, %s1753_s26  ;;  %p1759_p8 = scmp.lt.s32.totalorder %s1757_s17, %s1753_s26 }
 0x460   : > { %v1026_v7 = vpop.f32.mrf.mxu0 }
 0x461   : > { %1031 = vrot.lane.b32.xlu2 %v1026_v7, %s1830_s24  ;;  %s2282_s24 = sld [smem:[#allocation24_spill]]  ;;  %p1755_p5 = pnand %p1754_p4, %p1988_p9 }
 0x462   : > { %p1760_p10 = por %p1759_p8, %p1758_p7 }
 0x463   : > { %p1756_p6 = pneg %p1755_p5 }
 0x465   : > { %p1761_p13 = pnand %p1760_p10, %p1756_p6 }
 0x467   : > { %v1645_v42 = vld [vmem:[%s2282_s24] ss:$0 sm:$0xff] }
 0x468   : > { %v1028_v8 = vpop.f32.mrf.mxu0 }
 0x473   : > { %v1088_v10 = vpop.f32.mrf.mxu2 }
 0x474   : > { %1093 = vrot.lane.b32.xlu0 %v1088_v10, %s1831_s23 }
 0x47b   : > { %v1090_v11 = vpop.f32.mrf.mxu2 }
 0x4ae   : > { %v970_v12 = vpop.permute.xlu2 %969 }
 0x4af   : > { %973 = vst.msk [vmem:[#allocation2] sm:$0xff] %vm972_vm7, %v970_v12 }
 0x4bb   : > { %v1032_v13 = vpop.permute.xlu2 %1031 }
 0x4bc   : > { %1035 = vst.msk [vmem:[#allocation2] sm:$0xff] %vm1034_vm8, %v1032_v13 }
 0x4e6   : > { %v1094_v16 = vpop.permute.xlu0 %1093 }
 0x4e7   : > { %1097 = vst.msk [vmem:[#allocation2] sm:$0xff] %vm1096_vm9, %v1094_v16 }
 0x4ee   : > { %v1098_v17 = vld [vmem:[#allocation2] sm:$0xff] }
 0x4ef   : > { %v1099_v18 = vpack.c.bf16 %v1098_v17, %v1098_v17 }
 0x4f1   : > { %1500 = vmatmul.msk.bf16.vlgmr.msra.gmra.mxu3 %vm701_vm0, %v1099_v18 }
 0x574   : > { %v1132_v20 = vpop.f32.mrf.mxu3 }
 0x575   : > { %v1133_v21 = vadd.f32 %v1644_v19, %v1132_v20 }
 0x577   : > { %v1136_v22 = vadd.f32 %v1133_v21, %v2061_v35  ;;  %v1554_v35 = vld [vmem:[%s2239_s14] sm:$0xff] }
 0x578   : > { %1200 = vmatpush.bf16.msrb.mxu0 %v1554_v35 }
 0x579   : > { %v1139_v23 = vsel %vm701_vm0, %v1136_v22, 0.0 }
 0x57a   : > { %1140 = vadd.xlane.f32.xlu1 %v1139_v23 }
 0x57c   : > { %v1134_v24 = vpop.f32.mrf.mxu3 }
 0x5ed   : > { %v1141_v25 = vpop.xlane.xlu1 %1140 }
 0x5ee   : > { %v1142_v26 = vmul.f32 %v1141_v25, %v2032_v9 }
 0x5f0   : > { %v1143_v27 = vsub.f32 %v1136_v22, %v1142_v26 }
 0x5f2   : > { %v1144_v28 = vmul.f32 %v1143_v27, %v1143_v27 }
 0x5f4   : > { %v1145_v29 = vsel %vm701_vm0, %v1144_v28, 0.0 }
 0x5f5   : > { %1146 = vadd.xlane.f32.xlu2 %v1145_v29 }
 0x668   : > { %v1147_v32 = vpop.xlane.xlu2 %1146 }
 0x669   : > { %v1148_v33 = vmul.f32 %v1147_v32, %v2032_v9 }
 0x66b   : > { %v1149_v34 = vadd.f32 1e-12, %v1148_v33 }
 0x66d   : > { %1671 = vrsqrt.f32 %v1149_v34  ;;  %vm1156_vm11 = vweird.f32 %v1149_v34 }
 0x673   : > { %v1672_v36 = vpop.eup %1671 }
 0x674   : > { %v1151_v37 = vmul.f32 %v1672_v36, %v1149_v34  ;;  %vm1157_vm10 = vweird.f32 %v1672_v36 }
 0x675   : > { %vm1158_vm12 = vmor %vm1156_vm11, %vm1157_vm10 }
 0x676   : > { %v1152_v38 = vmul.f32 %v1672_v36, %v1151_v37 }
 0x678   : > { %v1153_v39 = vmul.f32 0.5, %v1152_v38 }
 0x67a   : > { %v1154_v40 = vsub.f32 1.5, %v1153_v39 }
 0x67c   : > { %v1155_v41 = vmul.f32 %v1672_v36, %v1154_v40 }
 0x67e   : > { %v1159_v43 = vsel %vm1158_vm12, %v1672_v36, %v1155_v41 }
 0x67f   : > { %v1160_v45 = vmul.f32 %v1159_v43, %v1143_v27  ;;  %v1649_v27 = vld [vmem:[%s2287_s28] ss:$0 sm:$0xff] }
 0x681   : > { %v1164_v46 = vmul.f32 %v1645_v42, %v1160_v45 }
 0x683   : > { %v1168_v47 = vadd.f32 %v1646_v44, %v1164_v46 }
 0x685   : > { %v1169_v48 = vpack.c.bf16 %v1168_v47, %v1168_v47 }
 0x687   : > { %1509 = vmatmul.msk.bf16.vlgmr.msrb.gmra.mxu0 %vm701_vm0, %v1169_v48 }
 0x704   : > { %v1202_v57 = vpop.f32.mrf.mxu0 }
 0x705   : > { %v1203_v58 = vadd.f32 %v1647_v56, %v1202_v57 }
 0x707   : > { %v1206_v59 = vmul.f32 %v1203_v58, %v1203_v58 }
 0x709   : > { %v1207_v60 = vmul.f32 %v1206_v59, %v1203_v58 }
 0x70b   : > { %v1208_v61 = vmul.f32 0.044715, %v1207_v60 }
 0x70c   : > { %v1204_v62 = vpop.f32.mrf.mxu0 }
 0x70d   : > { %v1209_v63 = vadd.f32 %v1208_v61, %v1203_v58 }
 0x70f   : > { %v1210_v0 = vmul.f32 0.7978846, %v1209_v63 }
 0x711   : > { %1673 = vtanh.f32 %v1210_v0 }
 0x717   : > { %v1674_v1 = vpop.eup %1673 }
 0x718   : > { %v1212_v2 = vadd.f32 1.0, %v1674_v1 }
 0x71a   : > { %v1213_v3 = vmul.f32 0.5, %v1212_v2 }
 0x71c   : > { %v1214_v4 = vmul.f32 %v1213_v3, %v1203_v58 }
 0x71e   : > { %v1215_v5 = vpack.c.bf16 %v1214_v4, %v1214_v4 }
 0x720   : > { %1292 = vmatmul.bf16.vlgmr.msra.gmra.mxu1 %v1215_v5 }
 0x79d   : > { %v1293_v7 = vpop.f32.mrf.mxu1 }
 0x79e   : > { %v1294_v8 = vadd.f32 %v1648_v6, %v1293_v7 }
 0x7a0   : > { %v1297_v10 = vadd.f32 %v1294_v8, %v1168_v47 }
 0x7a2   : > { %v1300_v11 = vsel %vm701_vm0, %v1297_v10, 0.0 }
 0x7a3   : > { %1301 = vadd.xlane.f32.xlu0 %v1300_v11 }
 0x7a5   : > { %v1295_v12 = vpop.f32.mrf.mxu1 }
 0x816   : > { %v1302_v13 = vpop.xlane.xlu0 %1301 }
 0x817   : > { %v1303_v14 = vmul.f32 %v1302_v13, %v2032_v9 }
 0x819   : > { %v1304_v15 = vsub.f32 %v1297_v10, %v1303_v14 }
 0x81b   : > { %v1305_v16 = vmul.f32 %v1304_v15, %v1304_v15 }
 0x81d   : > { %v1306_v17 = vsel %vm701_vm0, %v1305_v16, 0.0  ;;  %vm1331_vm0 = vcmask 257024  }
 0x81e   : > { %1307 = vadd.xlane.f32.xlu1 %v1306_v17 }
 0x891   : > { %v1308_v18 = vpop.xlane.xlu1 %1307 }
 0x892   : > { %v1309_v19 = vmul.f32 %v1308_v18, %v2032_v9  ;;  %v1650_v9 = vld [vmem:[%s2288_s13] ss:$0 sm:$0xff] }
 0x894   : > { %v1310_v20 = vadd.f32 1e-12, %v1309_v19 }
 0x896   : > { %1675 = vrsqrt.f32 %v1310_v20  ;;  %vm1317_vm14 = vweird.f32 %v1310_v20 }
 0x89c   : > { %v1676_v21 = vpop.eup %1675 }
 0x89d   : > { %v1312_v22 = vmul.f32 %v1676_v21, %v1310_v20  ;;  %vm1318_vm13 = vweird.f32 %v1676_v21 }
 0x89e   : > { %vm1319_vm15 = vmor %vm1317_vm14, %vm1318_vm13 }
 0x89f   : > { %v1313_v23 = vmul.f32 %v1676_v21, %v1312_v22 }
 0x8a1   : > { %v1314_v24 = vmul.f32 0.5, %v1313_v23 }
 0x8a3   : > { %v1315_v25 = vsub.f32 1.5, %v1314_v24 }
 0x8a5   : > { %v1316_v26 = vmul.f32 %v1676_v21, %v1315_v25 }
 0x8a7   : > { %v1320_v28 = vsel %vm1319_vm15, %v1676_v21, %v1316_v26 }
 0x8a8   : > { %v1321_v29 = vmul.f32 %v1320_v28, %v1304_v15 }
 0x8aa   : > { %v1325_v30 = vmul.f32 %v1649_v27, %v1321_v29 }
 0x8ac   : > { %v1329_v35 = vadd.f32 %v1650_v9, %v1325_v30 }
 0x8ae   : > { %v1330_v31 = vpack.c.bf16 %v1329_v35, %v1329_v35 }
 0x8b0   : > { %1332 = vst.msk [vmem:[%s695_s4] sm:$0xf] %vm1331_vm0, %v1330_v31 }
 0x8b1   : > { %1764 = shalt.err (!%p1761_p13)
}
 0x8b2   : > { %1568 = dma.vmem_to_hbm [thread:$0]  (%p1988_p9), %s1348_s30, 64, %s1350_s0, %s1334_s21  }
 0x8b3 PF: > { %s2291_s20 = sld [smem:[#allocation12_spill]]  ;;  %p1578_p0 = pnand %p1451_p12, %p1995_p11 }
 0x8b5   : > { %p1579_p1 = pneg %p1578_p0 }
 0x8b9   : > { %s1361_s24 = sand.u32 1, %s2291_s20  }
 0x8ba   : > { %s1362_s23 = scalar_lea.sflag [#allocation5], %s1361_s24 }
 0x8bb   : > { %1798 = dma.done.wait (%p1579_p1), %s1362_s23, 64  }
 0x8bc   : > { %1800 = vsyncadd (%p1579_p1), %s1362_s23, 4294967232  ;;  %s39_s25 = sadd.s32 1, %s1823_s25   ;;  %s2293_s15 = sld [smem:[#allocation13_spill]] }
 0x8bd   : > { %p36_p2 = scmp.ge.s32.totalorder %s39_s25, 4   ;;  %s2294_s23 = sld [smem:[#allocation17_spill]] }
 0x8be   : > { %s2295_s4 = sld [smem:[#allocation15_spill]]  ;;  %s2296_s1 = smov %s1807_s22 }
 0x8bf   : > { %s2298_s24 = smov %s1819_s2 }
 0x8c0   :  { %38 = sbr.rel (!%p36_p2) target bundleno = 21 (0x15), region = 158 }
 0x8c2   : > { %s2297_s22 = smov %s2293_s15 }
 0x8c4   : > { %s2299_s2 = smov %s2295_s4 }
 0x8c5   :  { %1368 = vsyncpa [#allocation4], 1 }
 0x8c6   :  { %1370 = vsyncpa [#allocation4 + $0x1], 1 }
 0x8c7   :  { %1371 = vsyncpa [#allocation7], 1 }
 0x8c8   :  { %1373 = vsyncpa [#allocation7 + $0x1], 1 }
 0x8c9   :  { %1374 = vsyncpa [#allocation5], 1 }
 0x8ca   :  { %1376 = vsyncpa [#allocation5 + $0x1], 1 }

</bundles_post_ra>
